<compile_context>
chip_gen: v6e
topology: v6e:2x2x1
jax: 0.10.0
libtpu: 0.0.40
codegen_flags: <defaults>
</compile_context>

<pallas_src>
import jax
import jax.numpy as jnp
from jax.experimental import pallas as pl
from jax.experimental.pallas import tpu as pltpu

NUM_CLASSES = 10          # dc.num_classes / target_class = range(10)
HIDDEN = 32               # synthetic unet hidden width
ALPHA_BAR = 0.5           # fixed diffusion timestep
SQRT_AB = ALPHA_BAR ** 0.5
SQRT_1MAB = (1.0 - ALPHA_BAR) ** 0.5
OUT_PAD = 128             # lane-dense padded output width (sliced to NUM_CLASSES)
MAX_TILE = 8              # instances per grid step for batch > MAX_TILE (multiple of 8)


def _dc_kernel(x_ref, eps_ref, w1t_ref, embbt_ref, w2t_ref, b2t_ref, out_ref):
    # x_ref / eps_ref block: (C, N) with N = b_tile * P (instances packed on lanes)
    # out_ref block: (b_tile, OUT_PAD)
    w1t = w1t_ref[...]        # (HIDDEN, C)
    embbt = embbt_ref[...]    # (HIDDEN, NUM_CLASSES), b1 already folded in
    w2t = w2t_ref[...]        # (C, HIDDEN)
    b2t = b2t_ref[...]        # (C, 1)

    c_dim, n_dim = x_ref.shape
    b_tile = out_ref.shape[0]
    p_dim = n_dim // b_tile
    inv_n = -1.0 / float(c_dim * p_dim)            # fold mean + (loss * -1) sign

    x = x_ref[...]                                 # (C, N), raw input in [0, 1]
    eps = eps_ref[...]                             # (C, N), shared noise (share_noise=True)

    # xt = sqrt(ab) * ((x - 0.5) * 2) + sqrt(1 - ab) * eps, constants folded
    xt = (2.0 * SQRT_AB) * x + SQRT_1MAB * eps - SQRT_AB
    # fold the output bias b2 into the regression target once per grid step
    e = eps - b2t                                  # (C, N)

    # first projection (K = C is tiny): C lane-dense VPU FMAs over ALL instances
    # at once; keeps the MXU free for the second projection.
    h0 = w1t[:, 0:1] * xt[0:1, :]                  # (HIDDEN, N)
    for c in range(1, c_dim):
        h0 = h0 + w1t[:, c:c + 1] * xt[c:c + 1, :]

    row = jax.lax.broadcasted_iota(jnp.int32, (b_tile, OUT_PAD), 0)
    lane = jax.lax.broadcasted_iota(jnp.int32, (b_tile, OUT_PAD), 1)
    row_masks = [row == b for b in range(b_tile)]  # hoisted: built once per grid step

    acc = jnp.zeros((b_tile, OUT_PAD), jnp.float32)
    # mirrors `for class_id in self.target_class:` in get_one_instance_prediction
    for cls in range(NUM_CLASSES):
        h = h0 + embbt[:, cls:cls + 1]             # class conditioning (b1 folded in)
        # SiLU with the division as a single approximate EUP vrcp (kernel is EUP-bound).
        # TODO(synk): on v6e/v7x this SiLU path could run in bf16 (bf16 VPU/EUP) for ~2x;
        # kept f32 so the same kernel is also optimal on v5e and stays near the reference.
        s = pl.reciprocal(1.0 + jnp.exp(-h), approx=True)
        h = h * s                                  # (HIDDEN, N), lane-dense
        # second projection: ONE batched MXU matmul per class over all N lanes
        pred = jnp.dot(w2t, h, preferred_element_type=jnp.float32)   # (C, N)
        d = pred - e
        colsum = jnp.sum(d * d, axis=0, keepdims=True)               # (1, N)
        lmask = lane == cls
        for b in range(b_tile):
            # per-instance MSE from a static 256-lane-aligned slice
            sb = jnp.sum(colsum[:, b * p_dim:(b + 1) * p_dim])
            acc = acc + jnp.where(row_masks[b] & lmask, inv_n * sb, 0.0)

    out_ref[...] = acc        # single full-tile unmasked store per grid step


def _plan_grid(batch: int):
    """Return (b_tile, n_steps, padded_batch).

    batch <= 8 : one grid step with b_tile = batch (per-step overhead dominates tiny
                 batches; ideal on single-TensorCore v5e/v6e, negligible cost on v7x).
    batch  > 8 : b_tile = 8 (multiple of 8 -> legal output sublane block), >= 2
                 'parallel' grid steps so both v7x TensorCores get work; batch is
                 padded to a multiple of 8 and padded rows are sliced off later.
    """
    if batch <= MAX_TILE:
        return batch, 1, batch
    n_steps = -(-batch // MAX_TILE)
    return MAX_TILE, n_steps, MAX_TILE * n_steps


def diffusion_classifier_forward(x_nchw, eps_nchw, params):
    """x_nchw: (B, C, H, W) float32 in [0,1]; eps_nchw: per-instance shared noise.
    Returns logits (B, NUM_CLASSES) = -MSE diffusion loss per class."""
    B, C, H, W = x_nchw.shape
    P = H * W
    b_tile, n_steps, b_pad = _plan_grid(B)

    x = x_nchw.reshape(B, C, P)
    eps = eps_nchw.reshape(B, C, P)
    if b_pad != B:
        padw = ((0, b_pad - B), (0, 0), (0, 0))
        x = jnp.pad(x, padw)
        eps = jnp.pad(eps, padw)

    # lane-batched channels-first layout: (C, b_pad*P). One tiny XLA transpose of
    # KB-scale inputs; inside the kernel every op is then lane-dense over b_tile*P
    # lanes with no per-instance unrolling of the class loop / SiLU / matmul.
    x_cn = x.transpose(1, 0, 2).reshape(C, b_pad * P)
    eps_cn = eps.transpose(1, 0, 2).reshape(C, b_pad * P)

    w1, b1, emb, w2, b2 = params
    w1t = jnp.transpose(w1)            # (HIDDEN, C)
    embbt = jnp.transpose(emb + b1)    # (HIDDEN, NUM_CLASSES), fold b1 into class emb
    w2t = jnp.transpose(w2)            # (C, HIDDEN)
    b2t = jnp.transpose(b2)            # (C, 1)

    out_padded = pl.pallas_call(
        _dc_kernel,
        out_shape=jax.ShapeDtypeStruct((b_pad, OUT_PAD), jnp.float32),
        grid_spec=pltpu.PrefetchScalarGridSpec(
            num_scalar_prefetch=0,
            grid=(n_steps,),
            in_specs=[
                pl.BlockSpec((C, b_tile * P), lambda i: (0, i)),          # x (lane-batched)
                pl.BlockSpec((C, b_tile * P), lambda i: (0, i)),          # eps
                pl.BlockSpec((HIDDEN, C), lambda i: (0, 0)),              # w1^T
                pl.BlockSpec((HIDDEN, NUM_CLASSES), lambda i: (0, 0)),    # (emb+b1)^T
                pl.BlockSpec((C, HIDDEN), lambda i: (0, 0)),              # w2^T
                pl.BlockSpec((C, 1), lambda i: (0, 0)),                   # b2^T
            ],
            out_specs=pl.BlockSpec((b_tile, OUT_PAD), lambda i: (i, 0)),
        ),
        compiler_params=pltpu.CompilerParams(dimension_semantics=("parallel",)),
    )(x_cn, eps_cn, w1t, embbt, w2t, b2t)

    # preserve the (B, num_classes) contract of the PyTorch module; drop batch/lane pad
    return out_padded[:B, :NUM_CLASSES]


def reference_forward(x_nchw, eps_nchw, params):
    """Pure-JAX reference of the same forward semantics (exact sigmoid)."""
    B, C, H, W = x_nchw.shape
    P = H * W
    x = x_nchw.reshape(B, C, P)
    eps = eps_nchw.reshape(B, C, P)
    w1, b1, emb, w2, b2 = params
    x0 = (x - 0.5) * 2.0
    xt = SQRT_AB * x0 + SQRT_1MAB * eps                                   # (B, C, P)
    h0 = jnp.einsum("ch,bcp->bhp", w1, xt) + b1[0][None, :, None]         # (B, Hd, P)
    h = h0[:, None] + emb[None, :, :, None]                               # (B, NC, Hd, P)
    h = h * jax.nn.sigmoid(h)
    pred = jnp.einsum("hc,bnhp->bncp", w2, h) + b2[0][None, None, :, None]
    mse = jnp.mean((pred - eps[:, None]) ** 2, axis=(2, 3))               # (B, NC)
    return -mse


if __name__ == "__main__":
    key = jax.random.PRNGKey(0)
    k_x, k_eps, k_w1, k_b1, k_emb, k_w2, k_b2 = jax.random.split(key, 7)

    B, C, H, W = 2, 4, 16, 16
    x = jax.random.uniform(k_x, (B, C, H, W), dtype=jnp.float32)
    # share_noise=True: one noise tensor per instance, reused for all classes
    eps = jax.random.normal(k_eps, (B, C, H, W), dtype=jnp.float32)

    # deterministic synthetic unet parameters (precision = float32)
    w1 = 0.1 * jax.random.normal(k_w1, (C, HIDDEN), dtype=jnp.float32)
    b1 = 0.1 * jax.random.normal(k_b1, (1, HIDDEN), dtype=jnp.float32)
    emb = 0.1 * jax.random.normal(k_emb, (NUM_CLASSES, HIDDEN), dtype=jnp.float32)
    w2 = 0.1 * jax.random.normal(k_w2, (HIDDEN, C), dtype=jnp.float32)
    b2 = 0.1 * jax.random.normal(k_b2, (1, C), dtype=jnp.float32)
    params = (w1, b1, emb, w2, b2)

    # tolerance relaxed from 1e-5 because the kernel uses the approximate EUP
    # reciprocal (~12-bit mantissa) inside SiLU; MSE accumulation stays in f32.
    TOL = 2e-3

    out = diffusion_classifier_forward(x, eps, params)
    out = jax.block_until_ready(out)
    ref = reference_forward(x, eps, params)
    assert out.shape == (B, NUM_CLASSES) and out.dtype == jnp.float32
    assert jnp.allclose(out, ref, atol=TOL, rtol=TOL), (out, ref)

    # also exercise the non-divisible-batch path (pads 10 -> 16, two grid steps)
    B2 = 10
    k_x2, k_eps2 = jax.random.split(jax.random.PRNGKey(1), 2)
    x2 = jax.random.uniform(k_x2, (B2, C, H, W), dtype=jnp.float32)
    eps2 = jax.random.normal(k_eps2, (B2, C, H, W), dtype=jnp.float32)
    out2 = jax.block_until_ready(diffusion_classifier_forward(x2, eps2, params))
    ref2 = reference_forward(x2, eps2, params)
    assert out2.shape == (B2, NUM_CLASSES)
    assert jnp.allclose(out2, ref2, atol=TOL, rtol=TOL), (out2, ref2)

    print("KERNEL_OK")
</pallas_src>

<mosaic_0001>
module attributes {stable_mosaic.version = 11 : i64} {
  func.func @_dc_kernel(%arg0: i32, %arg1: memref<4x512xf32, #tpu.memory_space<vmem>>, %arg2: memref<4x512xf32, #tpu.memory_space<vmem>>, %arg3: memref<32x4xf32, #tpu.memory_space<vmem>>, %arg4: memref<32x10xf32, #tpu.memory_space<vmem>>, %arg5: memref<4x32xf32, #tpu.memory_space<vmem>>, %arg6: memref<4x1xf32, #tpu.memory_space<vmem>>, %arg7: memref<2x128xf32, #tpu.memory_space<vmem>>) attributes {dimension_semantics = [#tpu.dimension_semantics<parallel>], iteration_bounds = array<i64: 1>, scalar_prefetch = 0 : i64, scratch_operands = 0 : i64, tpu.core_type = #tpu.core_type<tc>, window_params = [{transform_indices = @transform_0, window_bounds = array<i64: 4, 512>}, {transform_indices = @transform_1, window_bounds = array<i64: 4, 512>}, {pipeline_mode = #tpu.pipeline_mode<synchronous>, transform_indices = @transform_2, window_bounds = array<i64: 32, 4>}, {pipeline_mode = #tpu.pipeline_mode<synchronous>, transform_indices = @transform_3, window_bounds = array<i64: 32, 10>}, {pipeline_mode = #tpu.pipeline_mode<synchronous>, transform_indices = @transform_4, window_bounds = array<i64: 4, 32>}, {pipeline_mode = #tpu.pipeline_mode<synchronous>, transform_indices = @transform_5, window_bounds = array<i64: 4, 1>}, {transform_indices = @transform_6, window_bounds = array<i64: 2, 128>}]} {
    %c0 = arith.constant 0 : index
    %c0_0 = arith.constant 0 : index
    %0 = vector.load %arg3[%c0, %c0_0] : memref<32x4xf32, #tpu.memory_space<vmem>>, vector<32x4xf32>
    %c0_1 = arith.constant 0 : index
    %c0_2 = arith.constant 0 : index
    %1 = vector.load %arg4[%c0_1, %c0_2] : memref<32x10xf32, #tpu.memory_space<vmem>>, vector<32x10xf32>
    %c0_3 = arith.constant 0 : index
    %c0_4 = arith.constant 0 : index
    %2 = vector.load %arg5[%c0_3, %c0_4] : memref<4x32xf32, #tpu.memory_space<vmem>>, vector<4x32xf32>
    %c0_5 = arith.constant 0 : index
    %c0_6 = arith.constant 0 : index
    %3 = vector.load %arg6[%c0_5, %c0_6] : memref<4x1xf32, #tpu.memory_space<vmem>>, vector<4x1xf32>
    %c0_7 = arith.constant 0 : index
    %c0_8 = arith.constant 0 : index
    %4 = vector.load %arg1[%c0_7, %c0_8] : memref<4x512xf32, #tpu.memory_space<vmem>>, vector<4x512xf32>
    %c0_9 = arith.constant 0 : index
    %c0_10 = arith.constant 0 : index
    %5 = vector.load %arg2[%c0_9, %c0_10] : memref<4x512xf32, #tpu.memory_space<vmem>>, vector<4x512xf32>
    %cst = arith.constant 1.41421354 : f32
    %6 = vector.broadcast %cst : f32 to vector<4x512xf32>
    %7 = arith.mulf %6, %4 : vector<4x512xf32>
    %cst_11 = arith.constant 0.707106769 : f32
    %8 = vector.broadcast %cst_11 : f32 to vector<4x512xf32>
    %9 = arith.mulf %8, %5 : vector<4x512xf32>
    %10 = arith.addf %7, %9 : vector<4x512xf32>
    %cst_12 = arith.constant 0.707106769 : f32
    %11 = vector.broadcast %cst_12 : f32 to vector<4x512xf32>
    %12 = arith.subf %10, %11 : vector<4x512xf32>
    %13 = vector.broadcast %3 : vector<4x1xf32> to vector<4x512xf32>
    %14 = arith.subf %5, %13 : vector<4x512xf32>
    %15 = vector.extract_strided_slice %0 {offsets = [0, 0], sizes = [32, 1], strides = [1, 1]} : vector<32x4xf32> to vector<32x1xf32>
    %16 = vector.extract_strided_slice %12 {offsets = [0, 0], sizes = [1, 512], strides = [1, 1]} : vector<4x512xf32> to vector<1x512xf32>
    %17 = vector.broadcast %15 : vector<32x1xf32> to vector<32x512xf32>
    %18 = vector.broadcast %16 : vector<1x512xf32> to vector<32x512xf32>
    %19 = arith.mulf %17, %18 : vector<32x512xf32>
    %20 = vector.extract_strided_slice %0 {offsets = [0, 1], sizes = [32, 1], strides = [1, 1]} : vector<32x4xf32> to vector<32x1xf32>
    %21 = vector.extract_strided_slice %12 {offsets = [1, 0], sizes = [1, 512], strides = [1, 1]} : vector<4x512xf32> to vector<1x512xf32>
    %22 = vector.broadcast %20 : vector<32x1xf32> to vector<32x512xf32>
    %23 = vector.broadcast %21 : vector<1x512xf32> to vector<32x512xf32>
    %24 = arith.mulf %22, %23 : vector<32x512xf32>
    %25 = arith.addf %19, %24 : vector<32x512xf32>
    %26 = vector.extract_strided_slice %0 {offsets = [0, 2], sizes = [32, 1], strides = [1, 1]} : vector<32x4xf32> to vector<32x1xf32>
    %27 = vector.extract_strided_slice %12 {offsets = [2, 0], sizes = [1, 512], strides = [1, 1]} : vector<4x512xf32> to vector<1x512xf32>
    %28 = vector.broadcast %26 : vector<32x1xf32> to vector<32x512xf32>
    %29 = vector.broadcast %27 : vector<1x512xf32> to vector<32x512xf32>
    %30 = arith.mulf %28, %29 : vector<32x512xf32>
    %31 = arith.addf %25, %30 : vector<32x512xf32>
    %32 = vector.extract_strided_slice %0 {offsets = [0, 3], sizes = [32, 1], strides = [1, 1]} : vector<32x4xf32> to vector<32x1xf32>
    %33 = vector.extract_strided_slice %12 {offsets = [3, 0], sizes = [1, 512], strides = [1, 1]} : vector<4x512xf32> to vector<1x512xf32>
    %34 = vector.broadcast %32 : vector<32x1xf32> to vector<32x512xf32>
    %35 = vector.broadcast %33 : vector<1x512xf32> to vector<32x512xf32>
    %36 = arith.mulf %34, %35 : vector<32x512xf32>
    %37 = arith.addf %31, %36 : vector<32x512xf32>
    %38 = tpu.iota {dimensions = array<i32: 0>} : vector<2x128xi32>
    %39 = tpu.iota {dimensions = array<i32: 1>} : vector<2x128xi32>
    %c0_i32 = arith.constant 0 : i32
    %40 = vector.broadcast %c0_i32 : i32 to vector<2x128xi32>
    %41 = arith.cmpi eq, %38, %40 : vector<2x128xi32>
    %c1_i32 = arith.constant 1 : i32
    %42 = vector.broadcast %c1_i32 : i32 to vector<2x128xi32>
    %43 = arith.cmpi eq, %38, %42 : vector<2x128xi32>
    %cst_13 = arith.constant 0.000000e+00 : f32
    %44 = vector.broadcast %cst_13 : f32 to vector<2x128xf32>
    %45 = vector.extract_strided_slice %1 {offsets = [0, 0], sizes = [32, 1], strides = [1, 1]} : vector<32x10xf32> to vector<32x1xf32>
    %46 = vector.broadcast %45 : vector<32x1xf32> to vector<32x512xf32>
    %47 = arith.addf %37, %46 : vector<32x512xf32>
    %cst_14 = arith.constant 0.000000e+00 : f32
    %48 = vector.broadcast %cst_14 : f32 to vector<32x512xf32>
    %49 = arith.subf %48, %47 : vector<32x512xf32>
    %50 = math.exp %49 : vector<32x512xf32>
    %cst_15 = arith.constant 1.000000e+00 : f32
    %51 = vector.broadcast %cst_15 : f32 to vector<32x512xf32>
    %52 = arith.addf %51, %50 : vector<32x512xf32>
    %53 = tpu.reciprocal %52 {approx = true} : vector<32x512xf32> -> vector<32x512xf32>
    %54 = arith.mulf %47, %53 : vector<32x512xf32>
    %cst_16 = arith.constant dense<0.000000e+00> : vector<4x512xf32>
    %55 = tpu.matmul %2, %54, %cst_16 {dimension_numbers = #tpu.dot_dimension_numbers<[1], [0], [0], [1], [0, 0, 1, 1], [], []>} : vector<4x32xf32>, vector<32x512xf32>, vector<4x512xf32> -> vector<4x512xf32>
    %56 = arith.subf %55, %14 : vector<4x512xf32>
    %57 = arith.mulf %56, %56 : vector<4x512xf32>
    %cst_17 = arith.constant dense<0.000000e+00> : vector<512xf32>
    %58 = vector.multi_reduction <add>, %57, %cst_17 [0] : vector<4x512xf32> to vector<512xf32>
    %59 = vector.shape_cast %58 : vector<512xf32> to vector<1x512xf32>
    %c0_i32_18 = arith.constant 0 : i32
    %60 = vector.broadcast %c0_i32_18 : i32 to vector<2x128xi32>
    %61 = arith.cmpi eq, %39, %60 : vector<2x128xi32>
    %62 = vector.extract_strided_slice %59 {offsets = [0, 0], sizes = [1, 256], strides = [1, 1]} : vector<1x512xf32> to vector<1x256xf32>
    %63 = vector.shape_cast %62 : vector<1x256xf32> to vector<1x1x256xf32>
    %cst_19 = arith.constant dense<0.000000e+00> : vector<1xf32>
    %64 = vector.multi_reduction <add>, %63, %cst_19 [1, 2] : vector<1x1x256xf32> to vector<1xf32>
    %65 = vector.shape_cast %64 : vector<1xf32> to vector<1x1x1xf32>
    %66 = vector.extract %65[0, 0, 0] : f32 from vector<1x1x1xf32>
    %67 = arith.andi %41, %61 : vector<2x128xi1>
    %cst_20 = arith.constant -9.765625E-4 : f32
    %68 = arith.mulf %cst_20, %66 : f32
    %cst_21 = arith.constant 0.000000e+00 : f32
    %69 = vector.broadcast %68 : f32 to vector<2x128xf32>
    %70 = vector.broadcast %cst_21 : f32 to vector<2x128xf32>
    %71 = arith.select %67, %69, %70 : vector<2x128xi1>, vector<2x128xf32>
    %72 = arith.addf %44, %71 : vector<2x128xf32>
    %73 = vector.extract_strided_slice %59 {offsets = [0, 256], sizes = [1, 256], strides = [1, 1]} : vector<1x512xf32> to vector<1x256xf32>
    %74 = vector.shape_cast %73 : vector<1x256xf32> to vector<1x1x256xf32>
    %cst_22 = arith.constant dense<0.000000e+00> : vector<1xf32>
    %75 = vector.multi_reduction <add>, %74, %cst_22 [1, 2] : vector<1x1x256xf32> to vector<1xf32>
    %76 = vector.shape_cast %75 : vector<1xf32> to vector<1x1x1xf32>
    %77 = vector.extract %76[0, 0, 0] : f32 from vector<1x1x1xf32>
    %78 = arith.andi %43, %61 : vector<2x128xi1>
    %cst_23 = arith.constant -9.765625E-4 : f32
    %79 = arith.mulf %cst_23, %77 : f32
    %cst_24 = arith.constant 0.000000e+00 : f32
    %80 = vector.broadcast %79 : f32 to vector<2x128xf32>
    %81 = vector.broadcast %cst_24 : f32 to vector<2x128xf32>
    %82 = arith.select %78, %80, %81 : vector<2x128xi1>, vector<2x128xf32>
    %83 = arith.addf %72, %82 : vector<2x128xf32>
    %84 = vector.extract_strided_slice %1 {offsets = [0, 1], sizes = [32, 1], strides = [1, 1]} : vector<32x10xf32> to vector<32x1xf32>
    %85 = vector.broadcast %84 : vector<32x1xf32> to vector<32x512xf32>
    %86 = arith.addf %37, %85 : vector<32x512xf32>
    %cst_25 = arith.constant 0.000000e+00 : f32
    %87 = vector.broadcast %cst_25 : f32 to vector<32x512xf32>
    %88 = arith.subf %87, %86 : vector<32x512xf32>
    %89 = math.exp %88 : vector<32x512xf32>
    %cst_26 = arith.constant 1.000000e+00 : f32
    %90 = vector.broadcast %cst_26 : f32 to vector<32x512xf32>
    %91 = arith.addf %90, %89 : vector<32x512xf32>
    %92 = tpu.reciprocal %91 {approx = true} : vector<32x512xf32> -> vector<32x512xf32>
    %93 = arith.mulf %86, %92 : vector<32x512xf32>
    %cst_27 = arith.constant dense<0.000000e+00> : vector<4x512xf32>
    %94 = tpu.matmul %2, %93, %cst_27 {dimension_numbers = #tpu.dot_dimension_numbers<[1], [0], [0], [1], [0, 0, 1, 1], [], []>} : vector<4x32xf32>, vector<32x512xf32>, vector<4x512xf32> -> vector<4x512xf32>
    %95 = arith.subf %94, %14 : vector<4x512xf32>
    %96 = arith.mulf %95, %95 : vector<4x512xf32>
    %cst_28 = arith.constant dense<0.000000e+00> : vector<512xf32>
    %97 = vector.multi_reduction <add>, %96, %cst_28 [0] : vector<4x512xf32> to vector<512xf32>
    %98 = vector.shape_cast %97 : vector<512xf32> to vector<1x512xf32>
    %c1_i32_29 = arith.constant 1 : i32
    %99 = vector.broadcast %c1_i32_29 : i32 to vector<2x128xi32>
    %100 = arith.cmpi eq, %39, %99 : vector<2x128xi32>
    %101 = vector.extract_strided_slice %98 {offsets = [0, 0], sizes = [1, 256], strides = [1, 1]} : vector<1x512xf32> to vector<1x256xf32>
    %102 = vector.shape_cast %101 : vector<1x256xf32> to vector<1x1x256xf32>
    %cst_30 = arith.constant dense<0.000000e+00> : vector<1xf32>
    %103 = vector.multi_reduction <add>, %102, %cst_30 [1, 2] : vector<1x1x256xf32> to vector<1xf32>
    %104 = vector.shape_cast %103 : vector<1xf32> to vector<1x1x1xf32>
    %105 = vector.extract %104[0, 0, 0] : f32 from vector<1x1x1xf32>
    %106 = arith.andi %41, %100 : vector<2x128xi1>
    %cst_31 = arith.constant -9.765625E-4 : f32
    %107 = arith.mulf %cst_31, %105 : f32
    %cst_32 = arith.constant 0.000000e+00 : f32
    %108 = vector.broadcast %107 : f32 to vector<2x128xf32>
    %109 = vector.broadcast %cst_32 : f32 to vector<2x128xf32>
    %110 = arith.select %106, %108, %109 : vector<2x128xi1>, vector<2x128xf32>
    %111 = arith.addf %83, %110 : vector<2x128xf32>
    %112 = vector.extract_strided_slice %98 {offsets = [0, 256], sizes = [1, 256], strides = [1, 1]} : vector<1x512xf32> to vector<1x256xf32>
    %113 = vector.shape_cast %112 : vector<1x256xf32> to vector<1x1x256xf32>
    %cst_33 = arith.constant dense<0.000000e+00> : vector<1xf32>
    %114 = vector.multi_reduction <add>, %113, %cst_33 [1, 2] : vector<1x1x256xf32> to vector<1xf32>
    %115 = vector.shape_cast %114 : vector<1xf32> to vector<1x1x1xf32>
    %116 = vector.extract %115[0, 0, 0] : f32 from vector<1x1x1xf32>
    %117 = arith.andi %43, %100 : vector<2x128xi1>
    %cst_34 = arith.constant -9.765625E-4 : f32
    %118 = arith.mulf %cst_34, %116 : f32
    %cst_35 = arith.constant 0.000000e+00 : f32
    %119 = vector.broadcast %118 : f32 to vector<2x128xf32>
    %120 = vector.broadcast %cst_35 : f32 to vector<2x128xf32>
    %121 = arith.select %117, %119, %120 : vector<2x128xi1>, vector<2x128xf32>
    %122 = arith.addf %111, %121 : vector<2x128xf32>
    %123 = vector.extract_strided_slice %1 {offsets = [0, 2], sizes = [32, 1], strides = [1, 1]} : vector<32x10xf32> to vector<32x1xf32>
    %124 = vector.broadcast %123 : vector<32x1xf32> to vector<32x512xf32>
    %125 = arith.addf %37, %124 : vector<32x512xf32>
    %cst_36 = arith.constant 0.000000e+00 : f32
    %126 = vector.broadcast %cst_36 : f32 to vector<32x512xf32>
    %127 = arith.subf %126, %125 : vector<32x512xf32>
    %128 = math.exp %127 : vector<32x512xf32>
    %cst_37 = arith.constant 1.000000e+00 : f32
    %129 = vector.broadcast %cst_37 : f32 to vector<32x512xf32>
    %130 = arith.addf %129, %128 : vector<32x512xf32>
    %131 = tpu.reciprocal %130 {approx = true} : vector<32x512xf32> -> vector<32x512xf32>
    %132 = arith.mulf %125, %131 : vector<32x512xf32>
    %cst_38 = arith.constant dense<0.000000e+00> : vector<4x512xf32>
    %133 = tpu.matmul %2, %132, %cst_38 {dimension_numbers = #tpu.dot_dimension_numbers<[1], [0], [0], [1], [0, 0, 1, 1], [], []>} : vector<4x32xf32>, vector<32x512xf32>, vector<4x512xf32> -> vector<4x512xf32>
    %134 = arith.subf %133, %14 : vector<4x512xf32>
    %135 = arith.mulf %134, %134 : vector<4x512xf32>
    %cst_39 = arith.constant dense<0.000000e+00> : vector<512xf32>
    %136 = vector.multi_reduction <add>, %135, %cst_39 [0] : vector<4x512xf32> to vector<512xf32>
    %137 = vector.shape_cast %136 : vector<512xf32> to vector<1x512xf32>
    %c2_i32 = arith.constant 2 : i32
    %138 = vector.broadcast %c2_i32 : i32 to vector<2x128xi32>
    %139 = arith.cmpi eq, %39, %138 : vector<2x128xi32>
    %140 = vector.extract_strided_slice %137 {offsets = [0, 0], sizes = [1, 256], strides = [1, 1]} : vector<1x512xf32> to vector<1x256xf32>
    %141 = vector.shape_cast %140 : vector<1x256xf32> to vector<1x1x256xf32>
    %cst_40 = arith.constant dense<0.000000e+00> : vector<1xf32>
    %142 = vector.multi_reduction <add>, %141, %cst_40 [1, 2] : vector<1x1x256xf32> to vector<1xf32>
    %143 = vector.shape_cast %142 : vector<1xf32> to vector<1x1x1xf32>
    %144 = vector.extract %143[0, 0, 0] : f32 from vector<1x1x1xf32>
    %145 = arith.andi %41, %139 : vector<2x128xi1>
    %cst_41 = arith.constant -9.765625E-4 : f32
    %146 = arith.mulf %cst_41, %144 : f32
    %cst_42 = arith.constant 0.000000e+00 : f32
    %147 = vector.broadcast %146 : f32 to vector<2x128xf32>
    %148 = vector.broadcast %cst_42 : f32 to vector<2x128xf32>
    %149 = arith.select %145, %147, %148 : vector<2x128xi1>, vector<2x128xf32>
    %150 = arith.addf %122, %149 : vector<2x128xf32>
    %151 = vector.extract_strided_slice %137 {offsets = [0, 256], sizes = [1, 256], strides = [1, 1]} : vector<1x512xf32> to vector<1x256xf32>
    %152 = vector.shape_cast %151 : vector<1x256xf32> to vector<1x1x256xf32>
    %cst_43 = arith.constant dense<0.000000e+00> : vector<1xf32>
    %153 = vector.multi_reduction <add>, %152, %cst_43 [1, 2] : vector<1x1x256xf32> to vector<1xf32>
    %154 = vector.shape_cast %153 : vector<1xf32> to vector<1x1x1xf32>
    %155 = vector.extract %154[0, 0, 0] : f32 from vector<1x1x1xf32>
    %156 = arith.andi %43, %139 : vector<2x128xi1>
    %cst_44 = arith.constant -9.765625E-4 : f32
    %157 = arith.mulf %cst_44, %155 : f32
    %cst_45 = arith.constant 0.000000e+00 : f32
    %158 = vector.broadcast %157 : f32 to vector<2x128xf32>
    %159 = vector.broadcast %cst_45 : f32 to vector<2x128xf32>
    %160 = arith.select %156, %158, %159 : vector<2x128xi1>, vector<2x128xf32>
    %161 = arith.addf %150, %160 : vector<2x128xf32>
    %162 = vector.extract_strided_slice %1 {offsets = [0, 3], sizes = [32, 1], strides = [1, 1]} : vector<32x10xf32> to vector<32x1xf32>
    %163 = vector.broadcast %162 : vector<32x1xf32> to vector<32x512xf32>
    %164 = arith.addf %37, %163 : vector<32x512xf32>
    %cst_46 = arith.constant 0.000000e+00 : f32
    %165 = vector.broadcast %cst_46 : f32 to vector<32x512xf32>
    %166 = arith.subf %165, %164 : vector<32x512xf32>
    %167 = math.exp %166 : vector<32x512xf32>
    %cst_47 = arith.constant 1.000000e+00 : f32
    %168 = vector.broadcast %cst_47 : f32 to vector<32x512xf32>
    %169 = arith.addf %168, %167 : vector<32x512xf32>
    %170 = tpu.reciprocal %169 {approx = true} : vector<32x512xf32> -> vector<32x512xf32>
    %171 = arith.mulf %164, %170 : vector<32x512xf32>
    %cst_48 = arith.constant dense<0.000000e+00> : vector<4x512xf32>
    %172 = tpu.matmul %2, %171, %cst_48 {dimension_numbers = #tpu.dot_dimension_numbers<[1], [0], [0], [1], [0, 0, 1, 1], [], []>} : vector<4x32xf32>, vector<32x512xf32>, vector<4x512xf32> -> vector<4x512xf32>
    %173 = arith.subf %172, %14 : vector<4x512xf32>
    %174 = arith.mulf %173, %173 : vector<4x512xf32>
    %cst_49 = arith.constant dense<0.000000e+00> : vector<512xf32>
    %175 = vector.multi_reduction <add>, %174, %cst_49 [0] : vector<4x512xf32> to vector<512xf32>
    %176 = vector.shape_cast %175 : vector<512xf32> to vector<1x512xf32>
    %c3_i32 = arith.constant 3 : i32
    %177 = vector.broadcast %c3_i32 : i32 to vector<2x128xi32>
    %178 = arith.cmpi eq, %39, %177 : vector<2x128xi32>
    %179 = vector.extract_strided_slice %176 {offsets = [0, 0], sizes = [1, 256], strides = [1, 1]} : vector<1x512xf32> to vector<1x256xf32>
    %180 = vector.shape_cast %179 : vector<1x256xf32> to vector<1x1x256xf32>
    %cst_50 = arith.constant dense<0.000000e+00> : vector<1xf32>
    %181 = vector.multi_reduction <add>, %180, %cst_50 [1, 2] : vector<1x1x256xf32> to vector<1xf32>
    %182 = vector.shape_cast %181 : vector<1xf32> to vector<1x1x1xf32>
    %183 = vector.extract %182[0, 0, 0] : f32 from vector<1x1x1xf32>
    %184 = arith.andi %41, %178 : vector<2x128xi1>
    %cst_51 = arith.constant -9.765625E-4 : f32
    %185 = arith.mulf %cst_51, %183 : f32
    %cst_52 = arith.constant 0.000000e+00 : f32
    %186 = vector.broadcast %185 : f32 to vector<2x128xf32>
    %187 = vector.broadcast %cst_52 : f32 to vector<2x128xf32>
    %188 = arith.select %184, %186, %187 : vector<2x128xi1>, vector<2x128xf32>
    %189 = arith.addf %161, %188 : vector<2x128xf32>
    %190 = vector.extract_strided_slice %176 {offsets = [0, 256], sizes = [1, 256], strides = [1, 1]} : vector<1x512xf32> to vector<1x256xf32>
    %191 = vector.shape_cast %190 : vector<1x256xf32> to vector<1x1x256xf32>
    %cst_53 = arith.constant dense<0.000000e+00> : vector<1xf32>
    %192 = vector.multi_reduction <add>, %191, %cst_53 [1, 2] : vector<1x1x256xf32> to vector<1xf32>
    %193 = vector.shape_cast %192 : vector<1xf32> to vector<1x1x1xf32>
    %194 = vector.extract %193[0, 0, 0] : f32 from vector<1x1x1xf32>
    %195 = arith.andi %43, %178 : vector<2x128xi1>
    %cst_54 = arith.constant -9.765625E-4 : f32
    %196 = arith.mulf %cst_54, %194 : f32
    %cst_55 = arith.constant 0.000000e+00 : f32
    %197 = vector.broadcast %196 : f32 to vector<2x128xf32>
    %198 = vector.broadcast %cst_55 : f32 to vector<2x128xf32>
    %199 = arith.select %195, %197, %198 : vector<2x128xi1>, vector<2x128xf32>
    %200 = arith.addf %189, %199 : vector<2x128xf32>
    %201 = vector.extract_strided_slice %1 {offsets = [0, 4], sizes = [32, 1], strides = [1, 1]} : vector<32x10xf32> to vector<32x1xf32>
    %202 = vector.broadcast %201 : vector<32x1xf32> to vector<32x512xf32>
    %203 = arith.addf %37, %202 : vector<32x512xf32>
    %cst_56 = arith.constant 0.000000e+00 : f32
    %204 = vector.broadcast %cst_56 : f32 to vector<32x512xf32>
    %205 = arith.subf %204, %203 : vector<32x512xf32>
    %206 = math.exp %205 : vector<32x512xf32>
    %cst_57 = arith.constant 1.000000e+00 : f32
    %207 = vector.broadcast %cst_57 : f32 to vector<32x512xf32>
    %208 = arith.addf %207, %206 : vector<32x512xf32>
    %209 = tpu.reciprocal %208 {approx = true} : vector<32x512xf32> -> vector<32x512xf32>
    %210 = arith.mulf %203, %209 : vector<32x512xf32>
    %cst_58 = arith.constant dense<0.000000e+00> : vector<4x512xf32>
    %211 = tpu.matmul %2, %210, %cst_58 {dimension_numbers = #tpu.dot_dimension_numbers<[1], [0], [0], [1], [0, 0, 1, 1], [], []>} : vector<4x32xf32>, vector<32x512xf32>, vector<4x512xf32> -> vector<4x512xf32>
    %212 = arith.subf %211, %14 : vector<4x512xf32>
    %213 = arith.mulf %212, %212 : vector<4x512xf32>
    %cst_59 = arith.constant dense<0.000000e+00> : vector<512xf32>
    %214 = vector.multi_reduction <add>, %213, %cst_59 [0] : vector<4x512xf32> to vector<512xf32>
    %215 = vector.shape_cast %214 : vector<512xf32> to vector<1x512xf32>
    %c4_i32 = arith.constant 4 : i32
    %216 = vector.broadcast %c4_i32 : i32 to vector<2x128xi32>
    %217 = arith.cmpi eq, %39, %216 : vector<2x128xi32>
    %218 = vector.extract_strided_slice %215 {offsets = [0, 0], sizes = [1, 256], strides = [1, 1]} : vector<1x512xf32> to vector<1x256xf32>
    %219 = vector.shape_cast %218 : vector<1x256xf32> to vector<1x1x256xf32>
    %cst_60 = arith.constant dense<0.000000e+00> : vector<1xf32>
    %220 = vector.multi_reduction <add>, %219, %cst_60 [1, 2] : vector<1x1x256xf32> to vector<1xf32>
    %221 = vector.shape_cast %220 : vector<1xf32> to vector<1x1x1xf32>
    %222 = vector.extract %221[0, 0, 0] : f32 from vector<1x1x1xf32>
    %223 = arith.andi %41, %217 : vector<2x128xi1>
    %cst_61 = arith.constant -9.765625E-4 : f32
    %224 = arith.mulf %cst_61, %222 : f32
    %cst_62 = arith.constant 0.000000e+00 : f32
    %225 = vector.broadcast %224 : f32 to vector<2x128xf32>
    %226 = vector.broadcast %cst_62 : f32 to vector<2x128xf32>
    %227 = arith.select %223, %225, %226 : vector<2x128xi1>, vector<2x128xf32>
    %228 = arith.addf %200, %227 : vector<2x128xf32>
    %229 = vector.extract_strided_slice %215 {offsets = [0, 256], sizes = [1, 256], strides = [1, 1]} : vector<1x512xf32> to vector<1x256xf32>
    %230 = vector.shape_cast %229 : vector<1x256xf32> to vector<1x1x256xf32>
    %cst_63 = arith.constant dense<0.000000e+00> : vector<1xf32>
    %231 = vector.multi_reduction <add>, %230, %cst_63 [1, 2] : vector<1x1x256xf32> to vector<1xf32>
    %232 = vector.shape_cast %231 : vector<1xf32> to vector<1x1x1xf32>
    %233 = vector.extract %232[0, 0, 0] : f32 from vector<1x1x1xf32>
    %234 = arith.andi %43, %217 : vector<2x128xi1>
    %cst_64 = arith.constant -9.765625E-4 : f32
    %235 = arith.mulf %cst_64, %233 : f32
    %cst_65 = arith.constant 0.000000e+00 : f32
    %236 = vector.broadcast %235 : f32 to vector<2x128xf32>
    %237 = vector.broadcast %cst_65 : f32 to vector<2x128xf32>
    %238 = arith.select %234, %236, %237 : vector<2x128xi1>, vector<2x128xf32>
    %239 = arith.addf %228, %238 : vector<2x128xf32>
    %240 = vector.extract_strided_slice %1 {offsets = [0, 5], sizes = [32, 1], strides = [1, 1]} : vector<32x10xf32> to vector<32x1xf32>
    %241 = vector.broadcast %240 : vector<32x1xf32> to vector<32x512xf32>
    %242 = arith.addf %37, %241 : vector<32x512xf32>
    %cst_66 = arith.constant 0.000000e+00 : f32
    %243 = vector.broadcast %cst_66 : f32 to vector<32x512xf32>
    %244 = arith.subf %243, %242 : vector<32x512xf32>
    %245 = math.exp %244 : vector<32x512xf32>
    %cst_67 = arith.constant 1.000000e+00 : f32
    %246 = vector.broadcast %cst_67 : f32 to vector<32x512xf32>
    %247 = arith.addf %246, %245 : vector<32x512xf32>
    %248 = tpu.reciprocal %247 {approx = true} : vector<32x512xf32> -> vector<32x512xf32>
    %249 = arith.mulf %242, %248 : vector<32x512xf32>
    %cst_68 = arith.constant dense<0.000000e+00> : vector<4x512xf32>
    %250 = tpu.matmul %2, %249, %cst_68 {dimension_numbers = #tpu.dot_dimension_numbers<[1], [0], [0], [1], [0, 0, 1, 1], [], []>} : vector<4x32xf32>, vector<32x512xf32>, vector<4x512xf32> -> vector<4x512xf32>
    %251 = arith.subf %250, %14 : vector<4x512xf32>
    %252 = arith.mulf %251, %251 : vector<4x512xf32>
    %cst_69 = arith.constant dense<0.000000e+00> : vector<512xf32>
    %253 = vector.multi_reduction <add>, %252, %cst_69 [0] : vector<4x512xf32> to vector<512xf32>
    %254 = vector.shape_cast %253 : vector<512xf32> to vector<1x512xf32>
    %c5_i32 = arith.constant 5 : i32
    %255 = vector.broadcast %c5_i32 : i32 to vector<2x128xi32>
    %256 = arith.cmpi eq, %39, %255 : vector<2x128xi32>
    %257 = vector.extract_strided_slice %254 {offsets = [0, 0], sizes = [1, 256], strides = [1, 1]} : vector<1x512xf32> to vector<1x256xf32>
    %258 = vector.shape_cast %257 : vector<1x256xf32> to vector<1x1x256xf32>
    %cst_70 = arith.constant dense<0.000000e+00> : vector<1xf32>
    %259 = vector.multi_reduction <add>, %258, %cst_70 [1, 2] : vector<1x1x256xf32> to vector<1xf32>
    %260 = vector.shape_cast %259 : vector<1xf32> to vector<1x1x1xf32>
    %261 = vector.extract %260[0, 0, 0] : f32 from vector<1x1x1xf32>
    %262 = arith.andi %41, %256 : vector<2x128xi1>
    %cst_71 = arith.constant -9.765625E-4 : f32
    %263 = arith.mulf %cst_71, %261 : f32
    %cst_72 = arith.constant 0.000000e+00 : f32
    %264 = vector.broadcast %263 : f32 to vector<2x128xf32>
    %265 = vector.broadcast %cst_72 : f32 to vector<2x128xf32>
    %266 = arith.select %262, %264, %265 : vector<2x128xi1>, vector<2x128xf32>
    %267 = arith.addf %239, %266 : vector<2x128xf32>
    %268 = vector.extract_strided_slice %254 {offsets = [0, 256], sizes = [1, 256], strides = [1, 1]} : vector<1x512xf32> to vector<1x256xf32>
    %269 = vector.shape_cast %268 : vector<1x256xf32> to vector<1x1x256xf32>
    %cst_73 = arith.constant dense<0.000000e+00> : vector<1xf32>
    %270 = vector.multi_reduction <add>, %269, %cst_73 [1, 2] : vector<1x1x256xf32> to vector<1xf32>
    %271 = vector.shape_cast %270 : vector<1xf32> to vector<1x1x1xf32>
    %272 = vector.extract %271[0, 0, 0] : f32 from vector<1x1x1xf32>
    %273 = arith.andi %43, %256 : vector<2x128xi1>
    %cst_74 = arith.constant -9.765625E-4 : f32
    %274 = arith.mulf %cst_74, %272 : f32
    %cst_75 = arith.constant 0.000000e+00 : f32
    %275 = vector.broadcast %274 : f32 to vector<2x128xf32>
    %276 = vector.broadcast %cst_75 : f32 to vector<2x128xf32>
    %277 = arith.select %273, %275, %276 : vector<2x128xi1>, vector<2x128xf32>
    %278 = arith.addf %267, %277 : vector<2x128xf32>
    %279 = vector.extract_strided_slice %1 {offsets = [0, 6], sizes = [32, 1], strides = [1, 1]} : vector<32x10xf32> to vector<32x1xf32>
    %280 = vector.broadcast %279 : vector<32x1xf32> to vector<32x512xf32>
    %281 = arith.addf %37, %280 : vector<32x512xf32>
    %cst_76 = arith.constant 0.000000e+00 : f32
    %282 = vector.broadcast %cst_76 : f32 to vector<32x512xf32>
    %283 = arith.subf %282, %281 : vector<32x512xf32>
    %284 = math.exp %283 : vector<32x512xf32>
    %cst_77 = arith.constant 1.000000e+00 : f32
    %285 = vector.broadcast %cst_77 : f32 to vector<32x512xf32>
    %286 = arith.addf %285, %284 : vector<32x512xf32>
    %287 = tpu.reciprocal %286 {approx = true} : vector<32x512xf32> -> vector<32x512xf32>
    %288 = arith.mulf %281, %287 : vector<32x512xf32>
    %cst_78 = arith.constant dense<0.000000e+00> : vector<4x512xf32>
    %289 = tpu.matmul %2, %288, %cst_78 {dimension_numbers = #tpu.dot_dimension_numbers<[1], [0], [0], [1], [0, 0, 1, 1], [], []>} : vector<4x32xf32>, vector<32x512xf32>, vector<4x512xf32> -> vector<4x512xf32>
    %290 = arith.subf %289, %14 : vector<4x512xf32>
    %291 = arith.mulf %290, %290 : vector<4x512xf32>
    %cst_79 = arith.constant dense<0.000000e+00> : vector<512xf32>
    %292 = vector.multi_reduction <add>, %291, %cst_79 [0] : vector<4x512xf32> to vector<512xf32>
    %293 = vector.shape_cast %292 : vector<512xf32> to vector<1x512xf32>
    %c6_i32 = arith.constant 6 : i32
    %294 = vector.broadcast %c6_i32 : i32 to vector<2x128xi32>
    %295 = arith.cmpi eq, %39, %294 : vector<2x128xi32>
    %296 = vector.extract_strided_slice %293 {offsets = [0, 0], sizes = [1, 256], strides = [1, 1]} : vector<1x512xf32> to vector<1x256xf32>
    %297 = vector.shape_cast %296 : vector<1x256xf32> to vector<1x1x256xf32>
    %cst_80 = arith.constant dense<0.000000e+00> : vector<1xf32>
    %298 = vector.multi_reduction <add>, %297, %cst_80 [1, 2] : vector<1x1x256xf32> to vector<1xf32>
    %299 = vector.shape_cast %298 : vector<1xf32> to vector<1x1x1xf32>
    %300 = vector.extract %299[0, 0, 0] : f32 from vector<1x1x1xf32>
    %301 = arith.andi %41, %295 : vector<2x128xi1>
    %cst_81 = arith.constant -9.765625E-4 : f32
    %302 = arith.mulf %cst_81, %300 : f32
    %cst_82 = arith.constant 0.000000e+00 : f32
    %303 = vector.broadcast %302 : f32 to vector<2x128xf32>
    %304 = vector.broadcast %cst_82 : f32 to vector<2x128xf32>
    %305 = arith.select %301, %303, %304 : vector<2x128xi1>, vector<2x128xf32>
    %306 = arith.addf %278, %305 : vector<2x128xf32>
    %307 = vector.extract_strided_slice %293 {offsets = [0, 256], sizes = [1, 256], strides = [1, 1]} : vector<1x512xf32> to vector<1x256xf32>
    %308 = vector.shape_cast %307 : vector<1x256xf32> to vector<1x1x256xf32>
    %cst_83 = arith.constant dense<0.000000e+00> : vector<1xf32>
    %309 = vector.multi_reduction <add>, %308, %cst_83 [1, 2] : vector<1x1x256xf32> to vector<1xf32>
    %310 = vector.shape_cast %309 : vector<1xf32> to vector<1x1x1xf32>
    %311 = vector.extract %310[0, 0, 0] : f32 from vector<1x1x1xf32>
    %312 = arith.andi %43, %295 : vector<2x128xi1>
    %cst_84 = arith.constant -9.765625E-4 : f32
    %313 = arith.mulf %cst_84, %311 : f32
    %cst_85 = arith.constant 0.000000e+00 : f32
    %314 = vector.broadcast %313 : f32 to vector<2x128xf32>
    %315 = vector.broadcast %cst_85 : f32 to vector<2x128xf32>
    %316 = arith.select %312, %314, %315 : vector<2x128xi1>, vector<2x128xf32>
    %317 = arith.addf %306, %316 : vector<2x128xf32>
    %318 = vector.extract_strided_slice %1 {offsets = [0, 7], sizes = [32, 1], strides = [1, 1]} : vector<32x10xf32> to vector<32x1xf32>
    %319 = vector.broadcast %318 : vector<32x1xf32> to vector<32x512xf32>
    %320 = arith.addf %37, %319 : vector<32x512xf32>
    %cst_86 = arith.constant 0.000000e+00 : f32
    %321 = vector.broadcast %cst_86 : f32 to vector<32x512xf32>
    %322 = arith.subf %321, %320 : vector<32x512xf32>
    %323 = math.exp %322 : vector<32x512xf32>
    %cst_87 = arith.constant 1.000000e+00 : f32
    %324 = vector.broadcast %cst_87 : f32 to vector<32x512xf32>
    %325 = arith.addf %324, %323 : vector<32x512xf32>
    %326 = tpu.reciprocal %325 {approx = true} : vector<32x512xf32> -> vector<32x512xf32>
    %327 = arith.mulf %320, %326 : vector<32x512xf32>
    %cst_88 = arith.constant dense<0.000000e+00> : vector<4x512xf32>
    %328 = tpu.matmul %2, %327, %cst_88 {dimension_numbers = #tpu.dot_dimension_numbers<[1], [0], [0], [1], [0, 0, 1, 1], [], []>} : vector<4x32xf32>, vector<32x512xf32>, vector<4x512xf32> -> vector<4x512xf32>
    %329 = arith.subf %328, %14 : vector<4x512xf32>
    %330 = arith.mulf %329, %329 : vector<4x512xf32>
    %cst_89 = arith.constant dense<0.000000e+00> : vector<512xf32>
    %331 = vector.multi_reduction <add>, %330, %cst_89 [0] : vector<4x512xf32> to vector<512xf32>
    %332 = vector.shape_cast %331 : vector<512xf32> to vector<1x512xf32>
    %c7_i32 = arith.constant 7 : i32
    %333 = vector.broadcast %c7_i32 : i32 to vector<2x128xi32>
    %334 = arith.cmpi eq, %39, %333 : vector<2x128xi32>
    %335 = vector.extract_strided_slice %332 {offsets = [0, 0], sizes = [1, 256], strides = [1, 1]} : vector<1x512xf32> to vector<1x256xf32>
    %336 = vector.shape_cast %335 : vector<1x256xf32> to vector<1x1x256xf32>
    %cst_90 = arith.constant dense<0.000000e+00> : vector<1xf32>
    %337 = vector.multi_reduction <add>, %336, %cst_90 [1, 2] : vector<1x1x256xf32> to vector<1xf32>
    %338 = vector.shape_cast %337 : vector<1xf32> to vector<1x1x1xf32>
    %339 = vector.extract %338[0, 0, 0] : f32 from vector<1x1x1xf32>
    %340 = arith.andi %41, %334 : vector<2x128xi1>
    %cst_91 = arith.constant -9.765625E-4 : f32
    %341 = arith.mulf %cst_91, %339 : f32
    %cst_92 = arith.constant 0.000000e+00 : f32
    %342 = vector.broadcast %341 : f32 to vector<2x128xf32>
    %343 = vector.broadcast %cst_92 : f32 to vector<2x128xf32>
    %344 = arith.select %340, %342, %343 : vector<2x128xi1>, vector<2x128xf32>
    %345 = arith.addf %317, %344 : vector<2x128xf32>
    %346 = vector.extract_strided_slice %332 {offsets = [0, 256], sizes = [1, 256], strides = [1, 1]} : vector<1x512xf32> to vector<1x256xf32>
    %347 = vector.shape_cast %346 : vector<1x256xf32> to vector<1x1x256xf32>
    %cst_93 = arith.constant dense<0.000000e+00> : vector<1xf32>
    %348 = vector.multi_reduction <add>, %347, %cst_93 [1, 2] : vector<1x1x256xf32> to vector<1xf32>
    %349 = vector.shape_cast %348 : vector<1xf32> to vector<1x1x1xf32>
    %350 = vector.extract %349[0, 0, 0] : f32 from vector<1x1x1xf32>
    %351 = arith.andi %43, %334 : vector<2x128xi1>
    %cst_94 = arith.constant -9.765625E-4 : f32
    %352 = arith.mulf %cst_94, %350 : f32
    %cst_95 = arith.constant 0.000000e+00 : f32
    %353 = vector.broadcast %352 : f32 to vector<2x128xf32>
    %354 = vector.broadcast %cst_95 : f32 to vector<2x128xf32>
    %355 = arith.select %351, %353, %354 : vector<2x128xi1>, vector<2x128xf32>
    %356 = arith.addf %345, %355 : vector<2x128xf32>
    %357 = vector.extract_strided_slice %1 {offsets = [0, 8], sizes = [32, 1], strides = [1, 1]} : vector<32x10xf32> to vector<32x1xf32>
    %358 = vector.broadcast %357 : vector<32x1xf32> to vector<32x512xf32>
    %359 = arith.addf %37, %358 : vector<32x512xf32>
    %cst_96 = arith.constant 0.000000e+00 : f32
    %360 = vector.broadcast %cst_96 : f32 to vector<32x512xf32>
    %361 = arith.subf %360, %359 : vector<32x512xf32>
    %362 = math.exp %361 : vector<32x512xf32>
    %cst_97 = arith.constant 1.000000e+00 : f32
    %363 = vector.broadcast %cst_97 : f32 to vector<32x512xf32>
    %364 = arith.addf %363, %362 : vector<32x512xf32>
    %365 = tpu.reciprocal %364 {approx = true} : vector<32x512xf32> -> vector<32x512xf32>
    %366 = arith.mulf %359, %365 : vector<32x512xf32>
    %cst_98 = arith.constant dense<0.000000e+00> : vector<4x512xf32>
    %367 = tpu.matmul %2, %366, %cst_98 {dimension_numbers = #tpu.dot_dimension_numbers<[1], [0], [0], [1], [0, 0, 1, 1], [], []>} : vector<4x32xf32>, vector<32x512xf32>, vector<4x512xf32> -> vector<4x512xf32>
    %368 = arith.subf %367, %14 : vector<4x512xf32>
    %369 = arith.mulf %368, %368 : vector<4x512xf32>
    %cst_99 = arith.constant dense<0.000000e+00> : vector<512xf32>
    %370 = vector.multi_reduction <add>, %369, %cst_99 [0] : vector<4x512xf32> to vector<512xf32>
    %371 = vector.shape_cast %370 : vector<512xf32> to vector<1x512xf32>
    %c8_i32 = arith.constant 8 : i32
    %372 = vector.broadcast %c8_i32 : i32 to vector<2x128xi32>
    %373 = arith.cmpi eq, %39, %372 : vector<2x128xi32>
    %374 = vector.extract_strided_slice %371 {offsets = [0, 0], sizes = [1, 256], strides = [1, 1]} : vector<1x512xf32> to vector<1x256xf32>
    %375 = vector.shape_cast %374 : vector<1x256xf32> to vector<1x1x256xf32>
    %cst_100 = arith.constant dense<0.000000e+00> : vector<1xf32>
    %376 = vector.multi_reduction <add>, %375, %cst_100 [1, 2] : vector<1x1x256xf32> to vector<1xf32>
    %377 = vector.shape_cast %376 : vector<1xf32> to vector<1x1x1xf32>
    %378 = vector.extract %377[0, 0, 0] : f32 from vector<1x1x1xf32>
    %379 = arith.andi %41, %373 : vector<2x128xi1>
    %cst_101 = arith.constant -9.765625E-4 : f32
    %380 = arith.mulf %cst_101, %378 : f32
    %cst_102 = arith.constant 0.000000e+00 : f32
    %381 = vector.broadcast %380 : f32 to vector<2x128xf32>
    %382 = vector.broadcast %cst_102 : f32 to vector<2x128xf32>
    %383 = arith.select %379, %381, %382 : vector<2x128xi1>, vector<2x128xf32>
    %384 = arith.addf %356, %383 : vector<2x128xf32>
    %385 = vector.extract_strided_slice %371 {offsets = [0, 256], sizes = [1, 256], strides = [1, 1]} : vector<1x512xf32> to vector<1x256xf32>
    %386 = vector.shape_cast %385 : vector<1x256xf32> to vector<1x1x256xf32>
    %cst_103 = arith.constant dense<0.000000e+00> : vector<1xf32>
    %387 = vector.multi_reduction <add>, %386, %cst_103 [1, 2] : vector<1x1x256xf32> to vector<1xf32>
    %388 = vector.shape_cast %387 : vector<1xf32> to vector<1x1x1xf32>
    %389 = vector.extract %388[0, 0, 0] : f32 from vector<1x1x1xf32>
    %390 = arith.andi %43, %373 : vector<2x128xi1>
    %cst_104 = arith.constant -9.765625E-4 : f32
    %391 = arith.mulf %cst_104, %389 : f32
    %cst_105 = arith.constant 0.000000e+00 : f32
    %392 = vector.broadcast %391 : f32 to vector<2x128xf32>
    %393 = vector.broadcast %cst_105 : f32 to vector<2x128xf32>
    %394 = arith.select %390, %392, %393 : vector<2x128xi1>, vector<2x128xf32>
    %395 = arith.addf %384, %394 : vector<2x128xf32>
    %396 = vector.extract_strided_slice %1 {offsets = [0, 9], sizes = [32, 1], strides = [1, 1]} : vector<32x10xf32> to vector<32x1xf32>
    %397 = vector.broadcast %396 : vector<32x1xf32> to vector<32x512xf32>
    %398 = arith.addf %37, %397 : vector<32x512xf32>
    %cst_106 = arith.constant 0.000000e+00 : f32
    %399 = vector.broadcast %cst_106 : f32 to vector<32x512xf32>
    %400 = arith.subf %399, %398 : vector<32x512xf32>
    %401 = math.exp %400 : vector<32x512xf32>
    %cst_107 = arith.constant 1.000000e+00 : f32
    %402 = vector.broadcast %cst_107 : f32 to vector<32x512xf32>
    %403 = arith.addf %402, %401 : vector<32x512xf32>
    %404 = tpu.reciprocal %403 {approx = true} : vector<32x512xf32> -> vector<32x512xf32>
    %405 = arith.mulf %398, %404 : vector<32x512xf32>
    %cst_108 = arith.constant dense<0.000000e+00> : vector<4x512xf32>
    %406 = tpu.matmul %2, %405, %cst_108 {dimension_numbers = #tpu.dot_dimension_numbers<[1], [0], [0], [1], [0, 0, 1, 1], [], []>} : vector<4x32xf32>, vector<32x512xf32>, vector<4x512xf32> -> vector<4x512xf32>
    %407 = arith.subf %406, %14 : vector<4x512xf32>
    %408 = arith.mulf %407, %407 : vector<4x512xf32>
    %cst_109 = arith.constant dense<0.000000e+00> : vector<512xf32>
    %409 = vector.multi_reduction <add>, %408, %cst_109 [0] : vector<4x512xf32> to vector<512xf32>
    %410 = vector.shape_cast %409 : vector<512xf32> to vector<1x512xf32>
    %c9_i32 = arith.constant 9 : i32
    %411 = vector.broadcast %c9_i32 : i32 to vector<2x128xi32>
    %412 = arith.cmpi eq, %39, %411 : vector<2x128xi32>
    %413 = vector.extract_strided_slice %410 {offsets = [0, 0], sizes = [1, 256], strides = [1, 1]} : vector<1x512xf32> to vector<1x256xf32>
    %414 = vector.shape_cast %413 : vector<1x256xf32> to vector<1x1x256xf32>
    %cst_110 = arith.constant dense<0.000000e+00> : vector<1xf32>
    %415 = vector.multi_reduction <add>, %414, %cst_110 [1, 2] : vector<1x1x256xf32> to vector<1xf32>
    %416 = vector.shape_cast %415 : vector<1xf32> to vector<1x1x1xf32>
    %417 = vector.extract %416[0, 0, 0] : f32 from vector<1x1x1xf32>
    %418 = arith.andi %41, %412 : vector<2x128xi1>
    %cst_111 = arith.constant -9.765625E-4 : f32
    %419 = arith.mulf %cst_111, %417 : f32
    %cst_112 = arith.constant 0.000000e+00 : f32
    %420 = vector.broadcast %419 : f32 to vector<2x128xf32>
    %421 = vector.broadcast %cst_112 : f32 to vector<2x128xf32>
    %422 = arith.select %418, %420, %421 : vector<2x128xi1>, vector<2x128xf32>
    %423 = arith.addf %395, %422 : vector<2x128xf32>
    %424 = vector.extract_strided_slice %410 {offsets = [0, 256], sizes = [1, 256], strides = [1, 1]} : vector<1x512xf32> to vector<1x256xf32>
    %425 = vector.shape_cast %424 : vector<1x256xf32> to vector<1x1x256xf32>
    %cst_113 = arith.constant dense<0.000000e+00> : vector<1xf32>
    %426 = vector.multi_reduction <add>, %425, %cst_113 [1, 2] : vector<1x1x256xf32> to vector<1xf32>
    %427 = vector.shape_cast %426 : vector<1xf32> to vector<1x1x1xf32>
    %428 = vector.extract %427[0, 0, 0] : f32 from vector<1x1x1xf32>
    %429 = arith.andi %43, %412 : vector<2x128xi1>
    %cst_114 = arith.constant -9.765625E-4 : f32
    %430 = arith.mulf %cst_114, %428 : f32
    %cst_115 = arith.constant 0.000000e+00 : f32
    %431 = vector.broadcast %430 : f32 to vector<2x128xf32>
    %432 = vector.broadcast %cst_115 : f32 to vector<2x128xf32>
    %433 = arith.select %429, %431, %432 : vector<2x128xi1>, vector<2x128xf32>
    %434 = arith.addf %423, %433 : vector<2x128xf32>
    %c0_116 = arith.constant 0 : index
    %c0_117 = arith.constant 0 : index
    %435 = vector.load %arg7[%c0_116, %c0_117] : memref<2x128xf32, #tpu.memory_space<vmem>>, vector<2x128xf32>
    tpu.vector_store %arg7[%c0_116, %c0_117], %434 {strides = array<i32>} : memref<2x128xf32, #tpu.memory_space<vmem>>, vector<2x128xf32>,
    return
  }
  func.func @transform_0(%arg0: i32) -> (i32, i32) {
    %c0_i32 = arith.constant 0 : i32
    %c0_i32_0 = arith.constant 0 : i32
    return %c0_i32, %arg0 : i32, i32
  }
  func.func @transform_1(%arg0: i32) -> (i32, i32) {
    %c0_i32 = arith.constant 0 : i32
    %c0_i32_0 = arith.constant 0 : i32
    return %c0_i32, %arg0 : i32, i32
  }
  func.func @transform_2(%arg0: i32) -> (i32, i32) {
    %c0_i32 = arith.constant 0 : i32
    %c0_i32_0 = arith.constant 0 : i32
    %c0_i32_1 = arith.constant 0 : i32
    return %c0_i32, %c0_i32_0 : i32, i32
  }
  func.func @transform_3(%arg0: i32) -> (i32, i32) {
    %c0_i32 = arith.constant 0 : i32
    %c0_i32_0 = arith.constant 0 : i32
    %c0_i32_1 = arith.constant 0 : i32
    return %c0_i32, %c0_i32_0 : i32, i32
  }
  func.func @transform_4(%arg0: i32) -> (i32, i32) {
    %c0_i32 = arith.constant 0 : i32
    %c0_i32_0 = arith.constant 0 : i32
    %c0_i32_1 = arith.constant 0 : i32
    return %c0_i32, %c0_i32_0 : i32, i32
  }
  func.func @transform_5(%arg0: i32) -> (i32, i32) {
    %c0_i32 = arith.constant 0 : i32
    %c0_i32_0 = arith.constant 0 : i32
    %c0_i32_1 = arith.constant 0 : i32
    return %c0_i32, %c0_i32_0 : i32, i32
  }
  func.func @transform_6(%arg0: i32) -> (i32, i32) {
    %c0_i32 = arith.constant 0 : i32
    %c0_i32_0 = arith.constant 0 : i32
    return %arg0, %c0_i32 : i32, i32
  }
}

</mosaic_0001>

<bundles_post_ra>
// kernel: tpu_custom_call.1
= control target key start
LH: loop header
LB: loop body
LE: loop exit
PB: predicated region body
PF: predicated region fallthrough
CT: control target
= control target key end

     0   :  { %v4597_v2 = vmov 0   ;;  %s6650_s0 = inlined_call_operand.vmem [shape: f32[4,512], index: 0, kind: input, shape index: {}]   ;;  %s6651_s1 = inlined_call_operand.vmem [shape: f32[4,512], index: 1, kind: input, shape index: {}]   ;;  %s6652_s2 = inlined_call_operand.vmem [shape: f32[32,4], index: 2, kind: input, shape index: {}]   ;;  %s6653_s3 = inlined_call_operand.vmem [shape: f32[32,10], index: 3, kind: input, shape index: {}]   ;;  %s6654_s4 = inlined_call_operand.vmem [shape: f32[4,32], index: 4, kind: input, shape index: {}]   ;;  %s6655_s5 = inlined_call_operand.vmem [shape: f32[4,1], index: 5, kind: input, shape index: {}]   ;;  %s6656_s6 = inlined_call_operand.hbm [shape: f32[2,128], index: 6, kind: output, shape index: {}]  }
   0x1   :  { %v33_v0 = vld [vmem:[%s6655_s5] sm:$0xf]  ;;  %v25_v1 = vld [vmem:[%s6652_s2 + $0x8] sm:$0xff]  ;;  %3909 = vset.pattern.permute.xlu1 %v4597_v2  ;;  %3908 = vset.pattern.permute.xlu0 %v4597_v2  ;;  %v26_v3 = vld [vmem:[%s6652_s2 + $0x10] sm:$0xff] }
   0x2   :  { %48 = vperm.xlu0 %3908, %v33_v0   ;;  %67 = vperm.xlu1 %3909, %v25_v1   ;;  %v24_v4 = vld [vmem:[%s6652_s2] sm:$0xff] }
   0x6   :  { %72 = vperm.xlu1 %3909, %v26_v3   ;;  %62 = vperm.xlu0 %3908, %v24_v4  }
   0x7   :  { %11 = vsyncpa [#allocation3], 0  ;;  %v27_v5 = vld [vmem:[%s6652_s2 + $0x18] sm:$0xff]  ;;  %v4598_v6 = vmov 1   ;;  %v4669_v8 = vld [vmem:[%s6653_s3 + $0x8] sm:$0xff]  ;;  %v4599_v9 = vmov 2   ;;  %v6657_v31 = vlaneseq }
   0x8   :  { %v4663_v7 = vld [vmem:[%s6653_s3 + $0x18] sm:$0xff]  ;;  %v4600_v10 = vmov 3   ;;  %v4676_v11 = vld [vmem:[%s6653_s3] sm:$0xff]  ;;  %v4682_v12 = vld [vmem:[%s6653_s3 + $0x10] sm:$0xff]  ;;  %v4601_v13 = vmov 4   ;;  %v4602_v14 = vmov 5  }
   0x9   :  { %v4603_v15 = vmov 6   ;;  %v4604_v16 = vmov 7   ;;  %v4605_v17 = vmov 8   ;;  %v4606_v18 = vmov 9   ;;  %v34_v21 = vld [vmem:[%s6650_s0] sm:$0xff]  ;;  %v35_v22 = vld [vmem:[%s6650_s0 + $0x8] sm:$0xff] }
   0xa   :  { %3910 = vset.pattern.permute.xlu1 %v4598_v6  ;;  %77 = vperm.xlu0 %3908, %v27_v5   ;;  %v36_v23 = vld [vmem:[%s6651_s1] sm:$0xff]  ;;  %v37_v24 = vld [vmem:[%s6651_s1 + $0x8] sm:$0xff]  ;;  %v38_v27 = vmul.f32 1.4142135, %v34_v21  ;;  %v39_v28 = vmul.f32 1.4142135, %v35_v22 }
   0xb   :  { %135 = vperm.xlu1 %3910, %v24_v4   ;;  %v40_v29 = vmul.f32 0.70710677, %v36_v23  ;;  %v41_v30 = vmul.f32 0.70710677, %v37_v24  ;;  %v4742_v36 = vshrl.u32 %v6657_v31, 7  ;;  %vm524_vm0 = vcmask 261120  }
   0xc   :  { %vm684_vm1 = vcmask 1043456   ;;  %vm714_vm2 = vcmask 1040384  }
   0xd   :  { %v42_v34 = vadd.f32 %v40_v29, %v38_v27  ;;  %v43_v35 = vadd.f32 %v41_v30, %v39_v28  ;;  %6791 = vst [vmem:[#allocation6_spill] sm:$0xff] %v4742_v36  ;;  %v84_v41 = vsub.s32 0, %v4742_v36  ;;  %v88_v42 = vsub.s32 4, %v4742_v36 }
   0xe   :  { %409 = vperm.xlu0 %3908, %v4663_v7   ;;  %v152_v43 = vsub.s32 1, %v4742_v36  ;;  %v156_v44 = vsub.s32 5, %v4742_v36  ;;  %v236_v46 = vsub.s32 2, %v4742_v36  ;;  %v240_v47 = vsub.s32 6, %v4742_v36 }
   0xf   :  { %147 = vperm.xlu1 %3910, %v27_v5   ;;  %v3833_v39 = vadd.f32 -0.70710677, %v42_v34  ;;  %v3834_v40 = vadd.f32 -0.70710677, %v43_v35  ;;  %v320_v49 = vsub.s32 3, %v4742_v36  ;;  %v324_v50 = vsub.s32 7, %v4742_v36 }
  0x11   :  { %v85_v51 = vrot.slane %v3833_v39, %v84_v41  ;;  %v89_v52 = vrot.slane %v3833_v39, %v88_v42  ;;  %v93_v53 = vrot.slane %v3834_v40, %v84_v41  ;;  %v97_v54 = vrot.slane %v3834_v40, %v88_v42 }
  0x12   :  { %399 = vperm.xlu0 %3908, %v4669_v8   ;;  %v153_v55 = vrot.slane %v3833_v39, %v152_v43  ;;  %v157_v56 = vrot.slane %v3833_v39, %v156_v44  ;;  %v161_v57 = vrot.slane %v3834_v40, %v152_v43  ;;  %v165_v58 = vrot.slane %v3834_v40, %v156_v44 }
  0x13   :  { %143 = vperm.xlu1 %3910, %v26_v3   ;;  %v237_v59 = vrot.slane %v3833_v39, %v236_v46  ;;  %v241_v60 = vrot.slane %v3833_v39, %v240_v47  ;;  %v245_v61 = vrot.slane %v3834_v40, %v236_v46  ;;  %v249_v62 = vrot.slane %v3834_v40, %v240_v47 }
  0x14   :  { %v321_v0 = vrot.slane %v3833_v39, %v320_v49 }
  0x16   :  { %3914 = vset.pattern.permute.xlu0 %v4598_v6 }
  0x17   :  { %3911 = vset.pattern.permute.xlu1 %v4599_v9  ;;  %139 = vperm.xlu0 %3914, %v25_v1  }
  0x18   :  { %227 = vperm.xlu1 %3911, %v26_v3  }
  0x1b   :  { %762 = vperm.xlu0 %3914, %v4663_v7  }
  0x1c   :  { %3912 = vset.pattern.permute.xlu1 %v4600_v10 }
  0x1d   :  { %315 = vperm.xlu1 %3912, %v27_v5  }
  0x1f   :  { %750 = vperm.xlu0 %3914, %v4676_v11  }
  0x21   :  { %311 = vperm.xlu1 %3912, %v26_v3   ;;  %v333_v3 = vrot.slane %v3834_v40, %v324_v50 }
  0x23   :  { %3916 = vset.pattern.permute.xlu0 %v4599_v9  ;;  %v4797_v23 = vrot.slane %v333_v3, %v320_v49 }
  0x24   :  { %231 = vperm.xlu0 %3916, %v27_v5   ;;  %v4766_v5 = vrot.slane %v89_v52, %v84_v41 }
  0x25   :  { %307 = vperm.xlu1 %3912, %v25_v1  }
  0x28   :  { %223 = vperm.xlu0 %3916, %v25_v1   ;;  %v325_v1 = vrot.slane %v3833_v39, %v324_v50 }
  0x29   :  { %303 = vperm.xlu1 %3912, %v24_v4  }
  0x2a   :  { %v4793_v21 = vrot.slane %v325_v1, %v320_v49 }
  0x2c   :  { %219 = vperm.xlu0 %3916, %v24_v4   ;;  %v4764_v4 = vrot.slane %v85_v51, %v84_v41 }
  0x2d   :  { %3913 = vset.pattern.permute.xlu1 %v4597_v2  ;;  %v329_v2 = vrot.slane %v3834_v40, %v320_v49 }
  0x2e   :  { %404 = vperm.xlu1 %3913, %v4682_v12  }
  0x2f   :  { %v4795_v22 = vrot.slane %v329_v2, %v320_v49 }
  0x30   :  { %1099 = vperm.xlu0 %3916, %v4682_v12  }
  0x32   :  { %394 = vperm.xlu1 %3913, %v4676_v11  }
  0x34   :  { %3918 = vset.pattern.permute.xlu0 %v4600_v10 }
  0x35   :  { %1444 = vperm.xlu0 %3918, %v4663_v7  }
  0x36   :  { %3915 = vset.pattern.permute.xlu1 %v4598_v6  ;;  %v4768_v6 = vrot.slane %v93_v53, %v84_v41 }
  0x37   :  { %758 = vperm.xlu1 %3915, %v4682_v12  }
  0x39   :  { %1432 = vperm.xlu0 %3918, %v4676_v11  }
  0x3b   :  { %754 = vperm.xlu1 %3915, %v4669_v8  }
  0x3d   :  { %3921 = vset.pattern.permute.xlu0 %v4601_v13 }
  0x3e   :  { %1781 = vperm.xlu0 %3921, %v4682_v12  }
  0x3f   :  { %3917 = vset.pattern.permute.xlu1 %v4599_v9 }
  0x40   :  { %1103 = vperm.xlu1 %3917, %v4663_v7  }
  0x42   :  { %3922 = vset.pattern.permute.xlu0 %v4602_v14 }
  0x43   :  { %2126 = vperm.xlu0 %3922, %v4663_v7  }
  0x44   :  { %1095 = vperm.xlu1 %3917, %v4669_v8  }
  0x47   :  { %2114 = vperm.xlu0 %3922, %v4676_v11  }
  0x48   :  { %1091 = vperm.xlu1 %3917, %v4676_v11  }
  0x4b   :  { %3925 = vset.pattern.permute.xlu0 %v4603_v15 }
  0x4c   :  { %3919 = vset.pattern.permute.xlu1 %v4600_v10  ;;  %2463 = vperm.xlu0 %3925, %v4682_v12   ;;  %v4773_v10 = vrot.slane %v153_v55, %v152_v43 }
  0x4d   :  { %1440 = vperm.xlu1 %3919, %v4682_v12  }
  0x50   :  { %3926 = vset.pattern.permute.xlu0 %v4604_v16 }
  0x51   :  { %1436 = vperm.xlu1 %3919, %v4669_v8   ;;  %2808 = vperm.xlu0 %3926, %v4663_v7  }
  0x55   :  { %3920 = vset.pattern.permute.xlu1 %v4601_v13  ;;  %2796 = vperm.xlu0 %3926, %v4676_v11   ;;  %v4779_v13 = vrot.slane %v165_v58, %v152_v43 }
  0x56   :  { %1785 = vperm.xlu1 %3920, %v4663_v7  }
  0x59   :  { %3929 = vset.pattern.permute.xlu0 %v4605_v17 }
  0x5a   :  { %1777 = vperm.xlu1 %3920, %v4669_v8   ;;  %3145 = vperm.xlu0 %3929, %v4682_v12  }
  0x5e   :  { %1773 = vperm.xlu1 %3920, %v4676_v11   ;;  %3930 = vset.pattern.permute.xlu0 %v4606_v18 }
  0x5f   :  { %3490 = vperm.xlu0 %3930, %v4663_v7  }
  0x62   :  { %3923 = vset.pattern.permute.xlu1 %v4602_v14  ;;  %v4781_v14 = vrot.slane %v237_v59, %v236_v46 }
  0x63   :  { %2122 = vperm.xlu1 %3923, %v4682_v12   ;;  %3478 = vperm.xlu0 %3930, %v4676_v11  }
  0x67   :  { %2118 = vperm.xlu1 %3923, %v4669_v8  }
  0x6b   :  { %3924 = vset.pattern.permute.xlu1 %v4603_v15  ;;  %v4783_v15 = vrot.slane %v241_v60, %v236_v46 }
  0x6c   :  { %2467 = vperm.xlu1 %3924, %v4663_v7  }
  0x70   :  { %2459 = vperm.xlu1 %3924, %v4669_v8  }
  0x74   :  { %2455 = vperm.xlu1 %3924, %v4676_v11  }
  0x78   :  { %3927 = vset.pattern.permute.xlu1 %v4604_v16  ;;  %v4785_v16 = vrot.slane %v245_v61, %v236_v46 }
  0x79   :  { %2804 = vperm.xlu1 %3927, %v4682_v12  }
  0x7d   :  { %v4714_v19 = vpop.permute.xlu1 %67  ;;  %2800 = vperm.xlu1 %3927, %v4669_v8   ;;  %v4717_v20 = vpop.permute.xlu0 %48 }
  0x7e   :  { %6790 = vst [vmem:[#allocation5_spill] sm:$0xff] %v4717_v20 }
  0x81   :  { %v4731_v25 = vpop.permute.xlu1 %72  ;;  %3928 = vset.pattern.permute.xlu1 %v4605_v17  ;;  %v4733_v26 = vpop.permute.xlu0 %62  ;;  %v4787_v17 = vrot.slane %v249_v62, %v236_v46 }
  0x82   :  { %3149 = vperm.xlu1 %3928, %v4663_v7   ;;  %v4770_v7 = vrot.slane %v97_v54, %v84_v41  ;;  %v118_v24 = vmul.f32 %v4764_v4, %v4733_v26  ;;  %v119_v27 = vmul.f32 %v4766_v5, %v4733_v26  ;;  %v120_v28 = vmul.f32 %v4768_v6, %v4733_v26 }
  0x83   :  { %v126_v50 = vmul.f32 %v4764_v4, %v4731_v25  ;;  %v128_v51 = vmul.f32 %v4768_v6, %v4731_v25 }
  0x84   :  { %v121_v29 = vmul.f32 %v4770_v7, %v4733_v26  ;;  %v129_v52 = vmul.f32 %v4770_v7, %v4731_v25 }
  0x85   :  { %v4736_v32 = vpop.permute.xlu0 %77 }
  0x86   :  { %3141 = vperm.xlu1 %3928, %v4669_v8   ;;  %v4739_v33 = vpop.permute.xlu1 %135  ;;  %v130_v41 = vmul.f32 %v4764_v4, %v4736_v32  ;;  %v131_v42 = vmul.f32 %v4766_v5, %v4736_v32  ;;  %v132_v26 = vmul.f32 %v4768_v6, %v4736_v32 }
  0x87   :  { %v186_v30 = vmul.f32 %v4773_v10, %v4739_v33  ;;  %v189_v39 = vmul.f32 %v4779_v13, %v4739_v33 }
  0x89   :  { %v4744_v37 = vpop.permute.xlu0 %409  ;;  %v4841_v53 = vadd.f32 %v186_v30, %v118_v24 }
  0x8a   :  { %3137 = vperm.xlu1 %3928, %v4676_v11   ;;  %v4747_v38 = vpop.permute.xlu1 %147  ;;  %v4775_v11 = vrot.slane %v157_v56, %v152_v43 }
  0x8b   :  { %v198_v44 = vmul.f32 %v4773_v10, %v4747_v38  ;;  %v201_v47 = vmul.f32 %v4779_v13, %v4747_v38 }
  0x8c   :  { %v187_v34 = vmul.f32 %v4775_v11, %v4739_v33  ;;  %v199_v46 = vmul.f32 %v4775_v11, %v4747_v38 }
  0x8d   :  { %v4753_v45 = vpop.permute.xlu0 %399  ;;  %v214_v60 = vadd.f32 %v198_v44, %v130_v41 }
  0x8e   :  { %3931 = vset.pattern.permute.xlu1 %v4606_v18  ;;  %v4757_v48 = vpop.permute.xlu1 %143  ;;  %v4843_v54 = vadd.f32 %v187_v34, %v119_v27  ;;  %v215_v61 = vadd.f32 %v199_v46, %v131_v42 }
  0x8f   :  { %3486 = vperm.xlu1 %3931, %v4682_v12   ;;  %v4777_v12 = vrot.slane %v161_v57, %v152_v43  ;;  %v133_v43 = vmul.f32 %v4770_v7, %v4736_v32  ;;  %v127_v32 = vmul.f32 %v4766_v5, %v4731_v25  ;;  %v194_v57 = vmul.f32 %v4773_v10, %v4757_v48 }
  0x90   :  { %v195_v58 = vmul.f32 %v4775_v11, %v4757_v48  ;;  %v197_v25 = vmul.f32 %v4779_v13, %v4757_v48 }
  0x91   :  { %v188_v35 = vmul.f32 %v4777_v12, %v4739_v33  ;;  %v200_v33 = vmul.f32 %v4777_v12, %v4747_v38  ;;  %v4847_v38 = vadd.f32 %v189_v39, %v121_v29  ;;  %v196_v59 = vmul.f32 %v4777_v12, %v4757_v48 }
  0x92   :  { %v4762_v63 = vpop.permute.xlu0 %139  ;;  %v211_v39 = vadd.f32 %v195_v58, %v127_v32  ;;  %v213_v42 = vadd.f32 %v197_v25, %v129_v52 }
  0x93   :  { %3482 = vperm.xlu1 %3931, %v4669_v8   ;;  %v228_v9 = vpop.permute.xlu1 %227  ;;  %v4791_v8 = vrot.slane %v321_v0, %v320_v49  ;;  %v4845_v55 = vadd.f32 %v188_v35, %v120_v28  ;;  %v216_v62 = vadd.f32 %v200_v33, %v132_v26  ;;  %v217_v0 = vadd.f32 %v201_v47, %v133_v43 }
  0x94   :  { %v278_v1 = vmul.f32 %v4781_v14, %v228_v9  ;;  %v279_v2 = vmul.f32 %v4783_v15, %v228_v9  ;;  %v280_v3 = vmul.f32 %v4785_v16, %v228_v9  ;;  %v281_v24 = vmul.f32 %v4787_v17, %v228_v9 }
  0x95   :  { %v210_v35 = vadd.f32 %v194_v57, %v126_v50  ;;  %v212_v41 = vadd.f32 %v196_v59, %v128_v51 }
  0x96   :  { %v4789_v18 = vpop.permute.xlu0 %762  ;;  %v295_v36 = vadd.f32 %v279_v2, %v211_v39  ;;  %v297_v32 = vadd.f32 %v281_v24, %v213_v42 }
  0x97   :  { %v296_v50 = vadd.f32 %v280_v3, %v212_v41 }
  0x98   :  { %v316_v40 = vpop.permute.xlu1 %315 }
  0x99   :  { %v366_v52 = vmul.f32 %v4791_v8, %v316_v40  ;;  %v367_v57 = vmul.f32 %v4793_v21, %v316_v40  ;;  %v368_v58 = vmul.f32 %v4795_v22, %v316_v40  ;;  %v369_v59 = vmul.f32 %v4797_v23, %v316_v40 }
  0x9a   :  { %v4831_v49 = vpop.permute.xlu0 %750 }
  0x9b   :  { %6792 = vst [vmem:[#allocation7_spill] sm:$0xff] %v4831_v49 }
  0x9c   :  { %v312_v56 = vpop.permute.xlu1 %311 }
  0x9d   :  { %v362_v26 = vmul.f32 %v4791_v8, %v312_v56  ;;  %v363_v43 = vmul.f32 %v4793_v21, %v312_v56  ;;  %v364_v9 = vmul.f32 %v4795_v22, %v312_v56  ;;  %v365_v44 = vmul.f32 %v4797_v23, %v312_v56 }
  0x9f   :  { %v232_v27 = vpop.permute.xlu0 %231  ;;  %v4879_v25 = vadd.f32 %v363_v43, %v295_v36 }
  0xa0   :  { %v282_v28 = vmul.f32 %v4781_v14, %v232_v27  ;;  %v283_v29 = vmul.f32 %v4783_v15, %v232_v27  ;;  %v284_v30 = vmul.f32 %v4785_v16, %v232_v27  ;;  %v285_v48 = vmul.f32 %v4787_v17, %v232_v27  ;;  %v4865_v34 = vpop.permute.xlu1 %307 }
  0xa1   :  { %v294_v27 = vadd.f32 %v278_v1, %v210_v35  ;;  %6794 = vst [vmem:[#allocation9_spill] sm:$0xff] %v4879_v25 }
  0xa2   :  { %v298_v46 = vadd.f32 %v282_v28, %v214_v60  ;;  %v299_v33 = vadd.f32 %v283_v29, %v215_v61  ;;  %v300_v47 = vadd.f32 %v284_v30, %v216_v62  ;;  %v301_v31 = vadd.f32 %v285_v48, %v217_v0 }
  0xa3   :  { %v4871_v20 = vpop.permute.xlu0 %223  ;;  %v4877_v56 = vadd.f32 %v362_v26, %v294_v27  ;;  %v4881_v60 = vadd.f32 %v364_v9, %v296_v50  ;;  %v4883_v61 = vadd.f32 %v365_v44, %v297_v32 }
  0xa4   :  { %v304_v51 = vpop.permute.xlu1 %303  ;;  %v4885_v62 = vadd.f32 %v366_v52, %v298_v46  ;;  %v4887_v0 = vadd.f32 %v367_v57, %v299_v33  ;;  %v4889_v1 = vadd.f32 %v368_v58, %v300_v47  ;;  %v4891_v2 = vadd.f32 %v369_v59, %v301_v31 }
  0xa5   :  { %6793 = vst [vmem:[#allocation8_spill] sm:$0xff] %v4877_v56  ;;  %6795 = vst [vmem:[#allocation10_spill] sm:$0xff] %v4881_v60  ;;  %v354_v29 = vmul.f32 %v4791_v8, %v304_v51  ;;  %v355_v30 = vmul.f32 %v4793_v21, %v304_v51  ;;  %v356_v48 = vmul.f32 %v4795_v22, %v304_v51 }
  0xa6   :  { %6796 = vst [vmem:[#allocation11_spill] sm:$0xff] %v4883_v61  ;;  %v357_v35 = vmul.f32 %v4797_v23, %v304_v51 }
  0xa7   :  { %v220_v3 = vpop.permute.xlu0 %219 }
  0xa8   :  { %v270_v24 = vmul.f32 %v4781_v14, %v220_v3  ;;  %v271_v40 = vmul.f32 %v4783_v15, %v220_v3  ;;  %v272_v36 = vmul.f32 %v4785_v16, %v220_v3  ;;  %v273_v28 = vmul.f32 %v4787_v17, %v220_v3 }
  0xa9   :  { %v405_v39 = vpop.permute.xlu1 %404 }
  0xaa   :  { %v286_v31 = vadd.f32 %v270_v24, %v4841_v53  ;;  %v287_v41 = vadd.f32 %v271_v40, %v4843_v54  ;;  %v288_v42 = vadd.f32 %v272_v36, %v4845_v55  ;;  %v289_v26 = vadd.f32 %v273_v28, %v4847_v38 }
  0xab   :  { %v4906_v43 = vadd.f32 %v405_v39, %v4877_v56  ;;  %v4909_v9 = vadd.f32 %v405_v39, %v4879_v25  ;;  %v4912_v44 = vadd.f32 %v405_v39, %v4881_v60  ;;  %v4915_v46 = vadd.f32 %v405_v39, %v4883_v61  ;;  %v1100_v33 = vpop.permute.xlu0 %1099 }
  0xac   :  { %v4917_v53 = vadd.f32 %v354_v29, %v286_v31  ;;  %v4919_v54 = vadd.f32 %v355_v30, %v287_v41  ;;  %v4921_v55 = vadd.f32 %v356_v48, %v288_v42  ;;  %v4923_v38 = vadd.f32 %v357_v35, %v289_v26 }
  0xad   :  { %v436_v47 = vsub.f32 0.0, %v4906_v43  ;;  %v437_v27 = vsub.f32 0.0, %v4909_v9  ;;  %v438_v50 = vsub.f32 0.0, %v4912_v44  ;;  %v439_v32 = vsub.f32 0.0, %v4915_v46  ;;  %v395_v51 = vpop.permute.xlu1 %394 }
  0xae   :  { %6797 = vst [vmem:[#allocation12_spill] sm:$0xff] %v4917_v53  ;;  %6798 = vst [vmem:[#allocation13_spill] sm:$0xff] %v4919_v54  ;;  %v4930_v52 = vadd.f32 %v1100_v33, %v4877_v56  ;;  %v4933_v57 = vadd.f32 %v1100_v33, %v4879_v25  ;;  %v4936_v58 = vadd.f32 %v1100_v33, %v4881_v60 }
  0xaf   :  { %6799 = vst [vmem:[#allocation14_spill] sm:$0xff] %v4921_v55  ;;  %6800 = vst [vmem:[#allocation15_spill] sm:$0xff] %v4923_v38  ;;  %v4939_v59 = vadd.f32 %v1100_v33, %v4883_v61  ;;  %v460_v3 = vmul.f32 1.442695, %v436_v47  ;;  %v462_v24 = vmul.f32 1.442695, %v437_v27  ;;  %v4942_v36 = vadd.f32 %v395_v51, %v4917_v53 }
  0xb0   :  { %6801 = vst [vmem:[#allocation16_spill] sm:$0xff] %v4930_v52  ;;  %6802 = vst [vmem:[#allocation17_spill] sm:$0xff] %v4933_v57  ;;  %v464_v40 = vmul.f32 1.442695, %v438_v50  ;;  %v466_v28 = vmul.f32 1.442695, %v439_v32  ;;  %v4949_v39 = vadd.f32 %v395_v51, %v4919_v54  ;;  %v4952_v31 = vadd.f32 %v395_v51, %v4921_v55  ;;  %v1445_v41 = vpop.permute.xlu0 %1444 }
  0xb1   :  { %6803 = vst [vmem:[#allocation18_spill] sm:$0xff] %v4936_v58  ;;  %6804 = vst [vmem:[#allocation19_spill] sm:$0xff] %v4939_v59  ;;  %v1130_v29 = vsub.f32 0.0, %v4930_v52  ;;  %v1131_v30 = vsub.f32 0.0, %v4933_v57  ;;  %v1132_v48 = vsub.f32 0.0, %v4936_v58  ;;  %3932 = vpow2.f32 %v460_v3 }
  0xb2   :  { %v1133_v35 = vsub.f32 0.0, %v4939_v59  ;;  %3934 = vpow2.f32 %v462_v24  ;;  %v4955_v27 = vadd.f32 %v395_v51, %v4923_v38  ;;  %v428_v50 = vsub.f32 0.0, %v4942_v36 }
  0xb3   :  { %v1154_v42 = vmul.f32 1.442695, %v1130_v29  ;;  %v1156_v26 = vmul.f32 1.442695, %v1131_v30  ;;  %v1158_v33 = vmul.f32 1.442695, %v1132_v48  ;;  %3936 = vpow2.f32 %v464_v40 }
  0xb4   :  { %v1160_v47 = vmul.f32 1.442695, %v1133_v35  ;;  %3938 = vpow2.f32 %v466_v28  ;;  %v429_v32 = vsub.f32 0.0, %v4949_v39  ;;  %v430_v3 = vsub.f32 0.0, %v4952_v31 }
  0xb5   :  { %v4961_v58 = vadd.f32 %v1445_v41, %v4885_v62  ;;  %3940 = vpow2.f32 %v1154_v42  ;;  %v431_v24 = vsub.f32 0.0, %v4955_v27  ;;  %v444_v29 = vmul.f32 1.442695, %v428_v50 }
  0xb6   :  { %v4965_v40 = vadd.f32 %v1445_v41, %v4887_v0  ;;  %3942 = vpow2.f32 %v1156_v26  ;;  %v446_v51 = vmul.f32 1.442695, %v429_v32  ;;  %v4968_v30 = vadd.f32 %v1445_v41, %v4889_v1 }
  0xb7   :  { %6805 = vst [vmem:[#allocation20_spill] sm:$0xff] %v4961_v58  ;;  %3944 = vpow2.f32 %v1158_v33  ;;  %v448_v28 = vmul.f32 1.442695, %v430_v3  ;;  %v4971_v48 = vadd.f32 %v1445_v41, %v4891_v2  ;;  %v1475_v35 = vsub.f32 0.0, %v4961_v58 }
  0xb8   :  { %6806 = vst [vmem:[#allocation21_spill] sm:$0xff] %v4965_v40  ;;  %6807 = vst [vmem:[#allocation22_spill] sm:$0xff] %v4968_v30  ;;  %3946 = vpow2.f32 %v1160_v47  ;;  %v450_v42 = vmul.f32 1.442695, %v431_v24  ;;  %v1476_v52 = vsub.f32 0.0, %v4965_v40  ;;  %v1477_v50 = vsub.f32 0.0, %v4968_v30 }
  0xb9   :  { %6808 = vst [vmem:[#allocation23_spill] sm:$0xff] %v4971_v48  ;;  %3948 = vpow2.f32 %v444_v29  ;;  %v1478_v26 = vsub.f32 0.0, %v4971_v48  ;;  %v1503_v32 = vmul.f32 1.442695, %v1475_v35  ;;  %v190_v59 = vmul.f32 %v4773_v10, %v4762_v63 }
  0xba   :  { %v191_v33 = vmul.f32 %v4775_v11, %v4762_v63  ;;  %3950 = vpow2.f32 %v446_v51  ;;  %v1505_v41 = vmul.f32 1.442695, %v1476_v52  ;;  %v122_v47 = vmul.f32 %v4764_v4, %v4714_v19 }
  0xbb   :  { %v192_v3 = vmul.f32 %v4777_v12, %v4762_v63  ;;  %3952 = vpow2.f32 %v448_v28  ;;  %v1507_v24 = vmul.f32 1.442695, %v1477_v50  ;;  %v123_v29 = vmul.f32 %v4766_v5, %v4714_v19 }
  0xbc   :  { %v124_v35 = vmul.f32 %v4768_v6, %v4714_v19  ;;  %v193_v10 = vmul.f32 %v4779_v13, %v4762_v63  ;;  %3954 = vpow2.f32 %v450_v42  ;;  %v125_v11 = vmul.f32 %v4770_v7, %v4714_v19 }
  0xbd   :  { %v274_v4 = vmul.f32 %v4781_v14, %v4871_v20  ;;  %3956 = vpow2.f32 %v1503_v32  ;;  %v1509_v12 = vmul.f32 1.442695, %v1478_v26  ;;  %v206_v51 = vadd.f32 %v190_v59, %v122_v47 }
  0xbe   :  { %v3933_v52 = vpop.eup %3932  ;;  %v207_v28 = vadd.f32 %v191_v33, %v123_v29  ;;  %v275_v5 = vmul.f32 %v4783_v15, %v4871_v20  ;;  %3958 = vpow2.f32 %v1505_v41  ;;  %v208_v50 = vadd.f32 %v192_v3, %v124_v35  ;;  %v759_v41 = vpop.permute.xlu1 %758 }
  0xbf   :  { %v3935_v6 = vpop.eup %3934  ;;  %v276_v63 = vmul.f32 %v4785_v16, %v4871_v20  ;;  %v484_v13 = vadd.f32 1.0, %v3933_v52  ;;  %3960 = vpow2.f32 %v1507_v24  ;;  %v209_v7 = vadd.f32 %v193_v10, %v125_v11 }
  0xc0   :  { %v3937_v19 = vpop.eup %3936  ;;  %v358_v14 = vmul.f32 %v4791_v8, %v4865_v34  ;;  %v277_v59 = vmul.f32 %v4787_v17, %v4871_v20  ;;  %v485_v42 = vadd.f32 1.0, %v3935_v6  ;;  %v359_v15 = vmul.f32 %v4793_v21, %v4865_v34 }
  0xc1   :  { %v3939_v26 = vpop.eup %3938  ;;  %v290_v32 = vadd.f32 %v274_v4, %v206_v51  ;;  %v486_v33 = vadd.f32 1.0, %v3937_v19  ;;  %3962 = vpow2.f32 %v1509_v12  ;;  %v360_v47 = vmul.f32 %v4795_v22, %v4865_v34 }
  0xc2   :  { %v3941_v16 = vpop.eup %3940  ;;  %v291_v3 = vadd.f32 %v275_v5, %v207_v28  ;;  %v487_v24 = vadd.f32 1.0, %v3939_v26  ;;  %3964 = vrcp.f32 %v484_v13  ;;  %v361_v20 = vmul.f32 %v4797_v23, %v4865_v34  ;;  %v1433_v5 = vpop.permute.xlu0 %1432 }
  0xc3   :  { %v3943_v8 = vpop.eup %3942  ;;  %v292_v17 = vadd.f32 %v276_v63, %v208_v50  ;;  %3966 = vrcp.f32 %v485_v42  ;;  %v1178_v29 = vadd.f32 1.0, %v3941_v16  ;;  %v293_v21 = vadd.f32 %v277_v59, %v209_v7 }
  0xc4   :  { %v3945_v35 = vpop.eup %3944  ;;  %3968 = vrcp.f32 %v486_v33  ;;  %v1179_v10 = vadd.f32 1.0, %v3943_v8  ;;  %v5010_v11 = vadd.f32 %v759_v41, %v4877_v56  ;;  %v5012_v12 = vadd.f32 %v358_v14, %v290_v32 }
  0xc5   :  { %v3947_v4 = vpop.eup %3946  ;;  %3970 = vrcp.f32 %v487_v24  ;;  %v1180_v22 = vadd.f32 1.0, %v3945_v35  ;;  %v5015_v52 = vadd.f32 %v759_v41, %v4879_v25  ;;  %v5017_v23 = vadd.f32 %v359_v15, %v291_v3  ;;  %v755_v3 = vpop.permute.xlu1 %754 }
  0xc6   :  { %6809 = vst [vmem:[#allocation24_spill] sm:$0xff] %v5010_v11  ;;  %v3949_v51 = vpop.eup %3948  ;;  %v1181_v34 = vadd.f32 1.0, %v3947_v4  ;;  %3972 = vrcp.f32 %v1178_v29  ;;  %v5020_v28 = vadd.f32 %v759_v41, %v4881_v60  ;;  %v5022_v50 = vadd.f32 %v360_v47, %v292_v17 }
  0xc7   :  { %v3951_v6 = vpop.eup %3950  ;;  %3974 = vrcp.f32 %v1179_v10  ;;  %v476_v63 = vadd.f32 1.0, %v3949_v51  ;;  %v5025_v13 = vadd.f32 %v759_v41, %v4883_v61  ;;  %v5027_v7 = vadd.f32 %v361_v20, %v293_v21 }
  0xc8   :  { %6810 = vst [vmem:[#allocation25_spill] sm:$0xff] %v5020_v28  ;;  %v3953_v19 = vpop.eup %3952  ;;  %3976 = vrcp.f32 %v1180_v22  ;;  %v477_v14 = vadd.f32 1.0, %v3951_v6  ;;  %v789_v59 = vsub.f32 0.0, %v5010_v11  ;;  %v790_v15 = vsub.f32 0.0, %v5015_v52 }
  0xc9   :  { %6811 = vst [vmem:[#allocation26_spill] sm:$0xff] %v5025_v13  ;;  %v3955_v42 = vpop.eup %3954  ;;  %3978 = vrcp.f32 %v1181_v34  ;;  %v478_v26 = vadd.f32 1.0, %v3953_v19  ;;  %v5032_v32 = vadd.f32 %v1433_v5, %v4917_v53  ;;  %v791_v41 = vsub.f32 0.0, %v5020_v28 }
  0xca   :  { %v3957_v33 = vpop.eup %3956  ;;  %v479_v16 = vadd.f32 1.0, %v3955_v42  ;;  %3980 = vrcp.f32 %v476_v63  ;;  %v5036_v47 = vadd.f32 %v1433_v5, %v4919_v54  ;;  %v792_v20 = vsub.f32 0.0, %v5025_v13 }
  0xcb   :  { %6812 = vst [vmem:[#allocation27_spill] sm:$0xff] %v5032_v32  ;;  %v3959_v24 = vpop.eup %3958  ;;  %3982 = vrcp.f32 %v477_v14  ;;  %v1523_v8 = vadd.f32 1.0, %v3957_v33  ;;  %v5040_v17 = vadd.f32 %v1433_v5, %v4921_v55  ;;  %v813_v21 = vmul.f32 1.442695, %v789_v59  ;;  %v1782_v14 = vpop.permute.xlu0 %1781 }
  0xcc   :  { %6813 = vst [vmem:[#allocation28_spill] sm:$0xff] %v5036_v47  ;;  %v3961_v29 = vpop.eup %3960  ;;  %3984 = vrcp.f32 %v478_v26  ;;  %v1524_v35 = vadd.f32 1.0, %v3959_v24  ;;  %v5043_v10 = vadd.f32 %v1433_v5, %v4923_v38  ;;  %v1463_v22 = vsub.f32 0.0, %v5032_v32 }
  0xcd   :  { %6814 = vst [vmem:[#allocation29_spill] sm:$0xff] %v5040_v17  ;;  %3986 = vrcp.f32 %v479_v16  ;;  %v1525_v4 = vadd.f32 1.0, %v3961_v29  ;;  %v5047_v51 = vadd.f32 %v755_v3, %v5012_v12  ;;  %v815_v6 = vmul.f32 1.442695, %v790_v15 }
  0xce   :  { %6815 = vst [vmem:[#allocation30_spill] sm:$0xff] %v5043_v10  ;;  %v3963_v34 = vpop.eup %3962  ;;  %3988 = vrcp.f32 %v1523_v8  ;;  %v1464_v63 = vsub.f32 0.0, %v5036_v47  ;;  %v5051_v19 = vadd.f32 %v755_v3, %v5017_v23  ;;  %v817_v5 = vmul.f32 1.442695, %v791_v41 }
  0xcf   :  { %6816 = vst [vmem:[#allocation31_spill] sm:$0xff] %v5047_v51  ;;  %v5053_v59 = vpop.eup %3964  ;;  %3990 = vrcp.f32 %v1524_v35  ;;  %v1465_v42 = vsub.f32 0.0, %v5040_v17  ;;  %v5057_v26 = vadd.f32 %v755_v3, %v5022_v50  ;;  %v819_v16 = vmul.f32 1.442695, %v792_v20 }
  0xd0   :  { %6817 = vst [vmem:[#allocation32_spill] sm:$0xff] %v5051_v19  ;;  %v5059_v33 = vpop.eup %3966  ;;  %3992 = vrcp.f32 %v1525_v4  ;;  %v1466_v15 = vsub.f32 0.0, %v5043_v10  ;;  %v5063_v24 = vadd.f32 %v755_v3, %v5027_v7  ;;  %v1479_v29 = vmul.f32 1.442695, %v1463_v22 }
  0xd1   :  { %6818 = vst [vmem:[#allocation33_spill] sm:$0xff] %v5057_v26  ;;  %v5065_v8 = vpop.eup %3968  ;;  %3994 = vpow2.f32 %v813_v21  ;;  %v785_v41 = vsub.f32 0.0, %v5047_v51  ;;  %v5069_v35 = vadd.f32 %v1782_v14, %v4877_v56  ;;  %v1481_v32 = vmul.f32 1.442695, %v1464_v63 }
  0xd2   :  { %6819 = vst [vmem:[#allocation34_spill] sm:$0xff] %v5063_v24  ;;  %v5071_v17 = vpop.eup %3970  ;;  %3996 = vpow2.f32 %v815_v6  ;;  %v786_v20 = vsub.f32 0.0, %v5051_v19  ;;  %v5075_v4 = vadd.f32 %v1782_v14, %v4879_v25  ;;  %v1483_v10 = vmul.f32 1.442695, %v1465_v42 }
  0xd3   :  { %6820 = vst [vmem:[#allocation35_spill] sm:$0xff] %v5069_v35  ;;  %v5077_v3 = vpop.eup %3972  ;;  %3998 = vpow2.f32 %v817_v5  ;;  %v787_v21 = vsub.f32 0.0, %v5057_v26  ;;  %v5081_v22 = vadd.f32 %v1782_v14, %v4881_v60  ;;  %v1485_v30 = vmul.f32 1.442695, %v1466_v15 }
  0xd4   :  { %6821 = vst [vmem:[#allocation36_spill] sm:$0xff] %v5075_v4  ;;  %6822 = vst [vmem:[#allocation37_spill] sm:$0xff] %v5077_v3  ;;  %v5083_v47 = vpop.eup %3974  ;;  %4000 = vpow2.f32 %v819_v16  ;;  %v788_v6 = vsub.f32 0.0, %v5063_v24  ;;  %v805_v58 = vmul.f32 1.442695, %v785_v41  ;;  %v5089_v48 = vadd.f32 %v1782_v14, %v4883_v61 }
  0xd5   :  { %6823 = vst [vmem:[#allocation38_spill] sm:$0xff] %v5081_v22  ;;  %6824 = vst [vmem:[#allocation39_spill] sm:$0xff] %v5083_v47  ;;  %v5086_v63 = vpop.eup %3976  ;;  %4002 = vpow2.f32 %v1479_v29  ;;  %v1812_v5 = vsub.f32 0.0, %v5069_v35  ;;  %v807_v40 = vmul.f32 1.442695, %v786_v20  ;;  %v1813_v3 = vsub.f32 0.0, %v5075_v4 }
  0xd6   :  { %6825 = vst [vmem:[#allocation40_spill] sm:$0xff] %v5086_v63  ;;  %6826 = vst [vmem:[#allocation41_spill] sm:$0xff] %v5089_v48  ;;  %v5092_v42 = vpop.eup %3978  ;;  %4004 = vpow2.f32 %v1481_v32  ;;  %v809_v16 = vmul.f32 1.442695, %v787_v21  ;;  %v1814_v15 = vsub.f32 0.0, %v5081_v22  ;;  %v1815_v41 = vsub.f32 0.0, %v5089_v48 }
  0xd7   :  { %6827 = vst [vmem:[#allocation42_spill] sm:$0xff] %v5092_v42  ;;  %v5095_v47 = vpop.eup %3980  ;;  %4006 = vpow2.f32 %v1483_v10  ;;  %v811_v29 = vmul.f32 1.442695, %v788_v6  ;;  %v1836_v35 = vmul.f32 1.442695, %v1812_v5  ;;  %v1526_v22 = vadd.f32 1.0, %v3963_v34 }
  0xd8   :  { %v5098_v63 = vpop.eup %3982  ;;  %4008 = vpow2.f32 %v1485_v30  ;;  %v1838_v20 = vmul.f32 1.442695, %v1813_v3  ;;  %v1840_v10 = vmul.f32 1.442695, %v1814_v15  ;;  %v1842_v6 = vmul.f32 1.442695, %v1815_v41 }
  0xd9   :  { %v5100_v14 = vpop.eup %3984  ;;  %4010 = vpow2.f32 %v805_v58 }
  0xda   :  { %v5103_v32 = vpop.eup %3986  ;;  %4012 = vpow2.f32 %v807_v40 }
  0xdb   :  { %v5105_v4 = vpop.eup %3988  ;;  %4014 = vpow2.f32 %v809_v16  ;;  %v1104_v16 = vpop.permute.xlu1 %1103 }
  0xdc   :  { %6828 = vst [vmem:[#allocation43_spill] sm:$0xff] %v5105_v4  ;;  %v5107_v21 = vpop.eup %3990  ;;  %4016 = vpow2.f32 %v811_v29 }
  0xdd   :  { %6829 = vst [vmem:[#allocation44_spill] sm:$0xff] %v5107_v21  ;;  %v5109_v30 = vpop.eup %3992  ;;  %4018 = vpow2.f32 %v1836_v35 }
  0xde   :  { %6830 = vst [vmem:[#allocation45_spill] sm:$0xff] %v5109_v30  ;;  %v3995_v58 = vpop.eup %3994  ;;  %4020 = vpow2.f32 %v1838_v20  ;;  %v5112_v20 = vadd.f32 %v1104_v16, %v4885_v62 }
  0xdf   :  { %v3997_v48 = vpop.eup %3996  ;;  %v837_v5 = vadd.f32 1.0, %v3995_v58  ;;  %4022 = vpow2.f32 %v1840_v10 }
  0xe0   :  { %v3999_v42 = vpop.eup %3998  ;;  %4024 = vrcp.f32 %v1526_v22  ;;  %v838_v40 = vadd.f32 1.0, %v3997_v48  ;;  %6831 = vst [vmem:[#allocation46_spill] sm:$0xff] %v5112_v20 }
  0xe1   :  { %v4001_v3 = vpop.eup %4000  ;;  %v839_v4 = vadd.f32 1.0, %v3999_v42  ;;  %4026 = vpow2.f32 %v1842_v6  ;;  %v5115_v42 = vadd.f32 %v1104_v16, %v4887_v0  ;;  %v5118_v6 = vadd.f32 %v1104_v16, %v4889_v1 }
  0xe2   :  { %v4003_v15 = vpop.eup %4002  ;;  %v840_v21 = vadd.f32 1.0, %v4001_v3  ;;  %4028 = vrcp.f32 %v837_v5  ;;  %v2127_v5 = vpop.permute.xlu0 %2126  ;;  %v5121_v3 = vadd.f32 %v1104_v16, %v4891_v2 }
  0xe3   :  { %v4005_v34 = vpop.eup %4004  ;;  %4030 = vrcp.f32 %v838_v40  ;;  %v1511_v29 = vadd.f32 1.0, %v4003_v15  ;;  %6832 = vst [vmem:[#allocation47_spill] sm:$0xff] %v5115_v42  ;;  %6833 = vst [vmem:[#allocation48_spill] sm:$0xff] %v5118_v6  ;;  %v5128_v30 = vadd.f32 %v2127_v5, %v4887_v0  ;;  %v1135_v16 = vsub.f32 0.0, %v5115_v42 }
  0xe4   :  { %v4007_v35 = vpop.eup %4006  ;;  %4032 = vrcp.f32 %v839_v4  ;;  %v1512_v41 = vadd.f32 1.0, %v4005_v34  ;;  %6834 = vst [vmem:[#allocation49_spill] sm:$0xff] %v5121_v3  ;;  %v1134_v34 = vsub.f32 0.0, %v5112_v20 }
  0xe5   :  { %v4009_v10 = vpop.eup %4008  ;;  %4034 = vrcp.f32 %v840_v21  ;;  %v1513_v22 = vadd.f32 1.0, %v4007_v35  ;;  %6836 = vst [vmem:[#allocation51_spill] sm:$0xff] %v5128_v30  ;;  %v2158_v24 = vsub.f32 0.0, %v5128_v30 }
  0xe6   :  { %v4011_v48 = vpop.eup %4010  ;;  %v1514_v58 = vadd.f32 1.0, %v4009_v10  ;;  %4036 = vrcp.f32 %v1511_v29  ;;  %v5125_v10 = vadd.f32 %v2127_v5, %v4885_v62  ;;  %v1162_v51 = vmul.f32 1.442695, %v1134_v34  ;;  %v2115_v34 = vpop.permute.xlu0 %2114 }
  0xe7   :  { %v4013_v40 = vpop.eup %4012  ;;  %4038 = vrcp.f32 %v1512_v41  ;;  %v833_v4 = vadd.f32 1.0, %v4011_v48  ;;  %v1136_v48 = vsub.f32 0.0, %v5118_v6  ;;  %v2187_v28 = vmul.f32 1.442695, %v2158_v24 }
  0xe8   :  { %v4015_v15 = vpop.eup %4014  ;;  %4040 = vrcp.f32 %v1513_v22  ;;  %v834_v21 = vadd.f32 1.0, %v4013_v40  ;;  %6835 = vst [vmem:[#allocation50_spill] sm:$0xff] %v5125_v10  ;;  %v1096_v22 = vpop.permute.xlu1 %1095  ;;  %v2157_v42 = vsub.f32 0.0, %v5125_v10 }
  0xe9   :  { %v4017_v35 = vpop.eup %4016  ;;  %4042 = vrcp.f32 %v1514_v58  ;;  %v835_v29 = vadd.f32 1.0, %v4015_v15  ;;  %v1137_v58 = vsub.f32 0.0, %v5121_v3  ;;  %v5134_v15 = vadd.f32 %v2127_v5, %v4889_v1 }
  0xea   :  { %v4019_v57 = vpop.eup %4018  ;;  %v836_v41 = vadd.f32 1.0, %v4017_v35  ;;  %4044 = vrcp.f32 %v833_v4  ;;  %v5137_v35 = vadd.f32 %v2127_v5, %v4891_v2  ;;  %v1164_v3 = vmul.f32 1.442695, %v1135_v16 }
  0xeb   :  { %v4021_v40 = vpop.eup %4020  ;;  %4046 = vrcp.f32 %v834_v21  ;;  %v1860_v20 = vadd.f32 1.0, %v4019_v57  ;;  %6837 = vst [vmem:[#allocation52_spill] sm:$0xff] %v5134_v15  ;;  %v5143_v57 = vadd.f32 %v1096_v22, %v5012_v12  ;;  %v5159_v30 = vadd.f32 %v1096_v22, %v5027_v7 }
  0xec   :  { %v4023_v49 = vpop.eup %4022  ;;  %4048 = vrcp.f32 %v835_v29  ;;  %v1861_v26 = vadd.f32 1.0, %v4021_v40  ;;  %6838 = vst [vmem:[#allocation53_spill] sm:$0xff] %v5137_v35  ;;  %v5147_v29 = vadd.f32 %v1096_v22, %v5017_v23  ;;  %v1166_v40 = vmul.f32 1.442695, %v1136_v48 }
  0xed   :  { %v5139_v4 = vpop.eup %4024  ;;  %4050 = vrcp.f32 %v836_v41  ;;  %v1862_v6 = vadd.f32 1.0, %v4023_v49  ;;  %6840 = vst [vmem:[#allocation55_spill] sm:$0xff] %v5143_v57  ;;  %v2159_v49 = vsub.f32 0.0, %v5134_v15  ;;  %v5153_v41 = vadd.f32 %v1096_v22, %v5022_v50  ;;  %6844 = vst [vmem:[#allocation59_spill] sm:$0xff] %v5159_v30 }
  0xee   :  { %6839 = vst [vmem:[#allocation54_spill] sm:$0xff] %v5139_v4  ;;  %v4027_v21 = vpop.eup %4026  ;;  %4052 = vrcp.f32 %v1860_v20  ;;  %6841 = vst [vmem:[#allocation56_spill] sm:$0xff] %v5147_v29  ;;  %v1168_v20 = vmul.f32 1.442695, %v1137_v58  ;;  %v2160_v16 = vsub.f32 0.0, %v5137_v35  ;;  %v5165_v48 = vadd.f32 %v2115_v34, %v4917_v53 }
  0xef   :  { %v5149_v5 = vpop.eup %4028  ;;  %4054 = vrcp.f32 %v1861_v26  ;;  %6843 = vst [vmem:[#allocation58_spill] sm:$0xff] %v5153_v41  ;;  %v2185_v19 = vmul.f32 1.442695, %v2157_v42  ;;  %v1126_v26 = vsub.f32 0.0, %v5143_v57  ;;  %v5171_v58 = vadd.f32 %v2115_v34, %v4919_v54 }
  0xf0   :  { %6842 = vst [vmem:[#allocation57_spill] sm:$0xff] %v5149_v5  ;;  %v5155_v10 = vpop.eup %4030  ;;  %4056 = vrcp.f32 %v1862_v6  ;;  %6846 = vst [vmem:[#allocation61_spill] sm:$0xff] %v5165_v48  ;;  %v1127_v6 = vsub.f32 0.0, %v5147_v29  ;;  %v2189_v35 = vmul.f32 1.442695, %v2159_v49  ;;  %v5177_v42 = vadd.f32 %v2115_v34, %v4921_v55 }
  0xf1   :  { %v5161_v4 = vpop.eup %4032  ;;  %4058 = vpow2.f32 %v1162_v51  ;;  %6848 = vst [vmem:[#allocation63_spill] sm:$0xff] %v5171_v58  ;;  %v1128_v51 = vsub.f32 0.0, %v5153_v41  ;;  %v1129_v24 = vsub.f32 0.0, %v5159_v30  ;;  %v1146_v29 = vmul.f32 1.442695, %v1126_v26 }
  0xf2   :  { %6845 = vst [vmem:[#allocation60_spill] sm:$0xff] %v5161_v4  ;;  %v5167_v15 = vpop.eup %4034  ;;  %4060 = vpow2.f32 %v1164_v3  ;;  %6850 = vst [vmem:[#allocation65_spill] sm:$0xff] %v5177_v42  ;;  %v2191_v4 = vmul.f32 1.442695, %v2160_v16  ;;  %v5185_v5 = vadd.f32 %v2115_v34, %v4923_v38  ;;  %v2146_v41 = vsub.f32 0.0, %v5171_v58 }
  0xf3   :  { %6847 = vst [vmem:[#allocation62_spill] sm:$0xff] %v5167_v15  ;;  %v5173_v22 = vpop.eup %4036  ;;  %4062 = vpow2.f32 %v1166_v40  ;;  %v2145_v40 = vsub.f32 0.0, %v5165_v48  ;;  %v2147_v16 = vsub.f32 0.0, %v5177_v42  ;;  %v1863_v42 = vadd.f32 1.0, %v4027_v21 }
  0xf4   :  { %6849 = vst [vmem:[#allocation64_spill] sm:$0xff] %v5173_v22  ;;  %v5179_v57 = vpop.eup %4038  ;;  %4064 = vpow2.f32 %v1168_v20  ;;  %6853 = vst [vmem:[#allocation68_spill] sm:$0xff] %v5185_v5  ;;  %v1148_v22 = vmul.f32 1.442695, %v1127_v6  ;;  %v1150_v20 = vmul.f32 1.442695, %v1128_v51 }
  0xf5   :  { %6851 = vst [vmem:[#allocation66_spill] sm:$0xff] %v5179_v57  ;;  %v5182_v3 = vpop.eup %4040  ;;  %4066 = vpow2.f32 %v2185_v19  ;;  %v1152_v19 = vmul.f32 1.442695, %v1129_v24  ;;  %v2148_v26 = vsub.f32 0.0, %v5185_v5  ;;  %v2161_v48 = vmul.f32 1.442695, %v2145_v40 }
  0xf6   :  { %6852 = vst [vmem:[#allocation67_spill] sm:$0xff] %v5182_v3  ;;  %v5188_v49 = vpop.eup %4042  ;;  %4068 = vpow2.f32 %v2187_v28  ;;  %v2163_v6 = vmul.f32 1.442695, %v2146_v41 }
  0xf7   :  { %6854 = vst [vmem:[#allocation69_spill] sm:$0xff] %v5188_v49  ;;  %v5191_v57 = vpop.eup %4044  ;;  %4070 = vpow2.f32 %v2189_v35  ;;  %v2165_v35 = vmul.f32 1.442695, %v2147_v16  ;;  %v2167_v24 = vmul.f32 1.442695, %v2148_v26 }
  0xf8   :  { %6855 = vst [vmem:[#allocation70_spill] sm:$0xff] %v5191_v57  ;;  %v5194_v3 = vpop.eup %4046  ;;  %4072 = vpow2.f32 %v2191_v4 }
  0xf9   :  { %6856 = vst [vmem:[#allocation71_spill] sm:$0xff] %v5194_v3  ;;  %v5196_v34 = vpop.eup %4048  ;;  %4074 = vpow2.f32 %v1146_v29 }
  0xfa   :  { %6857 = vst [vmem:[#allocation72_spill] sm:$0xff] %v5196_v34  ;;  %v5199_v28 = vpop.eup %4050  ;;  %4076 = vpow2.f32 %v1148_v22  ;;  %v1092_v22 = vpop.permute.xlu1 %1091 }
  0xfb   :  { %6858 = vst [vmem:[#allocation73_spill] sm:$0xff] %v5199_v28  ;;  %v5201_v58 = vpop.eup %4052  ;;  %4078 = vpow2.f32 %v1150_v20 }
  0xfc   :  { %6859 = vst [vmem:[#allocation74_spill] sm:$0xff] %v5201_v58  ;;  %v5203_v51 = vpop.eup %4054  ;;  %4080 = vpow2.f32 %v1152_v19 }
  0xfd   :  { %6860 = vst [vmem:[#allocation75_spill] sm:$0xff] %v5203_v51  ;;  %v5205_v4 = vpop.eup %4056  ;;  %4082 = vpow2.f32 %v2161_v48  ;;  %v5208_v48 = vadd.f32 %v1092_v22, %v4917_v53 }
  0xfe   :  { %6861 = vst [vmem:[#allocation76_spill] sm:$0xff] %v5205_v4  ;;  %v4059_v29 = vpop.eup %4058  ;;  %4084 = vpow2.f32 %v2163_v6 }
  0xff   :  { %v4061_v5 = vpop.eup %4060  ;;  %v1182_v40 = vadd.f32 1.0, %v4059_v29  ;;  %4086 = vpow2.f32 %v2165_v35  ;;  %6862 = vst [vmem:[#allocation77_spill] sm:$0xff] %v5208_v48  ;;  %v5211_v35 = vadd.f32 %v1092_v22, %v4919_v54  ;;  %v5217_v29 = vadd.f32 %v1092_v22, %v4923_v38 }
 0x100   :  { %v4063_v49 = vpop.eup %4062  ;;  %4088 = vrcp.f32 %v1863_v42  ;;  %v1183_v41 = vadd.f32 1.0, %v4061_v5 }
 0x101   :  { %v4065_v58 = vpop.eup %4064  ;;  %v1184_v20 = vadd.f32 1.0, %v4063_v49  ;;  %4090 = vpow2.f32 %v2167_v24  ;;  %6863 = vst [vmem:[#allocation78_spill] sm:$0xff] %v5211_v35  ;;  %v5214_v49 = vadd.f32 %v1092_v22, %v4921_v55  ;;  %6865 = vst [vmem:[#allocation80_spill] sm:$0xff] %v5217_v29 }
 0x102   :  { %v4067_v16 = vpop.eup %4066  ;;  %v1185_v51 = vadd.f32 1.0, %v4065_v58  ;;  %4092 = vrcp.f32 %v1182_v40  ;;  %v2464_v40 = vpop.permute.xlu0 %2463 }
 0x103   :  { %v4069_v21 = vpop.eup %4068  ;;  %4094 = vrcp.f32 %v1183_v41  ;;  %v2205_v19 = vadd.f32 1.0, %v4067_v16  ;;  %6864 = vst [vmem:[#allocation79_spill] sm:$0xff] %v5214_v49  ;;  %v1122_v16 = vsub.f32 0.0, %v5208_v48  ;;  %v5223_v22 = vadd.f32 %v2464_v40, %v4877_v56 }
 0x104   :  { %v4071_v26 = vpop.eup %4070  ;;  %4096 = vrcp.f32 %v1184_v20  ;;  %v2206_v6 = vadd.f32 1.0, %v4069_v21  ;;  %v5233_v28 = vadd.f32 %v2464_v40, %v4883_v61 }
 0x105   :  { %v4073_v5 = vpop.eup %4072  ;;  %4098 = vrcp.f32 %v1185_v51  ;;  %v2207_v42 = vadd.f32 1.0, %v4071_v26  ;;  %v1123_v51 = vsub.f32 0.0, %v5211_v35  ;;  %v1441_v26 = vpop.permute.xlu1 %1440  ;;  %6866 = vst [vmem:[#allocation81_spill] sm:$0xff] %v5223_v22  ;;  %v1138_v48 = vmul.f32 1.442695, %v1122_v16 }
 0x106   :  { %v4075_v58 = vpop.eup %4074  ;;  %v2208_v24 = vadd.f32 1.0, %v4073_v5  ;;  %4100 = vrcp.f32 %v2205_v19  ;;  %v1124_v19 = vsub.f32 0.0, %v5214_v49  ;;  %6869 = vst [vmem:[#allocation84_spill] sm:$0xff] %v5233_v28 }
 0x107   :  { %v4077_v41 = vpop.eup %4076  ;;  %4102 = vrcp.f32 %v2206_v6  ;;  %v1174_v20 = vadd.f32 1.0, %v4075_v58  ;;  %v1125_v6 = vsub.f32 0.0, %v5217_v29  ;;  %v5227_v58 = vadd.f32 %v2464_v40, %v4879_v25 }
 0x108   :  { %v4079_v21 = vpop.eup %4078  ;;  %4104 = vrcp.f32 %v2207_v42  ;;  %v1175_v4 = vadd.f32 1.0, %v4077_v41  ;;  %v1140_v35 = vmul.f32 1.442695, %v1123_v51  ;;  %v2494_v29 = vsub.f32 0.0, %v5223_v22 }
 0x109   :  { %v4081_v30 = vpop.eup %4080  ;;  %4106 = vrcp.f32 %v2208_v24  ;;  %v1176_v34 = vadd.f32 1.0, %v4079_v21  ;;  %6867 = vst [vmem:[#allocation82_spill] sm:$0xff] %v5227_v58  ;;  %v5230_v24 = vadd.f32 %v2464_v40, %v4881_v60  ;;  %v5245_v51 = vadd.f32 %v1441_v26, %v4879_v25  ;;  %v1437_v40 = vpop.permute.xlu1 %1436 }
 0x10a   :  { %v4083_v5 = vpop.eup %4082  ;;  %v1177_v57 = vadd.f32 1.0, %v4081_v30  ;;  %4108 = vrcp.f32 %v1174_v20  ;;  %v5251_v22 = vadd.f32 %v1441_v26, %v4881_v60  ;;  %v2518_v3 = vmul.f32 1.442695, %v2494_v29 }
 0x10b   :  { %v4085_v42 = vpop.eup %4084  ;;  %4110 = vrcp.f32 %v1175_v4  ;;  %v2193_v41 = vadd.f32 1.0, %v4083_v5  ;;  %6868 = vst [vmem:[#allocation83_spill] sm:$0xff] %v5230_v24  ;;  %v5239_v4 = vadd.f32 %v1441_v26, %v4877_v56  ;;  %v1142_v5 = vmul.f32 1.442695, %v1124_v19  ;;  %6872 = vst [vmem:[#allocation87_spill] sm:$0xff] %v5245_v51 }
 0x10c   :  { %v4087_v21 = vpop.eup %4086  ;;  %4112 = vrcp.f32 %v1176_v34  ;;  %v2194_v49 = vadd.f32 1.0, %v4085_v42  ;;  %v2495_v34 = vsub.f32 0.0, %v5227_v58  ;;  %6874 = vst [vmem:[#allocation89_spill] sm:$0xff] %v5251_v22  ;;  %v2497_v19 = vsub.f32 0.0, %v5233_v28 }
 0x10d   :  { %v5235_v30 = vpop.eup %4088  ;;  %4114 = vrcp.f32 %v1177_v57  ;;  %v2195_v20 = vadd.f32 1.0, %v4087_v21  ;;  %6871 = vst [vmem:[#allocation86_spill] sm:$0xff] %v5239_v4  ;;  %v1144_v57 = vmul.f32 1.442695, %v1125_v6  ;;  %v2496_v21 = vsub.f32 0.0, %v5230_v24 }
 0x10e   :  { %6870 = vst [vmem:[#allocation85_spill] sm:$0xff] %v5235_v30  ;;  %v5241_v16 = vpop.eup %4090  ;;  %4116 = vrcp.f32 %v2193_v41  ;;  %v5257_v41 = vadd.f32 %v1441_v26, %v4883_v61  ;;  %v5263_v6 = vadd.f32 %v1437_v40, %v5012_v12  ;;  %v6707_v24 = vmov 0.0  }
 0x10f   :  { %v5247_v42 = vpop.eup %4092  ;;  %4118 = vrcp.f32 %v2194_v49  ;;  %v1471_v49 = vsub.f32 0.0, %v5239_v4  ;;  %592 = vmatprep.mubr.f32.mxu0 %v6707_v24  ;;  %663 = vmatprep.mubr.f32.mxu1 %v6707_v24  ;;  %v2520_v28 = vmul.f32 1.442695, %v2495_v34  ;;  %v1472_v26 = vsub.f32 0.0, %v5245_v51 }
 0x110   :  { %6873 = vst [vmem:[#allocation88_spill] sm:$0xff] %v5247_v42  ;;  %v5253_v30 = vpop.eup %4094  ;;  %4120 = vrcp.f32 %v2195_v20  ;;  %6876 = vst [vmem:[#allocation91_spill] sm:$0xff] %v5257_v41  ;;  %v2522_v29 = vmul.f32 1.442695, %v2496_v21  ;;  %v1473_v4 = vsub.f32 0.0, %v5251_v22  ;;  %v5277_v42 = vadd.f32 %v1437_v40, %v5022_v50 }
 0x111   :  { %6875 = vst [vmem:[#allocation90_spill] sm:$0xff] %v5253_v30  ;;  %v5259_v58 = vpop.eup %4096  ;;  %4122 = vpow2.f32 %v1138_v48  ;;  %6878 = vst [vmem:[#allocation93_spill] sm:$0xff] %v5263_v6  ;;  %v2524_v24 = vmul.f32 1.442695, %v2497_v19  ;;  %v1495_v51 = vmul.f32 1.442695, %v1471_v49 }
 0x112   :  { %6877 = vst [vmem:[#allocation92_spill] sm:$0xff] %v5259_v58  ;;  %v5267_v20 = vpop.eup %4098  ;;  %4124 = vpow2.f32 %v1140_v35  ;;  %v5271_v58 = vadd.f32 %v1437_v40, %v5017_v23  ;;  %6882 = vst [vmem:[#allocation97_spill] sm:$0xff] %v5277_v42  ;;  %v1474_v35 = vsub.f32 0.0, %v5257_v41  ;;  %v1469_v19 = vsub.f32 0.0, %v5277_v42 }
 0x113   :  { %6879 = vst [vmem:[#allocation94_spill] sm:$0xff] %v5267_v20  ;;  %v5273_v48 = vpop.eup %4100  ;;  %4126 = vpow2.f32 %v1142_v5  ;;  %v5285_v20 = vadd.f32 %v1437_v40, %v5027_v7  ;;  %v1467_v5 = vsub.f32 0.0, %v5263_v6  ;;  %v2196_v42 = vadd.f32 1.0, %v5241_v16 }
 0x114   :  { %6880 = vst [vmem:[#allocation95_spill] sm:$0xff] %v5271_v58  ;;  %6881 = vst [vmem:[#allocation96_spill] sm:$0xff] %v5273_v48  ;;  %v5279_v30 = vpop.eup %4102  ;;  %4128 = vpow2.f32 %v1144_v57  ;;  %v1497_v48 = vmul.f32 1.442695, %v1472_v26  ;;  %v1468_v22 = vsub.f32 0.0, %v5271_v58  ;;  %v5310_v16 = vadd.f32 %v4744_v37, %v4887_v0 }
 0x115   :  { %6883 = vst [vmem:[#allocation98_spill] sm:$0xff] %v5279_v30  ;;  %v5282_v34 = vpop.eup %4104  ;;  %4130 = vpow2.f32 %v2518_v3  ;;  %6885 = vst [vmem:[#allocation100_spill] sm:$0xff] %v5285_v20  ;;  %v1499_v57 = vmul.f32 1.442695, %v1473_v4  ;;  %v1501_v3 = vmul.f32 1.442695, %v1474_v35 }
 0x116   :  { %6884 = vst [vmem:[#allocation99_spill] sm:$0xff] %v5282_v34  ;;  %v5288_v21 = vpop.eup %4106  ;;  %4132 = vpow2.f32 %v2520_v28  ;;  %v1470_v49 = vsub.f32 0.0, %v5285_v20  ;;  %v1489_v26 = vmul.f32 1.442695, %v1468_v22  ;;  %v1491_v4 = vmul.f32 1.442695, %v1469_v19 }
 0x117   :  { %6886 = vst [vmem:[#allocation101_spill] sm:$0xff] %v5288_v21  ;;  %v5291_v30 = vpop.eup %4108  ;;  %4134 = vpow2.f32 %v2522_v29  ;;  %v1487_v21 = vmul.f32 1.442695, %v1467_v5 }
 0x118   :  { %6887 = vst [vmem:[#allocation102_spill] sm:$0xff] %v5291_v30  ;;  %v5294_v34 = vpop.eup %4110  ;;  %4136 = vpow2.f32 %v2524_v24 }
 0x119   :  { %6888 = vst [vmem:[#allocation103_spill] sm:$0xff] %v5294_v34  ;;  %v5296_v40 = vpop.eup %4112  ;;  %4138 = vpow2.f32 %v1495_v51  ;;  %v1493_v51 = vmul.f32 1.442695, %v1470_v49 }
 0x11a   :  { %6889 = vst [vmem:[#allocation104_spill] sm:$0xff] %v5296_v40  ;;  %v5299_v28 = vpop.eup %4114  ;;  %4140 = vpow2.f32 %v1497_v48 }
 0x11b   :  { %6890 = vst [vmem:[#allocation105_spill] sm:$0xff] %v5299_v28  ;;  %v5301_v6 = vpop.eup %4116  ;;  %4142 = vpow2.f32 %v1499_v57 }
 0x11c   :  { %6891 = vst [vmem:[#allocation106_spill] sm:$0xff] %v5301_v6  ;;  %v5303_v29 = vpop.eup %4118  ;;  %4144 = vpow2.f32 %v1501_v3 }
 0x11d   :  { %6892 = vst [vmem:[#allocation107_spill] sm:$0xff] %v5303_v29  ;;  %v5306_v24 = vpop.eup %4120  ;;  %4146 = vpow2.f32 %v1487_v21 }
 0x11e   :  { %6893 = vst [vmem:[#allocation108_spill] sm:$0xff] %v5306_v24  ;;  %v4123_v35 = vpop.eup %4122  ;;  %4148 = vpow2.f32 %v1489_v26 }
 0x11f   :  { %v4125_v5 = vpop.eup %4124  ;;  %v1170_v20 = vadd.f32 1.0, %v4123_v35  ;;  %4150 = vpow2.f32 %v1491_v4  ;;  %v2809_v4 = vpop.permute.xlu0 %2808 }
 0x120   :  { %v4127_v48 = vpop.eup %4126  ;;  %4152 = vrcp.f32 %v2196_v42  ;;  %v1171_v22 = vadd.f32 1.0, %v4125_v5  ;;  %v441_v5 = vsub.f32 0.0, %v5310_v16  ;;  %v5328_v41 = vadd.f32 %v2809_v4, %v4891_v2 }
 0x121   :  { %v4129_v6 = vpop.eup %4128  ;;  %v1172_v57 = vadd.f32 1.0, %v4127_v48  ;;  %4154 = vpow2.f32 %v1493_v51  ;;  %v5314_v51 = vadd.f32 %v4744_v37, %v4891_v2 }
 0x122   :  { %v4131_v19 = vpop.eup %4130  ;;  %v1173_v29 = vadd.f32 1.0, %v4129_v6  ;;  %4156 = vrcp.f32 %v1170_v20  ;;  %6897 = vst [vmem:[#allocation112_spill] sm:$0xff] %v5328_v41 }
 0x123   :  { %v4133_v21 = vpop.eup %4132  ;;  %4158 = vrcp.f32 %v1171_v22  ;;  %v2542_v3 = vadd.f32 1.0, %v4131_v19  ;;  %v5318_v19 = vadd.f32 %v2809_v4, %v4885_v62 }
 0x124   :  { %v4135_v49 = vpop.eup %4134  ;;  %4160 = vrcp.f32 %v1172_v57  ;;  %v2543_v26 = vadd.f32 1.0, %v4133_v21 }
 0x125   :  { %v4137_v35 = vpop.eup %4136  ;;  %4162 = vrcp.f32 %v1173_v29  ;;  %v2544_v42 = vadd.f32 1.0, %v4135_v49  ;;  %6894 = vst [vmem:[#allocation109_spill] sm:$0xff] %v5318_v19  ;;  %v5321_v29 = vadd.f32 %v2809_v4, %v4887_v0  ;;  %v2839_v30 = vsub.f32 0.0, %v5318_v19 }
 0x126   :  { %v4139_v6 = vpop.eup %4138  ;;  %v2545_v20 = vadd.f32 1.0, %v4137_v35  ;;  %4164 = vrcp.f32 %v2542_v3  ;;  %v443_v35 = vsub.f32 0.0, %v5314_v51  ;;  %v5325_v3 = vadd.f32 %v2809_v4, %v4889_v1 }
 0x127   :  { %v4141_v48 = vpop.eup %4140  ;;  %4166 = vrcp.f32 %v2543_v26  ;;  %v1519_v22 = vadd.f32 1.0, %v4139_v6  ;;  %6895 = vst [vmem:[#allocation110_spill] sm:$0xff] %v5321_v29  ;;  %v470_v6 = vmul.f32 1.442695, %v441_v5  ;;  %v5338_v5 = vadd.f32 %v4744_v37, %v4889_v1 }
 0x128   :  { %v4143_v57 = vpop.eup %4142  ;;  %4168 = vrcp.f32 %v2544_v42  ;;  %v1520_v21 = vadd.f32 1.0, %v4141_v48  ;;  %6896 = vst [vmem:[#allocation111_spill] sm:$0xff] %v5325_v3  ;;  %v2797_v42 = vpop.permute.xlu0 %2796  ;;  %v474_v34 = vmul.f32 1.442695, %v443_v35 }
 0x129   :  { %v4145_v49 = vpop.eup %4144  ;;  %4170 = vrcp.f32 %v2545_v20  ;;  %v1521_v24 = vadd.f32 1.0, %v4143_v57  ;;  %v5333_v20 = vadd.f32 %v4744_v37, %v4885_v62  ;;  %v442_v35 = vsub.f32 0.0, %v5338_v5 }
 0x12a   :  { %v4147_v58 = vpop.eup %4146  ;;  %v1522_v26 = vadd.f32 1.0, %v4145_v49  ;;  %4172 = vrcp.f32 %v1519_v22  ;;  %v2840_v49 = vsub.f32 0.0, %v5321_v29  ;;  %v1786_v29 = vpop.permute.xlu1 %1785 }
 0x12b   :  { %v4149_v48 = vpop.eup %4148  ;;  %4174 = vrcp.f32 %v1520_v21  ;;  %v1515_v40 = vadd.f32 1.0, %v4147_v58  ;;  %v2841_v58 = vsub.f32 0.0, %v5325_v3  ;;  %v5344_v21 = vadd.f32 %v2797_v42, %v4917_v53 }
 0x12c   :  { %v4151_v57 = vpop.eup %4150  ;;  %4176 = vrcp.f32 %v1521_v24  ;;  %v1516_v28 = vadd.f32 1.0, %v4149_v48  ;;  %v2842_v24 = vsub.f32 0.0, %v5328_v41  ;;  %v5348_v48 = vadd.f32 %v2797_v42, %v4919_v54 }
 0x12d   :  { %v5340_v4 = vpop.eup %4152  ;;  %4178 = vrcp.f32 %v1522_v26  ;;  %v1517_v22 = vadd.f32 1.0, %v4151_v57  ;;  %6899 = vst [vmem:[#allocation114_spill] sm:$0xff] %v5344_v21  ;;  %v440_v26 = vsub.f32 0.0, %v5333_v20  ;;  %v5354_v57 = vadd.f32 %v2797_v42, %v4921_v55 }
 0x12e   :  { %6898 = vst [vmem:[#allocation113_spill] sm:$0xff] %v5340_v4  ;;  %v4155_v19 = vpop.eup %4154  ;;  %4180 = vrcp.f32 %v1515_v40  ;;  %6900 = vst [vmem:[#allocation115_spill] sm:$0xff] %v5348_v48  ;;  %v2867_v4 = vmul.f32 1.442695, %v2839_v30  ;;  %v2869_v40 = vmul.f32 1.442695, %v2840_v49  ;;  %v5360_v41 = vadd.f32 %v2797_v42, %v4923_v38 }
 0x12f   :  { %v5350_v37 = vpop.eup %4156  ;;  %4182 = vrcp.f32 %v1516_v28  ;;  %6902 = vst [vmem:[#allocation117_spill] sm:$0xff] %v5354_v57  ;;  %v2827_v30 = vsub.f32 0.0, %v5344_v21  ;;  %v5366_v28 = vadd.f32 %v1786_v29, %v4885_v62  ;;  %v2828_v49 = vsub.f32 0.0, %v5348_v48 }
 0x130   :  { %6901 = vst [vmem:[#allocation116_spill] sm:$0xff] %v5350_v37  ;;  %v5356_v3 = vpop.eup %4158  ;;  %4184 = vrcp.f32 %v1517_v22  ;;  %6904 = vst [vmem:[#allocation119_spill] sm:$0xff] %v5360_v41  ;;  %v2871_v37 = vmul.f32 1.442695, %v2841_v58  ;;  %v5372_v22 = vadd.f32 %v1786_v29, %v4887_v0  ;;  %v5378_v58 = vadd.f32 %v1786_v29, %v4889_v1 }
 0x131   :  { %6903 = vst [vmem:[#allocation118_spill] sm:$0xff] %v5356_v3  ;;  %v5362_v11 = vpop.eup %4160  ;;  %4186 = vpow2.f32 %v470_v6  ;;  %6906 = vst [vmem:[#allocation121_spill] sm:$0xff] %v5366_v28  ;;  %v2873_v3 = vmul.f32 1.442695, %v2842_v24  ;;  %v2829_v6 = vsub.f32 0.0, %v5354_v57  ;;  %v1816_v13 = vsub.f32 0.0, %v5366_v28 }
 0x132   :  { %6905 = vst [vmem:[#allocation120_spill] sm:$0xff] %v5362_v11  ;;  %v5368_v15 = vpop.eup %4162  ;;  %4188 = vpow2.f32 %v474_v34  ;;  %6908 = vst [vmem:[#allocation123_spill] sm:$0xff] %v5372_v22  ;;  %v468_v11 = vmul.f32 1.442695, %v440_v26  ;;  %v2830_v34 = vsub.f32 0.0, %v5360_v41  ;;  %v1817_v26 = vsub.f32 0.0, %v5372_v22 }
 0x133   :  { %6907 = vst [vmem:[#allocation122_spill] sm:$0xff] %v5368_v15  ;;  %v5374_v42 = vpop.eup %4164  ;;  %4190 = vpow2.f32 %v2867_v4  ;;  %6910 = vst [vmem:[#allocation125_spill] sm:$0xff] %v5378_v58  ;;  %v472_v15 = vmul.f32 1.442695, %v442_v35  ;;  %v2843_v48 = vmul.f32 1.442695, %v2827_v30 }
 0x134   :  { %6909 = vst [vmem:[#allocation124_spill] sm:$0xff] %v5374_v42  ;;  %v5380_v21 = vpop.eup %4166  ;;  %4192 = vpow2.f32 %v2869_v40  ;;  %v2845_v4 = vmul.f32 1.442695, %v2828_v49  ;;  %v5392_v40 = vadd.f32 %v1786_v29, %v4891_v2  ;;  %v1818_v35 = vsub.f32 0.0, %v5378_v58 }
 0x135   :  { %6911 = vst [vmem:[#allocation126_spill] sm:$0xff] %v5380_v21  ;;  %v5383_v24 = vpop.eup %4168  ;;  %4194 = vpow2.f32 %v2871_v37  ;;  %v2847_v21 = vmul.f32 1.442695, %v2829_v6  ;;  %v2849_v37 = vmul.f32 1.442695, %v2830_v34  ;;  %v1518_v58 = vadd.f32 1.0, %v4155_v19 }
 0x136   :  { %6912 = vst [vmem:[#allocation127_spill] sm:$0xff] %v5383_v24  ;;  %v5386_v42 = vpop.eup %4170  ;;  %4196 = vpow2.f32 %v2873_v3  ;;  %6915 = vst [vmem:[#allocation130_spill] sm:$0xff] %v5392_v40  ;;  %v1844_v3 = vmul.f32 1.442695, %v1816_v13  ;;  %v1846_v24 = vmul.f32 1.442695, %v1817_v26 }
 0x137   :  { %6913 = vst [vmem:[#allocation128_spill] sm:$0xff] %v5386_v42  ;;  %v5389_v57 = vpop.eup %4172  ;;  %4198 = vpow2.f32 %v468_v11  ;;  %v1819_v11 = vsub.f32 0.0, %v5392_v40  ;;  %v1848_v29 = vmul.f32 1.442695, %v1818_v35 }
 0x138   :  { %6914 = vst [vmem:[#allocation129_spill] sm:$0xff] %v5389_v57  ;;  %v5395_v41 = vpop.eup %4174  ;;  %4200 = vpow2.f32 %v472_v15 }
 0x139   :  { %6916 = vst [vmem:[#allocation131_spill] sm:$0xff] %v5395_v41  ;;  %v5397_v30 = vpop.eup %4176  ;;  %4202 = vpow2.f32 %v2843_v48 }
 0x13a   :  { %6917 = vst [vmem:[#allocation132_spill] sm:$0xff] %v5397_v30  ;;  %v5399_v49 = vpop.eup %4178  ;;  %4204 = vpow2.f32 %v2845_v4  ;;  %v1850_v4 = vmul.f32 1.442695, %v1819_v11  ;;  %v5414_v11 = vadd.f32 %v4753_v45, %v5027_v7 }
 0x13b   :  { %6918 = vst [vmem:[#allocation133_spill] sm:$0xff] %v5399_v49  ;;  %v5401_v42 = vpop.eup %4180  ;;  %4206 = vpow2.f32 %v2847_v21 }
 0x13c   :  { %6919 = vst [vmem:[#allocation134_spill] sm:$0xff] %v5401_v42  ;;  %v5404_v6 = vpop.eup %4182  ;;  %4208 = vpow2.f32 %v2849_v37 }
 0x13d   :  { %6920 = vst [vmem:[#allocation135_spill] sm:$0xff] %v5404_v6  ;;  %v5406_v15 = vpop.eup %4184  ;;  %4210 = vpow2.f32 %v1844_v3  ;;  %v5410_v3 = vadd.f32 %v4753_v45, %v5017_v23 }
 0x13e   :  { %6921 = vst [vmem:[#allocation136_spill] sm:$0xff] %v5406_v15  ;;  %v4187_v34 = vpop.eup %4186  ;;  %4212 = vpow2.f32 %v1846_v24 }
 0x13f   :  { %v4189_v13 = vpop.eup %4188  ;;  %v489_v48 = vadd.f32 1.0, %v4187_v34  ;;  %4214 = vpow2.f32 %v1848_v29 }
 0x140   :  { %v4191_v26 = vpop.eup %4190  ;;  %4216 = vrcp.f32 %v1518_v58  ;;  %v491_v28 = vadd.f32 1.0, %v4189_v13 }
 0x141   :  { %v4193_v21 = vpop.eup %4192  ;;  %4218 = vrcp.f32 %v489_v48  ;;  %v2887_v40 = vadd.f32 1.0, %v4191_v26  ;;  %v1778_v26 = vpop.permute.xlu1 %1777 }
 0x142   :  { %v4195_v35 = vpop.eup %4194  ;;  %4220 = vrcp.f32 %v491_v28  ;;  %v2888_v22 = vadd.f32 1.0, %v4193_v21  ;;  %v5418_v28 = vadd.f32 %v4753_v45, %v5012_v12 }
 0x143   :  { %v4197_v19 = vpop.eup %4196  ;;  %v2889_v37 = vadd.f32 1.0, %v4195_v35  ;;  %4222 = vpow2.f32 %v1850_v4  ;;  %v5422_v4 = vmul.f32 %v5059_v33, %v4909_v9  ;;  %v5435_v9 = vmul.f32 %v5053_v59, %v4906_v43  ;;  %v5446_v43 = vpop.permute.xlu0 %3145 }
 0x144   :  { %v4199_v24 = vpop.eup %4198  ;;  %4224 = vrcp.f32 %v2887_v40  ;;  %v2890_v29 = vadd.f32 1.0, %v4197_v19  ;;  %v5426_v40 = vadd.f32 %v4753_v45, %v5022_v50  ;;  %v433_v19 = vsub.f32 0.0, %v5410_v3 }
 0x145   :  { %v4201_v58 = vpop.eup %4200  ;;  %4226 = vrcp.f32 %v2888_v22  ;;  %v488_v34 = vadd.f32 1.0, %v4199_v24  ;;  %v5430_v22 = vmul.f32 %v5071_v17, %v4915_v46  ;;  %v435_v45 = vsub.f32 0.0, %v5414_v11 }
 0x146   :  { %v4203_v13 = vpop.eup %4202  ;;  %4228 = vrcp.f32 %v2889_v37  ;;  %v490_v48 = vadd.f32 1.0, %v4201_v58  ;;  %v5440_v46 = vadd.f32 %v1778_v26, %v5012_v12 }
 0x147   :  { %v4205_v21 = vpop.eup %4204  ;;  %4230 = vrcp.f32 %v488_v34  ;;  %v2875_v35 = vadd.f32 1.0, %v4203_v13  ;;  %v432_v34 = vsub.f32 0.0, %v5418_v28  ;;  %v458_v30 = vmul.f32 1.442695, %v435_v45 }
 0x148   :  { %v4207_v37 = vpop.eup %4206  ;;  %4232 = vrcp.f32 %v490_v48  ;;  %v2876_v24 = vadd.f32 1.0, %v4205_v21  ;;  %6922 = vst [vmem:[#allocation137_spill] sm:$0xff] %v5440_v46  ;;  %v434_v48 = vsub.f32 0.0, %v5426_v40  ;;  %v5444_v21 = vadd.f32 %v1778_v26, %v5017_v23 }
 0x149   :  { %v4209_v33 = vpop.eup %4208  ;;  %4234 = vrcp.f32 %v2890_v29  ;;  %v2877_v58 = vadd.f32 1.0, %v4207_v37  ;;  %v454_v29 = vmul.f32 1.442695, %v433_v19  ;;  %v5449_v37 = vadd.f32 %v1778_v26, %v5022_v50 }
 0x14a   :  { %v4211_v17 = vpop.eup %4210  ;;  %v2878_v13 = vadd.f32 1.0, %v4209_v33  ;;  %4236 = vrcp.f32 %v2875_v35  ;;  %6923 = vst [vmem:[#allocation138_spill] sm:$0xff] %v5444_v21  ;;  %v5452_v35 = vadd.f32 %v1778_v26, %v5027_v7  ;;  %v1808_v49 = vsub.f32 0.0, %v5440_v46 }
 0x14b   :  { %v4213_v59 = vpop.eup %4212  ;;  %4238 = vrcp.f32 %v2876_v24  ;;  %v1864_v15 = vadd.f32 1.0, %v4211_v17  ;;  %6924 = vst [vmem:[#allocation139_spill] sm:$0xff] %v5449_v37  ;;  %v5459_v24 = vadd.f32 %v5446_v43, %v4877_v56  ;;  %v452_v17 = vmul.f32 1.442695, %v432_v34 }
 0x14c   :  { %v4215_v42 = vpop.eup %4214  ;;  %4240 = vrcp.f32 %v2877_v58  ;;  %v1865_v6 = vadd.f32 1.0, %v4213_v59  ;;  %6925 = vst [vmem:[#allocation140_spill] sm:$0xff] %v5452_v35  ;;  %v1809_v58 = vsub.f32 0.0, %v5444_v21  ;;  %v5464_v45 = vadd.f32 %v5446_v43, %v4879_v25 }
 0x14d   :  { %v5454_v33 = vpop.eup %4216  ;;  %4242 = vrcp.f32 %v2878_v13  ;;  %v1866_v57 = vadd.f32 1.0, %v4215_v42  ;;  %6927 = vst [vmem:[#allocation142_spill] sm:$0xff] %v5459_v24  ;;  %v1810_v42 = vsub.f32 0.0, %v5449_v37  ;;  %v5470_v13 = vadd.f32 %v5446_v43, %v4881_v60  ;;  %v7053_v37 = vld [vmem:[#allocation131_spill] sm:$0xff] }
 0x14e   :  { %6926 = vst [vmem:[#allocation141_spill] sm:$0xff] %v5454_v33  ;;  %v4219_v19 = vpop.eup %4218  ;;  %4244 = vrcp.f32 %v1864_v15  ;;  %6928 = vst [vmem:[#allocation143_spill] sm:$0xff] %v5464_v45  ;;  %v456_v34 = vmul.f32 1.442695, %v434_v48  ;;  %v1811_v21 = vsub.f32 0.0, %v5452_v35  ;;  %v5486_v48 = vadd.f32 %v4789_v18, %v4891_v2  ;;  %v7044_v35 = vld [vmem:[#allocation44_spill] sm:$0xff] }
 0x14f   :  { %v4221_v26 = vpop.eup %4220  ;;  %v521_v59 = vmul.f32 %v4219_v19, %v5310_v16  ;;  %4246 = vrcp.f32 %v1865_v6  ;;  %6929 = vst [vmem:[#allocation144_spill] sm:$0xff] %v5470_v13  ;;  %v1828_v41 = vmul.f32 1.442695, %v1808_v49  ;;  %v3176_v16 = vsub.f32 0.0, %v5459_v24 }
 0x150   :  { %v4223_v46 = vpop.eup %4222  ;;  %v523_v15 = vmul.f32 %v4221_v26, %v5314_v51  ;;  %4248 = vrcp.f32 %v1866_v57  ;;  %v5479_v6 = vadd.f32 %v4789_v18, %v4887_v0  ;;  %v1830_v51 = vmul.f32 1.442695, %v1809_v58 }
 0x151   :  { %v5474_v33 = vpop.eup %4224  ;;  %552 = vmatprep.subr.mxu0 %v521_v59  ;;  %4250 = vpow2.f32 %v454_v29  ;;  %v3177_v57 = vsub.f32 0.0, %v5464_v45  ;;  %v1832_v49 = vmul.f32 1.442695, %v1810_v42  ;;  %v3178_v29 = vsub.f32 0.0, %v5470_v13 }
 0x152   :  { %6930 = vst [vmem:[#allocation145_spill] sm:$0xff] %v5474_v33  ;;  %v5481_v19 = vpop.eup %4226  ;;  %623 = vmatprep.subr.mxu1 %v523_v15  ;;  %4252 = vpow2.f32 %v458_v30  ;;  %v5493_v59 = vadd.f32 %v4789_v18, %v4885_v62  ;;  %v518_v30 = vmul.f32 %v5065_v8, %v4912_v44  ;;  %v1834_v58 = vmul.f32 1.442695, %v1811_v21 }
 0x153   :  { %6931 = vst [vmem:[#allocation146_spill] sm:$0xff] %v5481_v19  ;;  %v5488_v26 = vpop.eup %4228  ;;  %4254 = vpow2.f32 %v452_v17  ;;  %v5499_v15 = vadd.f32 %v4789_v18, %v4889_v1  ;;  %v3200_v42 = vmul.f32 1.442695, %v3176_v16  ;;  %v794_v13 = vsub.f32 0.0, %v5479_v6 }
 0x154   :  { %6932 = vst [vmem:[#allocation147_spill] sm:$0xff] %v5488_v26  ;;  %v4231_v24 = vpop.eup %4230  ;;  %4256 = vpow2.f32 %v456_v34  ;;  %v3202_v19 = vmul.f32 1.442695, %v3177_v57  ;;  %v796_v44 = vsub.f32 0.0, %v5486_v48  ;;  %v3204_v18 = vmul.f32 1.442695, %v3178_v29 }
 0x155   :  { %v4233_v45 = vpop.eup %4232  ;;  %v520_v17 = vmul.f32 %v4231_v24, %v5333_v20  ;;  %4258 = vpow2.f32 %v1828_v41  ;;  %v793_v21 = vsub.f32 0.0, %v5493_v59  ;;  %v1867_v41 = vadd.f32 1.0, %v4223_v46 }
 0x156   :  { %v5503_v26 = vpop.eup %4234  ;;  %v522_v33 = vmul.f32 %v4233_v45, %v5338_v5  ;;  %4260 = vpow2.f32 %v1830_v51  ;;  %v795_v5 = vsub.f32 0.0, %v5499_v15  ;;  %v5520_v45 = vadd.f32 %v5446_v43, %v4883_v61 }
 0x157   :  { %6933 = vst [vmem:[#allocation148_spill] sm:$0xff] %v5503_v26  ;;  %v5507_v8 = vpop.eup %4236  ;;  %553 = vmatpush1.msra.mxu0 %v520_v17  ;;  %4262 = vpow2.f32 %v1832_v49  ;;  %v823_v34 = vmul.f32 1.442695, %v794_v13 }
 0x158   :  { %6934 = vst [vmem:[#allocation149_spill] sm:$0xff] %v5507_v8  ;;  %v5510_v20 = vpop.eup %4238  ;;  %624 = vmatpush1.msra.mxu1 %v522_v33  ;;  %554 = vmatprep.subr.mxu0 %v5422_v4  ;;  %4264 = vpow2.f32 %v1834_v58  ;;  %6937 = vst [vmem:[#allocation152_spill] sm:$0xff] %v5520_v45  ;;  %v827_v4 = vmul.f32 1.442695, %v796_v44  ;;  %v821_v33 = vmul.f32 1.442695, %v793_v21 }
 0x159   :  { %6935 = vst [vmem:[#allocation150_spill] sm:$0xff] %v5510_v20  ;;  %v5514_v24 = vpop.eup %4240  ;;  %625 = vmatprep.subr.mxu1 %v5430_v22  ;;  %555 = vmatpush1.msra.mxu0 %v5435_v9  ;;  %4266 = vpow2.f32 %v3200_v42  ;;  %v825_v22 = vmul.f32 1.442695, %v795_v5  ;;  %v3179_v43 = vsub.f32 0.0, %v5520_v45 }
 0x15a   :  { %6936 = vst [vmem:[#allocation151_spill] sm:$0xff] %v5514_v24  ;;  %v5522_v16 = vpop.eup %4242  ;;  %626 = vmatpush1.msra.mxu1 %v518_v30  ;;  %4268 = vpow2.f32 %v3202_v19  ;;  %v1774_v19 = vpop.permute.xlu1 %1773 }
 0x15b   :  { %6938 = vst [vmem:[#allocation153_spill] sm:$0xff] %v5522_v16  ;;  %v5524_v46 = vpop.eup %4244  ;;  %4270 = vpow2.f32 %v3204_v18  ;;  %v3206_v42 = vmul.f32 1.442695, %v3179_v43  ;;  %v5532_v21 = vadd.f32 %v1774_v19, %v4917_v53 }
 0x15c   :  { %v5526_v51 = vpop.eup %4246  ;;  %4272 = vrcp.f32 %v1867_v41  ;;  %v5535_v41 = vadd.f32 %v1774_v19, %v4919_v54 }
 0x15d   :  { %v5528_v9 = vpop.eup %4248  ;;  %4274 = vpow2.f32 %v823_v34  ;;  %6939 = vst [vmem:[#allocation154_spill] sm:$0xff] %v5532_v21 }
 0x15e   :  { %v4251_v57 = vpop.eup %4250  ;;  %4276 = vpow2.f32 %v827_v4  ;;  %6940 = vst [vmem:[#allocation155_spill] sm:$0xff] %v5535_v41  ;;  %v5538_v4 = vadd.f32 %v1774_v19, %v4921_v55  ;;  %v2123_v24 = vpop.permute.xlu1 %2122 }
 0x15f   :  { %v4253_v13 = vpop.eup %4252  ;;  %v481_v49 = vadd.f32 1.0, %v4251_v57  ;;  %4278 = vpow2.f32 %v821_v33  ;;  %v5545_v57 = vadd.f32 %v1774_v19, %v4923_v38 }
 0x160   :  { %v4255_v29 = vpop.eup %4254  ;;  %v483_v30 = vadd.f32 1.0, %v4253_v13  ;;  %4280 = vpow2.f32 %v825_v22  ;;  %6941 = vst [vmem:[#allocation156_spill] sm:$0xff] %v5538_v4  ;;  %v5542_v22 = vmul.f32 %v5098_v63, %v4949_v39  ;;  %v3491_v13 = vpop.permute.xlu0 %3490  ;;  %v1804_v39 = vsub.f32 0.0, %v5532_v21  ;;  %v7024_v21 = vld [vmem:[#allocation59_spill] sm:$0xff] }
 0x161   :  { %v4257_v58 = vpop.eup %4256  ;;  %4282 = vrcp.f32 %v481_v49  ;;  %v480_v17 = vadd.f32 1.0, %v4255_v29  ;;  %6942 = vst [vmem:[#allocation157_spill] sm:$0xff] %v5545_v57  ;;  %v5549_v29 = vmul.f32 %v5103_v32, %v4955_v27  ;;  %v1805_v63 = vsub.f32 0.0, %v5535_v41 }
 0x162   :  { %v4259_v44 = vpop.eup %4258  ;;  %4284 = vrcp.f32 %v483_v30  ;;  %v482_v18 = vadd.f32 1.0, %v4257_v58  ;;  %v5553_v58 = vmul.f32 %v5095_v47, %v4942_v36  ;;  %v5559_v27 = vadd.f32 %v3491_v13, %v4885_v62 }
 0x163   :  { %v4261_v5 = vpop.eup %4260  ;;  %4286 = vrcp.f32 %v480_v17  ;;  %v1856_v34 = vadd.f32 1.0, %v4259_v44  ;;  %v1807_v47 = vsub.f32 0.0, %v5545_v57  ;;  %v5575_v45 = vadd.f32 %v3491_v13, %v4891_v2  ;;  %v7030_v57 = vld [vmem:[#allocation104_spill] sm:$0xff] }
 0x164   :  { %v4263_v33 = vpop.eup %4262  ;;  %4288 = vrcp.f32 %v482_v18  ;;  %v1857_v43 = vadd.f32 1.0, %v4261_v5  ;;  %v1806_v5 = vsub.f32 0.0, %v5538_v4  ;;  %6943 = vst [vmem:[#allocation158_spill] sm:$0xff] %v5559_v27  ;;  %v3521_v20 = vsub.f32 0.0, %v5559_v27 }
 0x165   :  { %v4265_v49 = vpop.eup %4264  ;;  %v1858_v30 = vadd.f32 1.0, %v4263_v33  ;;  %4290 = vpow2.f32 %v3206_v42  ;;  %v5563_v42 = vadd.f32 %v3491_v13, %v4887_v0  ;;  %v5569_v33 = vmul.f32 %v5100_v14, %v4952_v31  ;;  %6946 = vst [vmem:[#allocation161_spill] sm:$0xff] %v5575_v45 }
 0x166   :  { %v4267_v17 = vpop.eup %4266  ;;  %v1859_v44 = vadd.f32 1.0, %v4265_v49  ;;  %4292 = vrcp.f32 %v1856_v34  ;;  %v5572_v49 = vadd.f32 %v3491_v13, %v4889_v1  ;;  %v5581_v13 = vadd.f32 %v2123_v24, %v4877_v56 }
 0x167   :  { %v4269_v19 = vpop.eup %4268  ;;  %4294 = vrcp.f32 %v1857_v43  ;;  %v3224_v18 = vadd.f32 1.0, %v4267_v17  ;;  %6944 = vst [vmem:[#allocation159_spill] sm:$0xff] %v5563_v42  ;;  %v3522_v26 = vsub.f32 0.0, %v5563_v42 }
 0x168   :  { %v4271_v32 = vpop.eup %4270  ;;  %4296 = vrcp.f32 %v1858_v30  ;;  %v3225_v36 = vadd.f32 1.0, %v4269_v19  ;;  %6945 = vst [vmem:[#allocation160_spill] sm:$0xff] %v5572_v49  ;;  %v1820_v30 = vmul.f32 1.442695, %v1804_v39  ;;  %v1822_v19 = vmul.f32 1.442695, %v1805_v63 }
 0x169   :  { %v5565_v34 = vpop.eup %4272  ;;  %4298 = vrcp.f32 %v1859_v44  ;;  %v3226_v43 = vadd.f32 1.0, %v4271_v32  ;;  %v1824_v44 = vmul.f32 1.442695, %v1806_v5  ;;  %v1826_v32 = vmul.f32 1.442695, %v1807_v47  ;;  %6947 = vst [vmem:[#allocation162_spill] sm:$0xff] %v5581_v13 }
 0x16a   :  { %v4275_v17 = vpop.eup %4274  ;;  %4300 = vrcp.f32 %v3224_v18  ;;  %v3523_v63 = vsub.f32 0.0, %v5572_v49  ;;  %v3524_v5 = vsub.f32 0.0, %v5575_v45 }
 0x16b   :  { %v4277_v8 = vpop.eup %4276  ;;  %4302 = vrcp.f32 %v3225_v36  ;;  %v842_v16 = vadd.f32 1.0, %v4275_v17  ;;  %v5585_v17 = vadd.f32 %v2123_v24, %v4879_v25 }
 0x16c   :  { %v4279_v31 = vpop.eup %4278  ;;  %4304 = vrcp.f32 %v3226_v43  ;;  %v844_v14 = vadd.f32 1.0, %v4277_v8  ;;  %v3479_v8 = vpop.permute.xlu0 %3478 }
 0x16d   :  { %v4281_v4 = vpop.eup %4280  ;;  %4306 = vrcp.f32 %v842_v16  ;;  %v841_v39 = vadd.f32 1.0, %v4279_v31  ;;  %6948 = vst [vmem:[#allocation163_spill] sm:$0xff] %v5585_v17  ;;  %v3549_v16 = vmul.f32 1.442695, %v3521_v20  ;;  %v5589_v31 = vadd.f32 %v2123_v24, %v4881_v60 }
 0x16e   :  { %v4283_v18 = vpop.eup %4282  ;;  %4308 = vrcp.f32 %v844_v14  ;;  %v843_v36 = vadd.f32 1.0, %v4281_v4  ;;  %v3551_v14 = vmul.f32 1.442695, %v3522_v26  ;;  %v5593_v4 = vadd.f32 %v2123_v24, %v4883_v61 }
 0x16f   :  { %v4285_v47 = vpop.eup %4284  ;;  %v513_v43 = vmul.f32 %v4283_v18, %v5410_v3  ;;  %4310 = vrcp.f32 %v841_v39  ;;  %6949 = vst [vmem:[#allocation164_spill] sm:$0xff] %v5589_v31  ;;  %v2153_v3 = vsub.f32 0.0, %v5581_v13  ;;  %v5598_v20 = vadd.f32 %v3479_v8, %v4917_v53  ;;  %v7001_v13 = vld [vmem:[#allocation90_spill] sm:$0xff] }
 0x170   :  { %v4287_v49 = vpop.eup %4286  ;;  %v515_v27 = vmul.f32 %v4285_v47, %v5414_v11  ;;  %4312 = vrcp.f32 %v843_v36  ;;  %6950 = vst [vmem:[#allocation165_spill] sm:$0xff] %v5593_v4  ;;  %v2154_v11 = vsub.f32 0.0, %v5585_v17  ;;  %v5603_v26 = vadd.f32 %v3479_v8, %v4919_v54 }
 0x171   :  { %v4289_v45 = vpop.eup %4288  ;;  %556 = vmatprep.subr.mxu0 %v513_v43  ;;  %v512_v42 = vmul.f32 %v4287_v49, %v5418_v28  ;;  %4314 = vpow2.f32 %v1820_v30  ;;  %6951 = vst [vmem:[#allocation166_spill] sm:$0xff] %v5598_v20  ;;  %v5610_v28 = vld [vmem:[%s6654_s4] sm:$0xf]  ;;  %v3553_v49 = vmul.f32 1.442695, %v3523_v63  ;;  %v2156_v30 = vsub.f32 0.0, %v5593_v4 }
 0x172   :  { %v4291_v39 = vpop.eup %4290  ;;  %627 = vmatprep.subr.mxu1 %v515_v27  ;;  %v514_v18 = vmul.f32 %v4289_v45, %v5426_v40  ;;  %4316 = vpow2.f32 %v1822_v19  ;;  %6952 = vst [vmem:[#allocation167_spill] sm:$0xff] %v5603_v26  ;;  %v2155_v27 = vsub.f32 0.0, %v5589_v31  ;;  %v3555_v45 = vmul.f32 1.442695, %v3524_v5 }
 0x173   :  { %v5605_v24 = vpop.eup %4292  ;;  %557 = vmatpush1.msra.mxu0 %v512_v42  ;;  %4318 = vpow2.f32 %v1824_v44  ;;  %v5618_v42 = vadd.f32 %v3479_v8, %v4923_v38  ;;  %v2177_v44 = vmul.f32 1.442695, %v2153_v3  ;;  %v5625_v63 = vadd.f32 %v3479_v8, %v4921_v55 }
 0x174   :  { %6953 = vst [vmem:[#allocation168_spill] sm:$0xff] %v5605_v24  ;;  %v5613_v40 = vpop.eup %4294  ;;  %628 = vmatpush1.msra.mxu1 %v514_v18  ;;  %558 = vmatprep.subr.mxu0 %v5542_v22  ;;  %4320 = vpow2.f32 %v1826_v32  ;;  %v3509_v22 = vsub.f32 0.0, %v5598_v20  ;;  %v2179_v36 = vmul.f32 1.442695, %v2154_v11  ;;  %v6960_v8 = vmov 0.0   ;;  %v7055_v24 = vld [vmem:[#allocation91_spill] sm:$0xff] }
 0x175   :  { %6954 = vst [vmem:[#allocation169_spill] sm:$0xff] %v5613_v40  ;;  %6955 = vst [vmem:[#allocation170_spill] sm:$0xff] %v5618_v42  ;;  %v5620_v19 = vpop.eup %4296  ;;  %629 = vmatprep.subr.mxu1 %v5549_v29  ;;  %559 = vmatpush1.msra.mxu0 %v5553_v58  ;;  %4322 = vpow2.f32 %v3549_v16  ;;  %v3510_v29 = vsub.f32 0.0, %v5603_v26  ;;  %v2181_v58 = vmul.f32 1.442695, %v2155_v27  ;;  %v3512_v43 = vsub.f32 0.0, %v5618_v42 }
 0x176   :  { %6956 = vst [vmem:[#allocation171_spill] sm:$0xff] %v5620_v19  ;;  %6957 = vst [vmem:[#allocation172_spill] sm:$0xff] %v5625_v63  ;;  %v5628_v32 = vpop.eup %4298  ;;  %630 = vmatpush1.msra.mxu1 %v5569_v33  ;;  %3835 = vmatmul.mubr.msk.f32.vlgmr.msra.gmra.mxu0 %vm524_vm0, %v5610_v28  ;;  %4324 = vpow2.f32 %v3551_v14  ;;  %v2183_v33 = vmul.f32 1.442695, %v2156_v30  ;;  %v3511_v14 = vsub.f32 0.0, %v5625_v63  ;;  %v3227_v27 = vadd.f32 1.0, %v4291_v39 }
 0x177   :  { %6958 = vst [vmem:[#allocation173_spill] sm:$0xff] %v5628_v32  ;;  %v5634_v5 = vpop.eup %4300  ;;  %3836 = vmatmul.mubr.msk.f32.vlgmr.msra.gmra.mxu1 %vm524_vm0, %v5610_v28  ;;  %4326 = vpow2.f32 %v3553_v49  ;;  %941 = vmatprep.mubr.f32.mxu0 %v6960_v8  ;;  %v3525_v3 = vmul.f32 1.442695, %v3509_v22  ;;  %v3527_v11 = vmul.f32 1.442695, %v3510_v29  ;;  %v6963_v26 = vld [vmem:[#allocation26_spill] sm:$0xff] }
 0x178   :  { %6959 = vst [vmem:[#allocation174_spill] sm:$0xff] %v5634_v5  ;;  %v5639_v47 = vpop.eup %4302  ;;  %4328 = vpow2.f32 %v3555_v45  ;;  %1012 = vmatprep.mubr.f32.mxu1 %v6960_v8  ;;  %v870_v45 = vmul.f32 %v5155_v10, %v5015_v52  ;;  %v3531_v63 = vmul.f32 1.442695, %v3512_v43  ;;  %v6965_v29 = vld [vmem:[#allocation24_spill] sm:$0xff]  ;;  %v6966_v39 = vld [vmem:[#allocation57_spill] sm:$0xff]  ;;  %v7050_v19 = vld [vmem:[#allocation22_spill] sm:$0xff] }
 0x179   :  { %6961 = vst [vmem:[#allocation175_spill] sm:$0xff] %v5639_v47  ;;  %v5643_v16 = vpop.eup %4304  ;;  %4330 = vpow2.f32 %v2177_v44  ;;  %v869_v5 = vmul.f32 %v6966_v39, %v6965_v29  ;;  %v6967_v10 = vld [vmem:[#allocation25_spill] sm:$0xff]  ;;  %v6976_v39 = vld [vmem:[#allocation72_spill] sm:$0xff] }
 0x17a   :  { %6962 = vst [vmem:[#allocation176_spill] sm:$0xff] %v5643_v16  ;;  %v4307_v18 = vpop.eup %4306  ;;  %4332 = vpow2.f32 %v2179_v36  ;;  %v6964_v16 = vld [vmem:[#allocation62_spill] sm:$0xff]  ;;  %v7043_v32 = vld [vmem:[#allocation21_spill] sm:$0xff] }
 0x17b   :  { %v4309_v49 = vpop.eup %4308  ;;  %v874_v20 = vmul.f32 %v4307_v18, %v5479_v6  ;;  %4334 = vpow2.f32 %v2181_v58  ;;  %v872_v44 = vmul.f32 %v6964_v16, %v6963_v26  ;;  %v3529_v6 = vmul.f32 1.442695, %v3511_v14  ;;  %v6970_v26 = vld [vmem:[#allocation71_spill] sm:$0xff]  ;;  %v6972_v16 = vld [vmem:[#allocation73_spill] sm:$0xff]  ;;  %v6974_v14 = vld [vmem:[#allocation70_spill] sm:$0xff] }
 0x17c   :  { %v4311_v30 = vpop.eup %4310  ;;  %v876_v42 = vmul.f32 %v4309_v49, %v5486_v48  ;;  %4336 = vpow2.f32 %v2183_v33  ;;  %v6968_v48 = vld [vmem:[#allocation60_spill] sm:$0xff] }
 0x17d   :  { %v4313_v22 = vpop.eup %4312  ;;  %901 = vmatprep.subr.mxu0 %v874_v20  ;;  %v873_v36 = vmul.f32 %v4311_v30, %v5493_v59  ;;  %4338 = vpow2.f32 %v3525_v3  ;;  %v871_v58 = vmul.f32 %v6968_v48, %v6967_v10  ;;  %v6969_v49 = vld [vmem:[#allocation32_spill] sm:$0xff]  ;;  %v6971_v20 = vld [vmem:[#allocation34_spill] sm:$0xff]  ;;  %v6973_v3 = vld [vmem:[#allocation31_spill] sm:$0xff] }
 0x17e   :  { %v4315_v18 = vpop.eup %4314  ;;  %972 = vmatprep.subr.mxu1 %v876_v42  ;;  %v875_v52 = vmul.f32 %v4313_v22, %v5499_v15  ;;  %v866_v33 = vmul.f32 %v6970_v26, %v6969_v49  ;;  %4340 = vpow2.f32 %v3527_v11  ;;  %v868_v30 = vmul.f32 %v6972_v16, %v6971_v20  ;;  %v6975_v22 = vld [vmem:[#allocation33_spill] sm:$0xff] }
 0x17f   :  { %v4317_v43 = vpop.eup %4316  ;;  %4342 = vrcp.f32 %v3227_v27  ;;  %902 = vmatpush1.msra.mxu0 %v873_v36  ;;  %v1852_v59 = vadd.f32 1.0, %v4315_v18  ;;  %v865_v29 = vmul.f32 %v6974_v14, %v6973_v3  ;;  %v867_v10 = vmul.f32 %v6976_v39, %v6975_v22  ;;  %v6977_v18 = vld [vmem:[#allocation7_spill] sm:$0xff] }
 0x180   :  { %v4319_v42 = vpop.eup %4318  ;;  %973 = vmatpush1.msra.mxu1 %v875_v52  ;;  %v1853_v15 = vadd.f32 1.0, %v4317_v43  ;;  %903 = vmatprep.subr.mxu0 %v870_v45  ;;  %4344 = vpow2.f32 %v3531_v63  ;;  %v5668_v49 = vadd.f32 %v6977_v18, %v4919_v54  ;;  %v2119_v52 = vpop.permute.xlu1 %2118 }
 0x181   :  { %v4321_v48 = vpop.eup %4320  ;;  %v1854_v11 = vadd.f32 1.0, %v4319_v42  ;;  %974 = vmatprep.subr.mxu1 %v872_v44  ;;  %904 = vmatpush1.msra.mxu0 %v869_v5  ;;  %4346 = vpow2.f32 %v3529_v6 }
 0x182   :  { %v4323_v27 = vpop.eup %4322  ;;  %v1855_v36 = vadd.f32 1.0, %v4321_v48  ;;  %4348 = vrcp.f32 %v1852_v59  ;;  %975 = vmatpush1.msra.mxu1 %v871_v58  ;;  %905 = vmatprep.subr.mxu0 %v866_v33  ;;  %v5672_v58 = vadd.f32 %v6977_v18, %v4923_v38  ;;  %v782_v59 = vsub.f32 0.0, %v5668_v49 }
 0x183   :  { %v4325_v45 = vpop.eup %4324  ;;  %4350 = vrcp.f32 %v1853_v15  ;;  %v3569_v26 = vadd.f32 1.0, %v4323_v27  ;;  %976 = vmatprep.subr.mxu1 %v868_v30  ;;  %906 = vmatpush1.msra.mxu0 %v865_v29  ;;  %v5677_v30 = vadd.f32 %v6977_v18, %v4917_v53  ;;  %v5681_v29 = vadd.f32 %v6977_v18, %v4921_v55 }
 0x184   :  { %v4327_v63 = vpop.eup %4326  ;;  %4352 = vrcp.f32 %v1854_v11  ;;  %v3570_v44 = vadd.f32 1.0, %v4325_v45  ;;  %977 = vmatpush1.msra.mxu1 %v867_v10  ;;  %v2468_v42 = vpop.permute.xlu1 %2467  ;;  %v784_v39 = vsub.f32 0.0, %v5672_v58  ;;  %v5685_v10 = vadd.f32 %v2119_v52, %v5012_v12 }
 0x185   :  { %v4329_v5 = vpop.eup %4328  ;;  %4354 = vrcp.f32 %v1855_v36  ;;  %v3571_v6 = vadd.f32 1.0, %v4327_v63  ;;  %v799_v27 = vmul.f32 1.442695, %v782_v59  ;;  %v5688_v36 = vadd.f32 %v2119_v52, %v5017_v23 }
 0x186   :  { %v4331_v33 = vpop.eup %4330  ;;  %v3572_v43 = vadd.f32 1.0, %v4329_v5  ;;  %4356 = vrcp.f32 %v3569_v26  ;;  %6978 = vst [vmem:[#allocation26_spill] sm:$0xff] %v5685_v10  ;;  %v781_v26 = vsub.f32 0.0, %v5677_v30  ;;  %v5692_v63 = vadd.f32 %v2119_v52, %v5022_v50 }
 0x187   :  { %v4333_v20 = vpop.eup %4332  ;;  %4358 = vrcp.f32 %v3570_v44  ;;  %v2201_v16 = vadd.f32 1.0, %v4331_v33  ;;  %6979 = vst [vmem:[#allocation62_spill] sm:$0xff] %v5688_v36  ;;  %v5698_v33 = vadd.f32 %v2119_v52, %v5027_v7  ;;  %v803_v59 = vmul.f32 1.442695, %v784_v39 }
 0x188   :  { %v4335_v3 = vpop.eup %4334  ;;  %4360 = vrcp.f32 %v3571_v6  ;;  %v2202_v14 = vadd.f32 1.0, %v4333_v20  ;;  %6980 = vst [vmem:[#allocation24_spill] sm:$0xff] %v5692_v63  ;;  %v783_v6 = vsub.f32 0.0, %v5681_v29  ;;  %v2149_v20 = vsub.f32 0.0, %v5685_v10 }
 0x189   :  { %v4337_v15 = vpop.eup %4336  ;;  %4362 = vrcp.f32 %v3572_v43  ;;  %v2203_v22 = vadd.f32 1.0, %v4335_v3  ;;  %6982 = vst [vmem:[#allocation25_spill] sm:$0xff] %v5698_v33  ;;  %v2151_v39 = vsub.f32 0.0, %v5692_v63  ;;  %v5720_v47 = vadd.f32 %v2468_v42, %v4891_v2 }
 0x18a   :  { %v4339_v48 = vpop.eup %4338  ;;  %v2204_v11 = vadd.f32 1.0, %v4337_v15  ;;  %4364 = vrcp.f32 %v2201_v16  ;;  %v5702_v16 = vadd.f32 %v2468_v42, %v4885_v62  ;;  %v2150_v15 = vsub.f32 0.0, %v5688_v36 }
 0x18b   :  { %v4341_v45 = vpop.eup %4340  ;;  %4366 = vrcp.f32 %v2202_v14  ;;  %v3557_v18 = vadd.f32 1.0, %v4339_v48  ;;  %v2460_v48 = vpop.permute.xlu1 %2459  ;;  %6989 = vst [vmem:[#allocation70_spill] sm:$0xff] %v5720_v47  ;;  %v2169_v10 = vmul.f32 1.442695, %v2149_v20 }
 0x18c   :  { %v5694_v44 = vpop.eup %4342  ;;  %4368 = vrcp.f32 %v2203_v22  ;;  %v3558_v5 = vadd.f32 1.0, %v4341_v45  ;;  %6983 = vst [vmem:[#allocation60_spill] sm:$0xff] %v5702_v16  ;;  %v5708_v22 = vadd.f32 %v2468_v42, %v4887_v0  ;;  %v5714_v45 = vadd.f32 %v2468_v42, %v4889_v1 }
 0x18d   :  { %6981 = vst [vmem:[#allocation57_spill] sm:$0xff] %v5694_v44  ;;  %v4345_v43 = vpop.eup %4344  ;;  %4370 = vrcp.f32 %v2204_v11  ;;  %v797_v11 = vmul.f32 1.442695, %v781_v26  ;;  %v2498_v26 = vsub.f32 0.0, %v5702_v16  ;;  %v2171_v36 = vmul.f32 1.442695, %v2150_v15 }
 0x18e   :  { %v5704_v3 = vpop.eup %4346  ;;  %v3560_v14 = vadd.f32 1.0, %v4345_v43  ;;  %4372 = vrcp.f32 %v3557_v18  ;;  %6985 = vst [vmem:[#allocation71_spill] sm:$0xff] %v5708_v22  ;;  %6987 = vst [vmem:[#allocation73_spill] sm:$0xff] %v5714_v45  ;;  %v801_v43 = vmul.f32 1.442695, %v783_v6  ;;  %v2152_v18 = vsub.f32 0.0, %v5698_v33 }
 0x18f   :  { %6984 = vst [vmem:[#allocation32_spill] sm:$0xff] %v5704_v3  ;;  %v5710_v52 = vpop.eup %4348  ;;  %4374 = vrcp.f32 %v3558_v5  ;;  %v5726_v5 = vadd.f32 %v2460_v48, %v5012_v12  ;;  %v2499_v6 = vsub.f32 0.0, %v5708_v22  ;;  %v2173_v33 = vmul.f32 1.442695, %v2151_v39 }
 0x190   :  { %6986 = vst [vmem:[#allocation34_spill] sm:$0xff] %v5710_v52  ;;  %v5716_v44 = vpop.eup %4350  ;;  %4376 = vrcp.f32 %v3560_v14  ;;  %v5732_v14 = vadd.f32 %v2460_v48, %v5017_v23  ;;  %v5738_v20 = vadd.f32 %v2460_v48, %v5022_v50  ;;  %v2175_v31 = vmul.f32 1.442695, %v2152_v18  ;;  %v7019_v52 = vld [vmem:[#allocation18_spill] sm:$0xff] }
 0x191   :  { %6988 = vst [vmem:[#allocation31_spill] sm:$0xff] %v5716_v44  ;;  %v5722_v3 = vpop.eup %4352  ;;  %4378 = vpow2.f32 %v799_v27  ;;  %6991 = vst [vmem:[#allocation72_spill] sm:$0xff] %v5726_v5  ;;  %v2500_v27 = vsub.f32 0.0, %v5714_v45  ;;  %v5744_v15 = vadd.f32 %v2460_v48, %v5027_v7  ;;  %v7000_v45 = vld [vmem:[#allocation47_spill] sm:$0xff]  ;;  %v7003_v48 = vld [vmem:[#allocation49_spill] sm:$0xff] }
 0x192   :  { %6990 = vst [vmem:[#allocation33_spill] sm:$0xff] %v5722_v3  ;;  %v5728_v63 = vpop.eup %4354  ;;  %4380 = vpow2.f32 %v803_v59  ;;  %6993 = vst [vmem:[#allocation177_spill] sm:$0xff] %v5732_v14  ;;  %v2501_v59 = vsub.f32 0.0, %v5720_v47  ;;  %v5753_v4 = vmul.f32 %v7001_v13, %v7000_v45  ;;  %v2491_v18 = vsub.f32 0.0, %v5732_v14  ;;  %v7004_v47 = vld [vmem:[#allocation94_spill] sm:$0xff] }
 0x193   :  { %6992 = vst [vmem:[#allocation7_spill] sm:$0xff] %v5728_v63  ;;  %v5734_v42 = vpop.eup %4356  ;;  %4382 = vpow2.f32 %v797_v11  ;;  %6995 = vst [vmem:[#allocation179_spill] sm:$0xff] %v5738_v20  ;;  %v2490_v11 = vsub.f32 0.0, %v5726_v5 }
 0x194   :  { %6994 = vst [vmem:[#allocation178_spill] sm:$0xff] %v5734_v42  ;;  %v5740_v16 = vpop.eup %4358  ;;  %4384 = vpow2.f32 %v801_v43  ;;  %6997 = vst [vmem:[#allocation181_spill] sm:$0xff] %v5744_v15  ;;  %v2526_v42 = vmul.f32 1.442695, %v2498_v26  ;;  %v2528_v43 = vmul.f32 1.442695, %v2499_v6 }
 0x195   :  { %6996 = vst [vmem:[#allocation180_spill] sm:$0xff] %v5740_v16  ;;  %v5746_v22 = vpop.eup %4360  ;;  %4386 = vpow2.f32 %v2169_v10  ;;  %v2530_v10 = vmul.f32 1.442695, %v2500_v27  ;;  %v2492_v26 = vsub.f32 0.0, %v5738_v20  ;;  %v2532_v45 = vmul.f32 1.442695, %v2501_v59 }
 0x196   :  { %6998 = vst [vmem:[#allocation182_spill] sm:$0xff] %v5746_v22  ;;  %v5749_v39 = vpop.eup %4362  ;;  %4388 = vpow2.f32 %v2171_v36  ;;  %v5760_v22 = vmul.f32 %v7004_v47, %v7003_v48  ;;  %v7006_v36 = vld [vmem:[#allocation46_spill] sm:$0xff]  ;;  %v2493_v6 = vsub.f32 0.0, %v5744_v15  ;;  %v7011_v47 = vld [vmem:[#allocation17_spill] sm:$0xff]  ;;  %v7012_v27 = vld [vmem:[#allocation39_spill] sm:$0xff] }
 0x197   :  { %6999 = vst [vmem:[#allocation183_spill] sm:$0xff] %v5749_v39  ;;  %v5756_v16 = vpop.eup %4364  ;;  %4390 = vpow2.f32 %v2173_v33  ;;  %v7007_v39 = vld [vmem:[#allocation88_spill] sm:$0xff]  ;;  %v5778_v48 = vmul.f32 %v7012_v27, %v7011_v47  ;;  %v2510_v20 = vmul.f32 1.442695, %v2490_v11  ;;  %v7017_v15 = vld [vmem:[#allocation37_spill] sm:$0xff]  ;;  %v7022_v11 = vld [vmem:[#allocation103_spill] sm:$0xff] }
 0x198   :  { %7002 = vst [vmem:[#allocation47_spill] sm:$0xff] %v5756_v16  ;;  %v5763_v5 = vpop.eup %4366  ;;  %4392 = vpow2.f32 %v2175_v31  ;;  %v5767_v13 = vmul.f32 %v7007_v39, %v7006_v36  ;;  %v7009_v33 = vld [vmem:[#allocation48_spill] sm:$0xff]  ;;  %v7015_v39 = vld [vmem:[#allocation42_spill] sm:$0xff]  ;;  %v2516_v63 = vmul.f32 1.442695, %v2493_v6 }
 0x199   :  { %7005 = vst [vmem:[#allocation90_spill] sm:$0xff] %v5763_v5  ;;  %v5770_v14 = vpop.eup %4368  ;;  %v7010_v16 = vld [vmem:[#allocation92_spill] sm:$0xff]  ;;  %4394 = vpow2.f32 %v2526_v42  ;;  %v7014_v5 = vld [vmem:[#allocation19_spill] sm:$0xff] }
 0x19a   :  { %7008 = vst [vmem:[#allocation49_spill] sm:$0xff] %v5770_v14  ;;  %v5774_v17 = vmul.f32 %v7010_v16, %v7009_v33  ;;  %v5780_v31 = vpop.eup %4370  ;;  %v5784_v36 = vmul.f32 %v7015_v39, %v7014_v5  ;;  %v7016_v59 = vld [vmem:[#allocation16_spill] sm:$0xff]  ;;  %4396 = vpow2.f32 %v2528_v43  ;;  %v2512_v14 = vmul.f32 1.442695, %v2491_v18  ;;  %v2456_v16 = vpop.permute.xlu1 %2455  ;;  %v7026_v43 = vld [vmem:[#allocation55_spill] sm:$0xff]  ;;  %v7027_v18 = vld [vmem:[#allocation102_spill] sm:$0xff] }
 0x19b   :  { %7013 = vst [vmem:[#allocation94_spill] sm:$0xff] %v5780_v31  ;;  %v5788_v3 = vmul.f32 %v7017_v15, %v7016_v59  ;;  %v5790_v33 = vpop.eup %4372  ;;  %v7020_v47 = vld [vmem:[#allocation40_spill] sm:$0xff]  ;;  %4398 = vpow2.f32 %v2530_v10  ;;  %v2514_v5 = vmul.f32 1.442695, %v2492_v26  ;;  %v7025_v15 = vld [vmem:[#allocation105_spill] sm:$0xff]  ;;  %v7031_v10 = vld [vmem:[#allocation78_spill] sm:$0xff]  ;;  %v5828_v6 = vadd.f32 %v2456_v16, %v4919_v54 }
 0x19c   :  { %7018 = vst [vmem:[#allocation46_spill] sm:$0xff] %v5790_v33  ;;  %v5794_v27 = vmul.f32 %v7020_v47, %v7019_v52  ;;  %v7021_v42 = vld [vmem:[#allocation56_spill] sm:$0xff]  ;;  %v5800_v39 = vpop.eup %4374  ;;  %v5804_v59 = vmul.f32 %v7025_v15, %v7024_v21  ;;  %4400 = vpow2.f32 %v2532_v45  ;;  %v5808_v33 = vmul.f32 %v7027_v18, %v7026_v43  ;;  %v7029_v47 = vld [vmem:[#allocation58_spill] sm:$0xff]  ;;  %v7045_v54 = vld [vmem:[#allocation23_spill] sm:$0xff] }
 0x19d   :  { %v5798_v31 = vmul.f32 %v7022_v11, %v7021_v42  ;;  %7023 = vst [vmem:[#allocation88_spill] sm:$0xff] %v5800_v39  ;;  %v5810_v52 = vpop.eup %4376  ;;  %v5814_v42 = vmul.f32 %v7030_v57, %v7029_v47  ;;  %v7032_v26 = vld [vmem:[#allocation118_spill] sm:$0xff]  ;;  %4402 = vpow2.f32 %v2510_v20  ;;  %v5821_v21 = vadd.f32 %v2456_v16, %v4917_v53  ;;  %v7034_v15 = vld [vmem:[#allocation80_spill] sm:$0xff]  ;;  %7036 = vst [vmem:[#allocation17_spill] sm:$0xff] %v5828_v6 }
 0x19e   :  { %7028 = vst [vmem:[#allocation48_spill] sm:$0xff] %v5810_v52  ;;  %v5818_v11 = vmul.f32 %v7032_v26, %v7031_v10  ;;  %v4379_v45 = vpop.eup %4378  ;;  %v7035_v39 = vld [vmem:[#allocation122_spill] sm:$0xff]  ;;  %4404 = vpow2.f32 %v2512_v14  ;;  %v5831_v57 = vadd.f32 %v2456_v16, %v4921_v55  ;;  %v7038_v10 = vld [vmem:[#allocation77_spill] sm:$0xff]  ;;  %v7039_v20 = vld [vmem:[#allocation116_spill] sm:$0xff]  ;;  %v5838_v52 = vadd.f32 %v2456_v16, %v4923_v38 }
 0x19f   :  { %7033 = vst [vmem:[#allocation92_spill] sm:$0xff] %v5821_v21  ;;  %v5825_v43 = vmul.f32 %v7035_v39, %v7034_v15  ;;  %v4381_v18 = vpop.eup %4380  ;;  %v830_v47 = vadd.f32 1.0, %v4379_v45  ;;  %4406 = vpow2.f32 %v2514_v5  ;;  %v5835_v26 = vmul.f32 %v7039_v20, %v7038_v10  ;;  %v7041_v14 = vld [vmem:[#allocation79_spill] sm:$0xff]  ;;  %v7042_v15 = vld [vmem:[#allocation120_spill] sm:$0xff]  ;;  %v7046_v10 = vld [vmem:[#allocation54_spill] sm:$0xff] }
 0x1a0   :  { %7037 = vst [vmem:[#allocation39_spill] sm:$0xff] %v5831_v57  ;;  %7040 = vst [vmem:[#allocation19_spill] sm:$0xff] %v5838_v52  ;;  %v4383_v44 = vpop.eup %4382  ;;  %v832_v39 = vadd.f32 1.0, %v4381_v18  ;;  %4408 = vpow2.f32 %v2516_v63  ;;  %v5842_v41 = vmul.f32 %v7042_v15, %v7041_v14  ;;  %v5846_v55 = vmul.f32 %v7044_v35, %v7043_v32  ;;  %v2805_v15 = vpop.permute.xlu1 %2804  ;;  %v7047_v32 = vld [vmem:[#allocation20_spill] sm:$0xff] }
 0x1a1   :  { %v4385_v45 = vpop.eup %4384  ;;  %4410 = vrcp.f32 %v830_v47  ;;  %v829_v5 = vadd.f32 1.0, %v4383_v44  ;;  %v5850_v20 = vmul.f32 %v7046_v10, %v7045_v54  ;;  %v2486_v16 = vsub.f32 0.0, %v5821_v21  ;;  %v7048_v47 = vld [vmem:[#allocation43_spill] sm:$0xff] }
 0x1a2   :  { %v4387_v38 = vpop.eup %4386  ;;  %4412 = vrcp.f32 %v832_v39  ;;  %v831_v63 = vadd.f32 1.0, %v4385_v45  ;;  %v2487_v18 = vsub.f32 0.0, %v5828_v6  ;;  %v2488_v14 = vsub.f32 0.0, %v5831_v57  ;;  %v7051_v39 = vld [vmem:[#allocation45_spill] sm:$0xff]  ;;  %v7052_v6 = vld [vmem:[#allocation87_spill] sm:$0xff] }
 0x1a3   :  { %v4389_v53 = vpop.eup %4388  ;;  %4414 = vrcp.f32 %v829_v5  ;;  %v2197_v35 = vadd.f32 1.0, %v4387_v38  ;;  %v5857_v44 = vmul.f32 %v7048_v47, %v7047_v32  ;;  %v2489_v54 = vsub.f32 0.0, %v5838_v52  ;;  %v7056_v32 = vld [vmem:[#allocation133_spill] sm:$0xff] }
 0x1a4   :  { %v4391_v10 = vpop.eup %4390  ;;  %4416 = vrcp.f32 %v831_v63  ;;  %v2198_v21 = vadd.f32 1.0, %v4389_v53  ;;  %v5862_v45 = vmul.f32 %v7051_v39, %v7050_v19  ;;  %v5866_v57 = vmul.f32 %v7053_v37, %v7052_v6 }
 0x1a5   :  { %7049 = vst [vmem:[#allocation42_spill] sm:$0xff] %v5857_v44  ;;  %v4393_v40 = vpop.eup %4392  ;;  %v2199_v5 = vadd.f32 1.0, %v4391_v10  ;;  %4418 = vrcp.f32 %v2197_v35  ;;  %v2502_v38 = vmul.f32 1.442695, %v2486_v16  ;;  %v5870_v47 = vmul.f32 %v7056_v32, %v7055_v24  ;;  %v7059_v24 = vld [vmem:[#allocation86_spill] sm:$0xff]  ;;  %v7060_v10 = vld [vmem:[#allocation129_spill] sm:$0xff] }
 0x1a6   :  { %7054 = vst [vmem:[#allocation16_spill] sm:$0xff] %v5866_v57  ;;  %v4395_v52 = vpop.eup %4394  ;;  %v2200_v44 = vadd.f32 1.0, %v4393_v40  ;;  %4420 = vrcp.f32 %v2198_v21  ;;  %v5872_v53 = vmul.f32 1.442695, %v2487_v18  ;;  %v5874_v63 = vmul.f32 1.442695, %v2488_v14  ;;  %v2801_v21 = vpop.permute.xlu1 %2800 }
 0x1a7   :  { %7057 = vst [vmem:[#allocation37_spill] sm:$0xff] %v5870_v47  ;;  %v4397_v19 = vpop.eup %4396  ;;  %4422 = vrcp.f32 %v2199_v5  ;;  %v2546_v39 = vadd.f32 1.0, %v4395_v52  ;;  %v5876_v37 = vmul.f32 1.442695, %v2489_v54  ;;  %v5879_v6 = vadd.f32 %v2805_v15, %v4877_v56  ;;  %v7063_v52 = vld [vmem:[#allocation89_spill] sm:$0xff]  ;;  %v7064_v54 = vld [vmem:[#allocation132_spill] sm:$0xff] }
 0x1a8   :  { %v4399_v16 = vpop.eup %4398  ;;  %4424 = vrcp.f32 %v2200_v44  ;;  %v2547_v35 = vadd.f32 1.0, %v4397_v19  ;;  %v5883_v32 = vmul.f32 %v7060_v10, %v7059_v24  ;;  %v5886_v40 = vadd.f32 %v2805_v15, %v4879_v25  ;;  %v7067_v47 = vld [vmem:[#allocation95_spill] sm:$0xff]  ;;  %v7071_v57 = vld [vmem:[#allocation141_spill] sm:$0xff] }
 0x1a9   :  { %7058 = vst [vmem:[#allocation18_spill] sm:$0xff] %v5879_v6  ;;  %v4401_v18 = vpop.eup %4400  ;;  %v2548_v14 = vadd.f32 1.0, %v4399_v16  ;;  %4426 = vrcp.f32 %v2546_v39  ;;  %v5890_v5 = vmul.f32 %v7064_v54, %v7063_v52  ;;  %v5893_v56 = vadd.f32 %v2805_v15, %v4881_v60  ;;  %v7068_v24 = vld [vmem:[#allocation135_spill] sm:$0xff]  ;;  %v7070_v16 = vld [vmem:[#allocation100_spill] sm:$0xff] }
 0x1aa   :  { %7061 = vst [vmem:[#allocation40_spill] sm:$0xff] %v5883_v32  ;;  %7062 = vst [vmem:[#allocation56_spill] sm:$0xff] %v5886_v40  ;;  %v4403_v44 = vpop.eup %4402  ;;  %v2549_v19 = vadd.f32 1.0, %v4401_v18  ;;  %4428 = vrcp.f32 %v2547_v35  ;;  %v5897_v10 = vmul.f32 %v7068_v24, %v7067_v47  ;;  %v5900_v25 = vadd.f32 %v2805_v15, %v4883_v61  ;;  %v7073_v47 = vld [vmem:[#allocation134_spill] sm:$0xff] }
 0x1ab   :  { %7065 = vst [vmem:[#allocation103_spill] sm:$0xff] %v5890_v5  ;;  %7066 = vst [vmem:[#allocation59_spill] sm:$0xff] %v5893_v56  ;;  %v4405_v32 = vpop.eup %4404  ;;  %4430 = vrcp.f32 %v2548_v14  ;;  %v2538_v39 = vadd.f32 1.0, %v4403_v44  ;;  %v5904_v52 = vmul.f32 %v7071_v57, %v7070_v16  ;;  %v2835_v54 = vsub.f32 0.0, %v5879_v6  ;;  %v7072_v5 = vld [vmem:[#allocation93_spill] sm:$0xff]  ;;  %v3150_v6 = vpop.permute.xlu1 %3149 }
 0x1ac   :  { %7069 = vst [vmem:[#allocation105_spill] sm:$0xff] %v5900_v25  ;;  %v4407_v60 = vpop.eup %4406  ;;  %4432 = vrcp.f32 %v2549_v19  ;;  %v2539_v18 = vadd.f32 1.0, %v4405_v32  ;;  %v2836_v35 = vsub.f32 0.0, %v5886_v40  ;;  %v5910_v24 = vmul.f32 %v7073_v47, %v7072_v5 }
 0x1ad   :  { %v4409_v15 = vpop.eup %4408  ;;  %v2540_v61 = vadd.f32 1.0, %v4407_v60  ;;  %4434 = vrcp.f32 %v2538_v39  ;;  %v2837_v14 = vsub.f32 0.0, %v5893_v56  ;;  %v5914_v44 = vadd.f32 %v2801_v21, %v5012_v12 }
 0x1ae   :  { %7074 = vst [vmem:[#allocation55_spill] sm:$0xff] %v5910_v24  ;;  %v4411_v57 = vpop.eup %4410  ;;  %v2541_v16 = vadd.f32 1.0, %v4409_v15  ;;  %4436 = vrcp.f32 %v2539_v18  ;;  %v2838_v19 = vsub.f32 0.0, %v5900_v25  ;;  %v5918_v32 = vadd.f32 %v2801_v21, %v5017_v23 }
 0x1af   :  { %v4413_v40 = vpop.eup %4412  ;;  %v862_v5 = vmul.f32 %v4411_v57, %v5668_v49  ;;  %4438 = vrcp.f32 %v2540_v61  ;;  %v2859_v60 = vmul.f32 1.442695, %v2835_v54  ;;  %v5922_v39 = vadd.f32 %v2801_v21, %v5022_v50 }
 0x1b0   :  { %v4415_v47 = vpop.eup %4414  ;;  %v864_v56 = vmul.f32 %v4413_v40, %v5672_v58  ;;  %4440 = vrcp.f32 %v2541_v16  ;;  %v2861_v15 = vmul.f32 1.442695, %v2836_v35  ;;  %v5926_v18 = vadd.f32 %v2801_v21, %v5027_v7 }
 0x1b1   :  { %v4417_v25 = vpop.eup %4416  ;;  %907 = vmatprep.subr.mxu0 %v862_v5  ;;  %v861_v24 = vmul.f32 %v4415_v47, %v5677_v30  ;;  %4442 = vpow2.f32 %v2502_v38  ;;  %v2831_v49 = vsub.f32 0.0, %v5914_v44  ;;  %v5931_v61 = vadd.f32 %v3150_v6, %v4885_v62  ;;  %v3142_v5 = vpop.permute.xlu1 %3141  ;;  %v7079_v47 = vld [vmem:[#allocation30_spill] sm:$0xff] }
 0x1b2   :  { %v5933_v54 = vpop.eup %4418  ;;  %978 = vmatprep.subr.mxu1 %v864_v56  ;;  %v863_v58 = vmul.f32 %v4417_v25, %v5681_v29  ;;  %4444 = vpow2.f32 %v5872_v53  ;;  %v2832_v40 = vsub.f32 0.0, %v5918_v32  ;;  %v5939_v21 = vadd.f32 %v3150_v6, %v4887_v0 }
 0x1b3   :  { %v5941_v35 = vpop.eup %4420  ;;  %908 = vmatpush1.msra.mxu0 %v861_v24  ;;  %4446 = vpow2.f32 %v5874_v63  ;;  %v2863_v30 = vmul.f32 1.442695, %v2837_v14  ;;  %v2833_v62 = vsub.f32 0.0, %v5922_v39  ;;  %v5946_v38 = vadd.f32 %v3150_v6, %v4889_v1  ;;  %v7075_v1 = vld [vmem:[#allocation97_spill] sm:$0xff]  ;;  %v7076_v63 = vld [vmem:[#allocation136_spill] sm:$0xff] }
 0x1b4   :  { %v5948_v56 = vpop.eup %4422  ;;  %979 = vmatpush1.msra.mxu1 %v863_v58  ;;  %3837 = vmatmul.mubr.msk.f32.vlgmr.msra.gmra.mxu0 %vm524_vm0, %v5610_v28  ;;  %4448 = vpow2.f32 %v5876_v37  ;;  %v2865_v25 = vmul.f32 1.442695, %v2838_v19  ;;  %v2834_v0 = vsub.f32 0.0, %v5926_v18  ;;  %v5955_v29 = vadd.f32 %v3150_v6, %v4891_v2  ;;  %v7077_v2 = vld [vmem:[#allocation28_spill] sm:$0xff]  ;;  %v7078_v6 = vld [vmem:[#allocation66_spill] sm:$0xff] }
 0x1b5   :  { %v5957_v53 = vpop.eup %4424  ;;  %3838 = vmatmul.mubr.msk.f32.vlgmr.msra.gmra.mxu1 %vm524_vm0, %v5610_v28  ;;  %1242 = vmatprep.subr.mxu0 %v5753_v4  ;;  %4450 = vpow2.f32 %v2859_v60  ;;  %v5964_v24 = vmul.f32 %v7076_v63, %v7075_v1  ;;  %v2851_v14 = vmul.f32 1.442695, %v2831_v49  ;;  %v3180_v37 = vsub.f32 0.0, %v5931_v61  ;;  %v7082_v1 = vld [vmem:[#allocation64_spill] sm:$0xff] }
 0x1b6   :  { %v5967_v57 = vpop.eup %4426  ;;  %1313 = vmatprep.subr.mxu1 %v5760_v22  ;;  %1243 = vmatpush1.msra.mxu0 %v5767_v13  ;;  %4452 = vpow2.f32 %v2861_v15  ;;  %v5973_v16 = vmul.f32 %v7078_v6, %v7077_v2  ;;  %v2853_v4 = vmul.f32 1.442695, %v2832_v40  ;;  %v3181_v19 = vsub.f32 0.0, %v5939_v21  ;;  %v7080_v22 = vld [vmem:[#allocation69_spill] sm:$0xff]  ;;  %v7081_v40 = vld [vmem:[#allocation27_spill] sm:$0xff] }
 0x1b7   :  { %v5976_v60 = vpop.eup %4428  ;;  %1314 = vmatpush1.msra.mxu1 %v5774_v17  ;;  %1244 = vmatprep.subr.mxu0 %v5778_v48  ;;  %4454 = vpow2.f32 %v2863_v30  ;;  %v5982_v49 = vmul.f32 %v7080_v22, %v7079_v47  ;;  %v2855_v13 = vmul.f32 1.442695, %v2833_v62  ;;  %v3182_v15 = vsub.f32 0.0, %v5946_v38  ;;  %v7086_v2 = vld [vmem:[#allocation67_spill] sm:$0xff] }
 0x1b8   :  { %v5985_v58 = vpop.eup %4430  ;;  %1315 = vmatprep.subr.mxu1 %v5784_v36  ;;  %1245 = vmatpush1.msra.mxu0 %v5788_v3  ;;  %4456 = vpow2.f32 %v2865_v25  ;;  %v5991_v17 = vmul.f32 %v7082_v1, %v7081_v40  ;;  %v2857_v48 = vmul.f32 1.442695, %v2834_v0  ;;  %v3183_v30 = vsub.f32 0.0, %v5955_v29  ;;  %v7085_v0 = vld [vmem:[#allocation29_spill] sm:$0xff]  ;;  %v7094_v40 = vld [vmem:[#allocation75_spill] sm:$0xff] }
 0x1b9   :  { %v5994_v63 = vpop.eup %4432  ;;  %1316 = vmatpush1.msra.mxu1 %v5794_v27  ;;  %1246 = vmatprep.subr.mxu0 %v5798_v31  ;;  %4458 = vpow2.f32 %v2851_v14  ;;  %v3208_v62 = vmul.f32 1.442695, %v3180_v37  ;;  %v5999_v36 = vadd.f32 %v3142_v5, %v5012_v12  ;;  %v6002_v3 = vadd.f32 %v3142_v5, %v5017_v23  ;;  %v7088_v37 = vld [vmem:[#allocation123_spill] sm:$0xff] }
 0x1ba   :  { %v6004_v25 = vpop.eup %4434  ;;  %1317 = vmatprep.subr.mxu1 %v5804_v59  ;;  %1247 = vmatpush1.msra.mxu0 %v5808_v33  ;;  %v6010_v6 = vmul.f32 %v7086_v2, %v7085_v0  ;;  %4460 = vpow2.f32 %v2853_v4  ;;  %v3210_v31 = vmul.f32 1.442695, %v3181_v19  ;;  %v6013_v27 = vadd.f32 %v3142_v5, %v5022_v50  ;;  %v7090_v19 = vld [vmem:[#allocation130_spill] sm:$0xff]  ;;  %v7097_v2 = vld [vmem:[#allocation35_spill] sm:$0xff] }
 0x1bb   :  { %7083 = vst [vmem:[#allocation102_spill] sm:$0xff] %v5999_v36  ;;  %7084 = vst [vmem:[#allocation58_spill] sm:$0xff] %v6002_v3  ;;  %v6015_v14 = vpop.eup %4436  ;;  %1318 = vmatpush1.msra.mxu1 %v5814_v42  ;;  %1248 = vmatprep.subr.mxu0 %v5818_v11  ;;  %4462 = vpow2.f32 %v2855_v13  ;;  %v6021_v59 = vmul.f32 %v5526_v51, %v7088_v37  ;;  %v3212_v33 = vmul.f32 1.442695, %v3182_v15  ;;  %v7091_v11 = vld [vmem:[#allocation121_spill] sm:$0xff]  ;;  %v7098_v37 = vld [vmem:[#allocation74_spill] sm:$0xff] }
 0x1bc   :  { %7087 = vst [vmem:[#allocation104_spill] sm:$0xff] %v6013_v27  ;;  %v6024_v47 = vadd.f32 %v3142_v5, %v5027_v7  ;;  %v6026_v4 = vpop.eup %4438  ;;  %1319 = vmatprep.subr.mxu1 %v5825_v43  ;;  %1249 = vmatpush1.msra.mxu0 %v5835_v26  ;;  %4464 = vpow2.f32 %v2857_v48  ;;  %v6032_v42 = vmul.f32 %v5565_v34, %v7090_v19  ;;  %v3214_v51 = vmul.f32 1.442695, %v3183_v30  ;;  %v7092_v5 = vld [vmem:[#allocation125_spill] sm:$0xff] }
 0x1bd   :  { %v6036_v22 = vmul.f32 %v5524_v46, %v7091_v11  ;;  %v6038_v13 = vpop.eup %4440  ;;  %1282 = vmatprep.mubr.f32.mxu0 %v6960_v8  ;;  %1320 = vmatpush1.msra.mxu1 %v5842_v41  ;;  %v6044_v43 = vmul.f32 %v5528_v9, %v7092_v5  ;;  %4466 = vpow2.f32 %v3208_v62  ;;  %v3172_v26 = vsub.f32 0.0, %v5999_v36  ;;  %v7093_v46 = vld [vmem:[#allocation36_spill] sm:$0xff]  ;;  %v7095_v41 = vld [vmem:[#allocation41_spill] sm:$0xff]  ;;  %v3138_v5 = vpop.permute.xlu1 %3137 }
 0x1be   :  { %7089 = vst [vmem:[#allocation78_spill] sm:$0xff] %v6024_v47  ;;  %v3173_v34 = vsub.f32 0.0, %v6002_v3  ;;  %v4443_v15 = vpop.eup %4442  ;;  %1353 = vmatprep.mubr.f32.mxu1 %v6960_v8  ;;  %3839 = vmatmul.mubr.msk.f32.vlgmr.msra.gmra.mxu0 %vm524_vm0, %v5610_v28  ;;  %v6053_v1 = vmul.f32 %v7094_v40, %v7093_v46  ;;  %v7096_v48 = vld [vmem:[#allocation85_spill] sm:$0xff]  ;;  %4468 = vpow2.f32 %v3210_v31  ;;  %v3174_v9 = vsub.f32 0.0, %v6013_v27  ;;  %v7099_v31 = vld [vmem:[#allocation42_spill] sm:$0xff] }
 0x1bf   :  { %v6057_v30 = vmul.f32 %v7096_v48, %v7095_v41  ;;  %v4445_v62 = vpop.eup %4444  ;;  %3840 = vmatmul.mubr.msk.f32.vlgmr.msra.gmra.mxu1 %vm524_vm0, %v5610_v28  ;;  %1583 = vmatprep.subr.mxu0 %v5846_v55  ;;  %v2534_v0 = vadd.f32 1.0, %v4443_v15  ;;  %v6065_v19 = vmul.f32 %v7098_v37, %v7097_v2  ;;  %4470 = vpow2.f32 %v3212_v33  ;;  %v7100_v41 = vld [vmem:[#allocation38_spill] sm:$0xff]  ;;  %v7101_v48 = vld [vmem:[#allocation76_spill] sm:$0xff]  ;;  %v7102_v55 = vld [vmem:[#allocation137_spill] sm:$0xff] }
 0x1c0   :  { %v3175_v11 = vsub.f32 0.0, %v6024_v47  ;;  %v4447_v46 = vpop.eup %4446  ;;  %1654 = vmatprep.subr.mxu1 %v5850_v20  ;;  %1584 = vmatpush1.msra.mxu0 %v7099_v31  ;;  %v2535_v40 = vadd.f32 1.0, %v4445_v62  ;;  %v6072_v27 = vmul.f32 %v7101_v48, %v7100_v41  ;;  %4472 = vpow2.f32 %v3214_v51  ;;  %v7103_v15 = vld [vmem:[#allocation168_spill] sm:$0xff]  ;;  %v7105_v41 = vld [vmem:[#allocation37_spill] sm:$0xff]  ;;  %v7107_v48 = vld [vmem:[#allocation138_spill] sm:$0xff] }
 0x1c1   :  { %v6076_v36 = vmul.f32 %v7103_v15, %v7102_v55  ;;  %v4449_v2 = vpop.eup %4448  ;;  %1655 = vmatpush1.msra.mxu1 %v5862_v45  ;;  %v2536_v33 = vadd.f32 1.0, %v4447_v46  ;;  %4474 = vrcp.f32 %v2534_v0  ;;  %v7104_v37 = vld [vmem:[#allocation16_spill] sm:$0xff]  ;;  %v6080_v20 = vmul.f32 1.442695, %v3172_v26  ;;  %v7108_v55 = vld [vmem:[#allocation169_spill] sm:$0xff]  ;;  %v7109_v46 = vld [vmem:[#allocation103_spill] sm:$0xff]  ;;  %1623 = vmatprep.mubr.f32.mxu0 %v6960_v8 }
 0x1c2   :  { %1585 = vmatprep.subr.mxu0 %v7104_v37  ;;  %v6082_v31 = vmul.f32 1.442695, %v3173_v34  ;;  %v4451_v62 = vpop.eup %4450  ;;  %v2537_v47 = vadd.f32 1.0, %v4449_v2  ;;  %4476 = vrcp.f32 %v2535_v40  ;;  %1656 = vmatprep.subr.mxu1 %v7105_v41  ;;  %v7106_v51 = vld [vmem:[#allocation40_spill] sm:$0xff]  ;;  %v6088_v15 = vmul.f32 %v7108_v55, %v7107_v48  ;;  %v7110_v34 = vld [vmem:[#allocation139_spill] sm:$0xff] }
 0x1c3   :  { %1586 = vmatpush1.msra.mxu0 %v7106_v51  ;;  %v6090_v45 = vmul.f32 1.442695, %v3174_v9  ;;  %v4453_v0 = vpop.eup %4452  ;;  %4478 = vrcp.f32 %v2536_v33  ;;  %1657 = vmatpush1.msra.mxu1 %v7109_v46  ;;  %v2883_v26 = vadd.f32 1.0, %v4451_v62  ;;  %v7111_v2 = vld [vmem:[#allocation171_spill] sm:$0xff]  ;;  %v6098_v37 = vmul.f32 1.442695, %v3175_v11 }
 0x1c4   :  { %1587 = vmatprep.subr.mxu0 %v5897_v10  ;;  %v6096_v40 = vmul.f32 %v7111_v2, %v7110_v34  ;;  %v4455_v41 = vpop.eup %4454  ;;  %4480 = vrcp.f32 %v2537_v47  ;;  %1658 = vmatprep.subr.mxu1 %v5904_v52  ;;  %v2884_v51 = vadd.f32 1.0, %v4453_v0  ;;  %v7112_v9 = vld [vmem:[#allocation55_spill] sm:$0xff]  ;;  %v7114_v33 = vld [vmem:[#allocation98_spill] sm:$0xff]  ;;  %v7115_v46 = vld [vmem:[#allocation53_spill] sm:$0xff]  ;;  %v3487_v2 = vpop.permute.xlu1 %3486 }
 0x1c5   :  { %1588 = vmatpush1.msra.mxu0 %v7112_v9  ;;  %v7113_v48 = vld [vmem:[#allocation51_spill] sm:$0xff]  ;;  %v7116_v10 = vld [vmem:[#allocation101_spill] sm:$0xff]  ;;  %v4457_v3 = vpop.eup %4456  ;;  %v2885_v34 = vadd.f32 1.0, %v4455_v41  ;;  %4482 = vrcp.f32 %v2883_v26  ;;  %1659 = vmatpush1.msra.mxu1 %v5964_v24  ;;  %v7117_v47 = vld [vmem:[#allocation12_spill] sm:$0xff] }
 0x1c6   :  { %v6104_v55 = vmul.f32 %v7114_v33, %v7113_v48  ;;  %v6108_v62 = vmul.f32 %v7116_v10, %v7115_v46  ;;  %1589 = vmatprep.subr.mxu0 %v5973_v16  ;;  %v6113_v52 = vadd.f32 %v3138_v5, %v7117_v47  ;;  %v7119_v11 = vld [vmem:[#allocation13_spill] sm:$0xff]  ;;  %v4459_v9 = vpop.eup %4458  ;;  %v2886_v48 = vadd.f32 1.0, %v4457_v3  ;;  %1660 = vmatprep.subr.mxu1 %v5982_v49  ;;  %v7121_v41 = vld [vmem:[#allocation14_spill] sm:$0xff]  ;;  %v7123_v24 = vld [vmem:[#allocation15_spill] sm:$0xff] }
 0x1c7   :  { %v6116_v0 = vadd.f32 %v3138_v5, %v7119_v11  ;;  %4484 = vrcp.f32 %v2884_v51  ;;  %1590 = vmatpush1.msra.mxu0 %v5991_v17  ;;  %v6121_v26 = vadd.f32 %v3138_v5, %v7121_v41  ;;  %v6124_v33 = vadd.f32 %v3138_v5, %v7123_v24  ;;  %v4461_v16 = vpop.eup %4460  ;;  %1661 = vmatpush1.msra.mxu1 %v6010_v6  ;;  %v7125_v10 = vld [vmem:[#allocation140_spill] sm:$0xff]  ;;  %v7126_v3 = vld [vmem:[#allocation173_spill] sm:$0xff]  ;;  %v7127_v47 = vld [vmem:[#allocation50_spill] sm:$0xff] }
 0x1c8   :  { %7118 = vst [vmem:[#allocation118_spill] sm:$0xff] %v6113_v52  ;;  %4486 = vrcp.f32 %v2885_v34  ;;  %v2879_v46 = vadd.f32 1.0, %v4459_v9  ;;  %v1891_v51 = vmul.f32 %v7126_v3, %v7125_v10  ;;  %v7128_v49 = vld [vmem:[#allocation96_spill] sm:$0xff]  ;;  %v4463_v17 = vpop.eup %4462  ;;  %1694 = vmatprep.mubr.f32.mxu1 %v6960_v8  ;;  %3841 = vmatmul.mubr.msk.f32.vlgmr.msra.gmra.mxu0 %vm524_vm0, %v5610_v28  ;;  %v2880_v5 = vadd.f32 1.0, %v4461_v16  ;;  %v7130_v6 = vld [vmem:[#allocation9_spill] sm:$0xff] }
 0x1c9   :  { %7120 = vst [vmem:[#allocation80_spill] sm:$0xff] %v6116_v0  ;;  %7122 = vst [vmem:[#allocation122_spill] sm:$0xff] %v6121_v26  ;;  %v6132_v11 = vmul.f32 %v7128_v49, %v7127_v47  ;;  %4488 = vrcp.f32 %v2886_v48  ;;  %v7129_v34 = vld [vmem:[#allocation8_spill] sm:$0xff]  ;;  %v6141_v9 = vadd.f32 %v3487_v2, %v7130_v6  ;;  %v4465_v24 = vpop.eup %4464  ;;  %3842 = vmatmul.mubr.msk.f32.vlgmr.msra.gmra.mxu1 %vm524_vm0, %v5610_v28  ;;  %v2881_v10 = vadd.f32 1.0, %v4463_v17  ;;  %v7132_v17 = vld [vmem:[#allocation31_spill] sm:$0xff] }
 0x1ca   :  { %7124 = vst [vmem:[#allocation77_spill] sm:$0xff] %v6124_v33  ;;  %v6138_v41 = vadd.f32 %v3487_v2, %v7129_v34  ;;  %4490 = vrcp.f32 %v2879_v46  ;;  %1924 = vmatprep.subr.mxu0 %v6021_v59  ;;  %v3168_v48 = vsub.f32 0.0, %v6113_v52  ;;  %v3169_v3 = vsub.f32 0.0, %v6116_v0  ;;  %v4467_v47 = vpop.eup %4466  ;;  %1995 = vmatprep.subr.mxu1 %v6032_v42  ;;  %v7131_v46 = vld [vmem:[#allocation155_spill] sm:$0xff]  ;;  %v7137_v52 = vld [vmem:[#allocation34_spill] sm:$0xff] }
 0x1cb   :  { %v2882_v16 = vadd.f32 1.0, %v4465_v24  ;;  %4492 = vrcp.f32 %v2880_v5  ;;  %1925 = vmatpush1.msra.mxu0 %v6036_v22  ;;  %v3170_v49 = vsub.f32 0.0, %v6121_v26  ;;  %v3171_v34 = vsub.f32 0.0, %v6124_v33  ;;  %v4469_v28 = vpop.eup %4468  ;;  %1996 = vmatpush1.msra.mxu1 %v6044_v43  ;;  %v7133_v24 = vld [vmem:[#allocation10_spill] sm:$0xff]  ;;  %v7134_v33 = vld [vmem:[#allocation157_spill] sm:$0xff] }
 0x1cc   :  { %4494 = vrcp.f32 %v2881_v10  ;;  %1926 = vmatprep.subr.mxu0 %v6053_v1  ;;  %v3228_v59 = vadd.f32 1.0, %v4467_v47  ;;  %v1885_v6 = vmul.f32 %v7132_v17, %v7131_v46  ;;  %v6157_v5 = vadd.f32 %v3487_v2, %v7133_v24  ;;  %v4471_v42 = vpop.eup %4470  ;;  %1997 = vmatprep.subr.mxu1 %v6057_v30  ;;  %v7135_v10 = vld [vmem:[#allocation7_spill] sm:$0xff]  ;;  %v7136_v43 = vld [vmem:[#allocation154_spill] sm:$0xff]  ;;  %v7138_v17 = vld [vmem:[#allocation156_spill] sm:$0xff] }
 0x1cd   :  { %4496 = vrcp.f32 %v2882_v16  ;;  %1927 = vmatpush1.msra.mxu0 %v6065_v19  ;;  %v3229_v22 = vadd.f32 1.0, %v4469_v28  ;;  %v1887_v26 = vmul.f32 %v7135_v10, %v7134_v33  ;;  %v1884_v1 = vmul.f32 %v7137_v52, %v7136_v43  ;;  %v4473_v47 = vpop.eup %4472  ;;  %1998 = vmatpush1.msra.mxu1 %v6072_v27  ;;  %v7139_v16 = vld [vmem:[#allocation33_spill] sm:$0xff]  ;;  %v7140_v30 = vld [vmem:[#allocation11_spill] sm:$0xff]  ;;  %v7141_v52 = vld [vmem:[#allocation52_spill] sm:$0xff] }
 0x1ce   :  { %1928 = vmatprep.subr.mxu0 %v6088_v15  ;;  %v3230_v46 = vadd.f32 1.0, %v4471_v42  ;;  %4498 = vrcp.f32 %v3228_v59  ;;  %v1886_v24 = vmul.f32 %v7139_v16, %v7138_v17  ;;  %v6170_v0 = vadd.f32 %v3487_v2, %v7140_v30  ;;  %v6172_v19 = vpop.eup %4474  ;;  %1999 = vmatprep.subr.mxu1 %v1891_v51  ;;  %v7142_v28 = vld [vmem:[#allocation99_spill] sm:$0xff]  ;;  %v3483_v15 = vpop.permute.xlu1 %3482  ;;  %v7147_v16 = vld [vmem:[#allocation162_spill] sm:$0xff] }
 0x1cf   :  { %v3231_v33 = vadd.f32 1.0, %v4473_v47  ;;  %4500 = vrcp.f32 %v3229_v22  ;;  %1929 = vmatpush1.msra.mxu0 %v6076_v36  ;;  %v2239_v27 = vmul.f32 %v7142_v28, %v7141_v52  ;;  %v3184_v10 = vmul.f32 1.442695, %v3168_v48  ;;  %v6177_v42 = vpop.eup %4476  ;;  %2000 = vmatpush1.msra.mxu1 %v6096_v40  ;;  %v7143_v40 = vld [vmem:[#allocation163_spill] sm:$0xff]  ;;  %v7146_v47 = vld [vmem:[#allocation94_spill] sm:$0xff]  ;;  %v7150_v52 = vld [vmem:[#allocation49_spill] sm:$0xff] }
 0x1d0   :  { %4502 = vrcp.f32 %v3230_v46  ;;  %1930 = vmatprep.subr.mxu0 %v1885_v6  ;;  %v3186_v2 = vmul.f32 1.442695, %v3169_v3  ;;  %v3188_v59 = vmul.f32 1.442695, %v3170_v49  ;;  %v3190_v43 = vmul.f32 1.442695, %v3171_v34  ;;  %v6180_v17 = vpop.eup %4478  ;;  %2001 = vmatprep.subr.mxu1 %v1887_v26 }
 0x1d1   :  { %4504 = vrcp.f32 %v3231_v33  ;;  %1931 = vmatpush1.msra.mxu0 %v1884_v1  ;;  %v3517_v36 = vsub.f32 0.0, %v6138_v41  ;;  %v3518_v51 = vsub.f32 0.0, %v6141_v9  ;;  %v3519_v48 = vsub.f32 0.0, %v6157_v5  ;;  %v6185_v22 = vpop.eup %4480  ;;  %1964 = vmatprep.mubr.f32.mxu0 %v6960_v8  ;;  %v7144_v3 = vld [vmem:[#allocation90_spill] sm:$0xff]  ;;  %v7145_v1 = vld [vmem:[#allocation165_spill] sm:$0xff]  ;;  %v7149_v33 = vld [vmem:[#allocation164_spill] sm:$0xff] }
 0x1d2   :  { %4506 = vpow2.f32 %v6080_v20  ;;  %2002 = vmatpush1.msra.mxu1 %v1886_v24  ;;  %v2234_v49 = vmul.f32 %v7144_v3, %v7143_v40  ;;  %v3520_v34 = vsub.f32 0.0, %v6170_v0  ;;  %v6193_v26 = vadd.f32 %v3483_v15, %v5012_v12  ;;  %v6195_v6 = vpop.eup %4482  ;;  %2035 = vmatprep.mubr.f32.mxu1 %v6960_v8  ;;  %v6202_v20 = vld [vmem:[%s6654_s4] sm:$0xf]  ;;  %v7148_v12 = vld [vmem:[#allocation47_spill] sm:$0xff]  ;;  %v7151_v40 = vld [vmem:[#allocation62_spill] sm:$0xff] }
 0x1d3   :  { %4508 = vpow2.f32 %v6082_v31  ;;  %3843 = vmatmul.mubr.msk.f32.vlgmr.msra.gmra.mxu0 %vm524_vm0, %v6202_v20  ;;  %v2236_v46 = vmul.f32 %v7146_v47, %v7145_v1  ;;  %v2233_v24 = vmul.f32 %v7148_v12, %v7147_v16  ;;  %v6211_v30 = vadd.f32 %v3483_v15, %v5017_v23  ;;  %3844 = vmatmul.mubr.msk.f32.vlgmr.msra.gmra.mxu1 %vm524_vm0, %v6202_v20  ;;  %v7153_v47 = vld [vmem:[#allocation26_spill] sm:$0xff] }
 0x1d4   :  { %v6213_v31 = vpop.eup %4484  ;;  %4510 = vpow2.f32 %v6090_v45  ;;  %2265 = vmatprep.subr.mxu0 %v6104_v55  ;;  %v2235_v28 = vmul.f32 %v7150_v52, %v7149_v33  ;;  %v2230_v3 = vmul.f32 %v5941_v35, %v7151_v40  ;;  %v6224_v1 = vadd.f32 %v3483_v15, %v5022_v50  ;;  %2336 = vmatprep.subr.mxu1 %v6108_v62  ;;  %v7152_v45 = vld [vmem:[#allocation25_spill] sm:$0xff] }
 0x1d5   :  { %v6226_v23 = vpop.eup %4486  ;;  %4512 = vpow2.f32 %v6098_v37  ;;  %2266 = vmatpush1.msra.mxu0 %v6132_v11  ;;  %v2232_v55 = vmul.f32 %v5957_v53, %v7152_v45  ;;  %v2229_v16 = vmul.f32 %v5933_v54, %v7153_v47  ;;  %v6236_v12 = vadd.f32 %v3483_v15, %v5027_v7  ;;  %2337 = vmatpush1.msra.mxu1 %v2239_v27  ;;  %v7154_v37 = vld [vmem:[#allocation24_spill] sm:$0xff] }
 0x1d6   :  { %v6238_v35 = vpop.eup %4488  ;;  %4514 = vpow2.f32 %v3184_v10  ;;  %2267 = vmatprep.subr.mxu0 %v2234_v49  ;;  %v3541_v50 = vmul.f32 1.442695, %v3517_v36  ;;  %v2231_v62 = vmul.f32 %v5948_v56, %v7154_v37  ;;  %v3513_v11 = vsub.f32 0.0, %v6193_v26  ;;  %2338 = vmatprep.subr.mxu1 %v2236_v46  ;;  %v7155_v10 = vld [vmem:[#allocation63_spill] sm:$0xff]  ;;  %v7159_v46 = vld [vmem:[#allocation61_spill] sm:$0xff] }
 0x1d7   :  { %v6243_v33 = vpop.eup %4490  ;;  %4516 = vpow2.f32 %v3186_v2  ;;  %2268 = vmatpush1.msra.mxu0 %v2233_v24  ;;  %v3543_v54 = vmul.f32 1.442695, %v3518_v51  ;;  %v3545_v53 = vmul.f32 1.442695, %v3519_v48  ;;  %v3514_v7 = vsub.f32 0.0, %v6211_v30  ;;  %2339 = vmatpush1.msra.mxu1 %v2235_v28  ;;  %v7156_v36 = vld [vmem:[#allocation107_spill] sm:$0xff] }
 0x1d8   :  { %v6246_v15 = vpop.eup %4492  ;;  %4518 = vpow2.f32 %v3188_v59  ;;  %2269 = vmatprep.subr.mxu0 %v2230_v3  ;;  %v3547_v27 = vmul.f32 1.442695, %v3520_v34  ;;  %v2226_v56 = vmul.f32 %v7156_v36, %v7155_v10  ;;  %v3515_v49 = vsub.f32 0.0, %v6224_v1  ;;  %2340 = vmatprep.subr.mxu1 %v2232_v55  ;;  %v7157_v2 = vld [vmem:[#allocation68_spill] sm:$0xff]  ;;  %v7158_v51 = vld [vmem:[#allocation113_spill] sm:$0xff]  ;;  %v7160_v24 = vld [vmem:[#allocation106_spill] sm:$0xff] }
 0x1d9   :  { %v6251_v52 = vpop.eup %4494  ;;  %4520 = vpow2.f32 %v3190_v43  ;;  %2270 = vmatpush1.msra.mxu0 %v2229_v16  ;;  %v2228_v48 = vmul.f32 %v7158_v51, %v7157_v2  ;;  %v2225_v40 = vmul.f32 %v7160_v24, %v7159_v46  ;;  %v3516_v59 = vsub.f32 0.0, %v6236_v12  ;;  %2341 = vmatpush1.msra.mxu1 %v2231_v62  ;;  %v7161_v34 = vld [vmem:[#allocation65_spill] sm:$0xff]  ;;  %v7162_v3 = vld [vmem:[#allocation108_spill] sm:$0xff]  ;;  %v7163_v43 = vld [vmem:[#allocation71_spill] sm:$0xff] }
 0x1da   :  { %v6258_v28 = vpop.eup %4496  ;;  %4522 = vpow2.f32 %v3541_v50  ;;  %2271 = vmatprep.subr.mxu0 %v2226_v56  ;;  %v2227_v45 = vmul.f32 %v7162_v3, %v7161_v34  ;;  %v3533_v47 = vmul.f32 1.442695, %v3513_v11  ;;  %v2579_v55 = vmul.f32 %v5976_v60, %v7163_v43  ;;  %v7164_v10 = vld [vmem:[#allocation70_spill] sm:$0xff]  ;;  %v7165_v2 = vld [vmem:[#allocation60_spill] sm:$0xff]  ;;  %2305 = vmatprep.mubr.f32.mxu0 %v6960_v8  ;;  %v7166_v60 = vld [vmem:[#allocation73_spill] sm:$0xff] }
 0x1db   :  { %v6264_v16 = vpop.eup %4498  ;;  %4524 = vpow2.f32 %v3543_v54  ;;  %2342 = vmatprep.subr.mxu1 %v2228_v48  ;;  %2272 = vmatpush1.msra.mxu0 %v2225_v40  ;;  %v3535_v37 = vmul.f32 1.442695, %v3514_v7  ;;  %v2581_v36 = vmul.f32 %v5994_v63, %v7164_v10  ;;  %v2578_v50 = vmul.f32 %v5967_v57, %v7165_v2  ;;  %v7167_v57 = vld [vmem:[#allocation82_spill] sm:$0xff]  ;;  %v7172_v46 = vld [vmem:[#allocation124_spill] sm:$0xff]  ;;  %v7173_v40 = vld [vmem:[#allocation177_spill] sm:$0xff] }
 0x1dc   :  { %v6270_v62 = vpop.eup %4500  ;;  %4526 = vpow2.f32 %v3545_v53  ;;  %2343 = vmatpush1.msra.mxu1 %v2227_v45  ;;  %v3537_v11 = vmul.f32 1.442695, %v3515_v49  ;;  %v2580_v56 = vmul.f32 %v5985_v58, %v7166_v60  ;;  %2376 = vmatprep.mubr.f32.mxu1 %v6960_v8  ;;  %v3539_v63 = vmul.f32 1.442695, %v3516_v59  ;;  %v7168_v7 = vld [vmem:[#allocation126_spill] sm:$0xff]  ;;  %v7169_v58 = vld [vmem:[#allocation84_spill] sm:$0xff] }
 0x1dd   :  { %v6275_v54 = vpop.eup %4502  ;;  %4528 = vpow2.f32 %v3547_v27  ;;  %3845 = vmatmul.mubr.msk.f32.vlgmr.msra.gmra.mxu0 %vm524_vm0, %v6202_v20  ;;  %v2575_v51 = vmul.f32 %v7168_v7, %v7167_v57  ;;  %3846 = vmatmul.mubr.msk.f32.vlgmr.msra.gmra.mxu1 %vm524_vm0, %v6202_v20  ;;  %v7170_v49 = vld [vmem:[#allocation128_spill] sm:$0xff]  ;;  %v7171_v27 = vld [vmem:[#allocation81_spill] sm:$0xff]  ;;  %v2571_v34 = vmul.f32 %v6015_v14, %v7173_v40  ;;  %v7174_v3 = vld [vmem:[#allocation83_spill] sm:$0xff] }
 0x1de   :  { %v6282_v53 = vpop.eup %4504  ;;  %4530 = vpow2.f32 %v3533_v47  ;;  %2606 = vmatprep.subr.mxu0 %v2579_v55  ;;  %v2577_v48 = vmul.f32 %v7170_v49, %v7169_v58  ;;  %v2574_v24 = vmul.f32 %v7172_v46, %v7171_v27  ;;  %2677 = vmatprep.subr.mxu1 %v2581_v36  ;;  %v7175_v45 = vld [vmem:[#allocation127_spill] sm:$0xff]  ;;  %v7176_v10 = vld [vmem:[#allocation181_spill] sm:$0xff]  ;;  %v7177_v55 = vld [vmem:[#allocation72_spill] sm:$0xff] }
 0x1df   :  { %v4507_v59 = vpop.eup %4506  ;;  %4532 = vpow2.f32 %v3535_v37  ;;  %2607 = vmatpush1.msra.mxu0 %v2578_v50  ;;  %v2576_v43 = vmul.f32 %v7175_v45, %v7174_v3  ;;  %v2573_v47 = vmul.f32 %v6038_v13, %v7176_v10  ;;  %v2570_v2 = vmul.f32 %v6004_v25, %v7177_v55  ;;  %2678 = vmatpush1.msra.mxu1 %v2580_v56  ;;  %v7178_v7 = vld [vmem:[#allocation179_spill] sm:$0xff]  ;;  %v7179_v37 = vld [vmem:[#allocation17_spill] sm:$0xff]  ;;  %v7181_v25 = vld [vmem:[#allocation92_spill] sm:$0xff] }
 0x1e0   :  { %v4509_v60 = vpop.eup %4508  ;;  %v3220_v57 = vadd.f32 1.0, %v4507_v59  ;;  %4534 = vpow2.f32 %v3537_v11  ;;  %2608 = vmatprep.subr.mxu0 %v2575_v51  ;;  %v2572_v14 = vmul.f32 %v6026_v4, %v7178_v7  ;;  %v2567_v36 = vmul.f32 %v6177_v42, %v7179_v37  ;;  %2679 = vmatprep.subr.mxu1 %v2577_v48  ;;  %v7180_v13 = vld [vmem:[#allocation19_spill] sm:$0xff]  ;;  %v7187_v45 = vld [vmem:[#allocation109_spill] sm:$0xff]  ;;  %v7191_v7 = vld [vmem:[#allocation56_spill] sm:$0xff] }
 0x1e1   :  { %v4511_v50 = vpop.eup %4510  ;;  %v3221_v58 = vadd.f32 1.0, %v4509_v60  ;;  %4536 = vpow2.f32 %v3539_v63  ;;  %2609 = vmatpush1.msra.mxu0 %v2574_v24  ;;  %v2569_v49 = vmul.f32 %v6185_v22, %v7180_v13  ;;  %v2566_v27 = vmul.f32 %v6172_v19, %v7181_v25  ;;  %2680 = vmatpush1.msra.mxu1 %v2576_v43  ;;  %v7182_v4 = vld [vmem:[#allocation39_spill] sm:$0xff]  ;;  %v7183_v22 = vld [vmem:[#allocation110_spill] sm:$0xff]  ;;  %v7188_v43 = vld [vmem:[#allocation145_spill] sm:$0xff] }
 0x1e2   :  { %v4513_v11 = vpop.eup %4512  ;;  %v3222_v56 = vadd.f32 1.0, %v4511_v50  ;;  %4538 = vrcp.f32 %v3220_v57  ;;  %2610 = vmatprep.subr.mxu0 %v2571_v34  ;;  %v2568_v51 = vmul.f32 %v6180_v17, %v7182_v4  ;;  %2681 = vmatprep.subr.mxu1 %v2573_v47  ;;  %v7184_v19 = vld [vmem:[#allocation146_spill] sm:$0xff]  ;;  %v7185_v34 = vld [vmem:[#allocation112_spill] sm:$0xff]  ;;  %v2919_v10 = vmul.f32 %v7188_v43, %v7187_v45  ;;  %v7190_v60 = vld [vmem:[#allocation147_spill] sm:$0xff] }
 0x1e3   :  { %v4515_v42 = vpop.eup %4514  ;;  %v3223_v46 = vadd.f32 1.0, %v4513_v11  ;;  %4540 = vrcp.f32 %v3221_v58  ;;  %2611 = vmatpush1.msra.mxu0 %v2570_v2  ;;  %2682 = vmatpush1.msra.mxu1 %v2572_v14  ;;  %v2920_v24 = vmul.f32 %v7184_v19, %v7183_v22  ;;  %v7186_v17 = vld [vmem:[#allocation148_spill] sm:$0xff]  ;;  %v7189_v2 = vld [vmem:[#allocation111_spill] sm:$0xff]  ;;  %v2916_v14 = vmul.f32 %v6213_v31, %v7191_v7  ;;  %v7192_v50 = vld [vmem:[#allocation105_spill] sm:$0xff] }
 0x1e4   :  { %v4517_v63 = vpop.eup %4516  ;;  %4542 = vrcp.f32 %v3222_v56  ;;  %v3216_v48 = vadd.f32 1.0, %v4515_v42  ;;  %2612 = vmatprep.subr.mxu0 %v2567_v36  ;;  %2683 = vmatprep.subr.mxu1 %v2569_v49  ;;  %v2922_v3 = vmul.f32 %v7186_v17, %v7185_v34  ;;  %v2921_v57 = vmul.f32 %v7190_v60, %v7189_v2  ;;  %v7193_v13 = vld [vmem:[#allocation18_spill] sm:$0xff]  ;;  %v7194_v31 = vld [vmem:[#allocation59_spill] sm:$0xff]  ;;  %v7201_v34 = vld [vmem:[#allocation149_spill] sm:$0xff] }
 0x1e5   :  { %v4519_v40 = vpop.eup %4518  ;;  %4544 = vrcp.f32 %v3223_v46  ;;  %v3217_v59 = vadd.f32 1.0, %v4517_v63  ;;  %2613 = vmatpush1.msra.mxu0 %v2566_v27  ;;  %2646 = vmatprep.mubr.f32.mxu0 %v6960_v8  ;;  %v2918_v58 = vmul.f32 %v6238_v35, %v7192_v50  ;;  %v2915_v49 = vmul.f32 %v6195_v6, %v7193_v13  ;;  %v7202_v43 = vld [vmem:[#allocation117_spill] sm:$0xff]  ;;  %v7209_v13 = vld [vmem:[#allocation142_spill] sm:$0xff] }
 0x1e6   :  { %v4521_v47 = vpop.eup %4520  ;;  %v3218_v55 = vadd.f32 1.0, %v4519_v40  ;;  %4546 = vrcp.f32 %v3216_v48  ;;  %2684 = vmatpush1.msra.mxu1 %v2568_v51  ;;  %2717 = vmatprep.mubr.f32.mxu1 %v6960_v8  ;;  %v2917_v11 = vmul.f32 %v6226_v23, %v7194_v31  ;;  %v2912_v56 = vmul.f32 %v6246_v15, %v5918_v32  ;;  %v7195_v48 = vld [vmem:[#allocation32_spill] sm:$0xff] }
 0x1e7   :  { %v4523_v37 = vpop.eup %4522  ;;  %v3219_v36 = vadd.f32 1.0, %v4521_v47  ;;  %4548 = vrcp.f32 %v3217_v59  ;;  %3847 = vmatmul.mubr.msk.f32.vlgmr.msra.gmra.mxu0 %vm524_vm0, %v6202_v20  ;;  %3848 = vmatmul.mubr.msk.f32.vlgmr.msra.gmra.mxu1 %vm524_vm0, %v6202_v20  ;;  %v2914_v6 = vmul.f32 %v6258_v28, %v5926_v18  ;;  %v2911_v35 = vmul.f32 %v6243_v33, %v5914_v44  ;;  %v7196_v44 = vld [vmem:[#allocation115_spill] sm:$0xff]  ;;  %v7197_v33 = vld [vmem:[#allocation150_spill] sm:$0xff] }
 0x1e8   :  { %v4525_v25 = vpop.eup %4524  ;;  %4550 = vrcp.f32 %v3218_v55  ;;  %v3565_v27 = vadd.f32 1.0, %v4523_v37  ;;  %2947 = vmatprep.subr.mxu0 %v2920_v24  ;;  %3018 = vmatprep.subr.mxu1 %v2922_v3  ;;  %v2913_v23 = vmul.f32 %v6251_v52, %v5922_v39  ;;  %v3559_v22 = vadd.f32 1.0, %v7195_v48  ;;  %v7198_v39 = vld [vmem:[#allocation119_spill] sm:$0xff]  ;;  %v7199_v52 = vld [vmem:[#allocation153_spill] sm:$0xff]  ;;  %v7200_v59 = vld [vmem:[#allocation114_spill] sm:$0xff] }
 0x1e9   :  { %v4527_v4 = vpop.eup %4526  ;;  %4552 = vrcp.f32 %v3219_v36  ;;  %v3566_v51 = vadd.f32 1.0, %v4525_v25  ;;  %2948 = vmatpush1.msra.mxu0 %v2919_v10  ;;  %3019 = vmatpush1.msra.mxu1 %v2921_v57  ;;  %v2908_v28 = vmul.f32 %v7197_v33, %v7196_v44  ;;  %v2910_v40 = vmul.f32 %v7199_v52, %v7198_v39  ;;  %v7203_v10 = vld [vmem:[#allocation151_spill] sm:$0xff]  ;;  %v7207_v36 = vld [vmem:[#allocation57_spill] sm:$0xff] }
 0x1ea   :  { %v4529_v42 = vpop.eup %4528  ;;  %v3567_v46 = vadd.f32 1.0, %v4527_v4  ;;  %4554 = vrcp.f32 %v3565_v27  ;;  %2949 = vmatprep.subr.mxu0 %v2916_v14  ;;  %3020 = vmatprep.subr.mxu1 %v2918_v58  ;;  %v2907_v17 = vmul.f32 %v7201_v34, %v7200_v59  ;;  %v2909_v47 = vmul.f32 %v7203_v10, %v7202_v43  ;;  %v7211_v27 = vld [vmem:[#allocation78_spill] sm:$0xff]  ;;  %v7221_v59 = vld [vmem:[#allocation180_spill] sm:$0xff] }
 0x1eb   :  { %v4531_v32 = vpop.eup %4530  ;;  %v3568_v15 = vadd.f32 1.0, %v4529_v42  ;;  %4556 = vrcp.f32 %v3566_v51  ;;  %2950 = vmatpush1.msra.mxu0 %v2915_v49  ;;  %3021 = vmatpush1.msra.mxu1 %v2917_v11  ;;  %v3261_v55 = vmul.f32 %v6270_v62, %v5939_v21  ;;  %v3263_v57 = vmul.f32 %v6282_v53, %v5955_v29  ;;  %v7205_v29 = vld [vmem:[#allocation175_spill] sm:$0xff]  ;;  %v7206_v53 = vld [vmem:[#allocation152_spill] sm:$0xff]  ;;  %v7210_v49 = vld [vmem:[#allocation174_spill] sm:$0xff] }
 0x1ec   :  { %v4533_v63 = vpop.eup %4532  ;;  %4558 = vrcp.f32 %v3567_v46  ;;  %v3561_v18 = vadd.f32 1.0, %v4531_v32  ;;  %2951 = vmatprep.subr.mxu0 %v2912_v56  ;;  %3022 = vmatprep.subr.mxu1 %v2914_v6  ;;  %v3260_v7 = vmul.f32 %v6264_v16, %v5931_v61  ;;  %v3262_v37 = vmul.f32 %v6275_v54, %v5946_v38  ;;  %v7204_v61 = vld [vmem:[#allocation143_spill] sm:$0xff]  ;;  %v7208_v38 = vld [vmem:[#allocation58_spill] sm:$0xff]  ;;  %v7213_v51 = vld [vmem:[#allocation144_spill] sm:$0xff] }
 0x1ed   :  { %v4535_v19 = vpop.eup %4534  ;;  %4560 = vrcp.f32 %v3568_v15  ;;  %v3562_v24 = vadd.f32 1.0, %v4533_v63  ;;  %2952 = vmatpush1.msra.mxu0 %v2911_v35  ;;  %3023 = vmatpush1.msra.mxu1 %v2913_v23  ;;  %v3257_v16 = vmul.f32 %v7205_v29, %v7204_v61  ;;  %v3259_v50 = vmul.f32 %v7207_v36, %v7206_v53  ;;  %v7212_v11 = vld [vmem:[#allocation102_spill] sm:$0xff]  ;;  %v7214_v6 = vld [vmem:[#allocation176_spill] sm:$0xff] }
 0x1ee   :  { %v4537_v3 = vpop.eup %4536  ;;  %v3563_v45 = vadd.f32 1.0, %v4535_v19  ;;  %4562 = vrcp.f32 %v3561_v18  ;;  %2953 = vmatprep.subr.mxu0 %v2908_v28  ;;  %3024 = vmatprep.subr.mxu1 %v2910_v40  ;;  %v3256_v25 = vmul.f32 %v7210_v49, %v7209_v13  ;;  %v3258_v35 = vmul.f32 %v7214_v6, %v7213_v51  ;;  %v7215_v42 = vld [vmem:[#allocation104_spill] sm:$0xff]  ;;  %v7217_v63 = vld [vmem:[#allocation118_spill] sm:$0xff]  ;;  %v7219_v28 = vld [vmem:[#allocation77_spill] sm:$0xff] }
 0x1ef   :  { %v4539_v2 = vpop.eup %4538  ;;  %v3564_v60 = vadd.f32 1.0, %v4537_v3  ;;  %4564 = vrcp.f32 %v3562_v24  ;;  %2954 = vmatpush1.msra.mxu0 %v2907_v17  ;;  %2987 = vmatprep.mubr.f32.mxu0 %v6960_v8  ;;  %v7216_v32 = vld [vmem:[#allocation80_spill] sm:$0xff]  ;;  %v7218_v18 = vld [vmem:[#allocation122_spill] sm:$0xff]  ;;  %v7220_v40 = vld [vmem:[#allocation159_spill] sm:$0xff] }
 0x1f0   :  { %v4541_v14 = vpop.eup %4540  ;;  %4566 = vrcp.f32 %v3563_v45  ;;  %3025 = vmatpush1.msra.mxu1 %v2909_v47  ;;  %3058 = vmatprep.mubr.f32.mxu1 %v6960_v8  ;;  %v3252_v56 = vmul.f32 %v4539_v2, %v7212_v11  ;;  %v3602_v34 = vmul.f32 %v7221_v59, %v7220_v40  ;;  %v7222_v17 = vld [vmem:[#allocation158_spill] sm:$0xff]  ;;  %v7224_v47 = vld [vmem:[#allocation161_spill] sm:$0xff]  ;;  %v7229_v36 = vld [vmem:[#allocation88_spill] sm:$0xff] }
 0x1f1   :  { %v4543_v21 = vpop.eup %4542  ;;  %4568 = vrcp.f32 %v3564_v60  ;;  %3849 = vmatmul.mubr.msk.f32.vlgmr.msra.gmra.mxu0 %vm524_vm0, %v6202_v20  ;;  %3850 = vmatmul.mubr.msk.f32.vlgmr.msra.gmra.mxu1 %vm524_vm0, %v6202_v20  ;;  %v3253_v54 = vmul.f32 %v4541_v14, %v7208_v38  ;;  %v7223_v3 = vld [vmem:[#allocation178_spill] sm:$0xff]  ;;  %v7226_v14 = vld [vmem:[#allocation160_spill] sm:$0xff] }
 0x1f2   :  { %v4545_v62 = vpop.eup %4544  ;;  %4570 = vrcp.f32 %v3559_v22  ;;  %3288 = vmatprep.subr.mxu0 %v3261_v55  ;;  %3359 = vmatprep.subr.mxu1 %v3263_v57  ;;  %v3254_v46 = vmul.f32 %v4543_v21, %v7215_v42  ;;  %v3601_v45 = vmul.f32 %v7223_v3, %v7222_v17  ;;  %v7225_v55 = vld [vmem:[#allocation183_spill] sm:$0xff]  ;;  %v7231_v38 = vld [vmem:[#allocation48_spill] sm:$0xff] }
 0x1f3   :  { %v4547_v58 = vpop.eup %4546  ;;  %3289 = vmatpush1.msra.mxu0 %v3260_v7  ;;  %v3255_v31 = vmul.f32 %v4545_v62, %v7211_v27  ;;  %3360 = vmatpush1.msra.mxu1 %v3262_v37  ;;  %v3604_v2 = vmul.f32 %v7225_v55, %v7224_v47  ;;  %v4573_v51 = vld [vmem:[%s6651_s1] sm:$0xff] }
 0x1f4   :  { %v4549_v4 = vpop.eup %4548  ;;  %3290 = vmatprep.subr.mxu0 %v3257_v16  ;;  %3361 = vmatprep.subr.mxu1 %v3259_v50  ;;  %v3248_v48 = vmul.f32 %v4547_v58, %v7217_v63  ;;  %v7233_v58 = vld [vmem:[#allocation46_spill] sm:$0xff] }
 0x1f5   :  { %v4551_v23 = vpop.eup %4550  ;;  %3291 = vmatpush1.msra.mxu0 %v3256_v25  ;;  %v3249_v15 = vmul.f32 %v4549_v4, %v7216_v32  ;;  %3362 = vmatpush1.msra.mxu1 %v3258_v35 }
 0x1f6   :  { %v4553_v22 = vpop.eup %4552  ;;  %3292 = vmatprep.subr.mxu0 %v3253_v54  ;;  %v3250_v44 = vmul.f32 %v4551_v23, %v7218_v18  ;;  %3363 = vmatprep.subr.mxu1 %v3255_v31  ;;  %v7232_v54 = vld [vmem:[#allocation166_spill] sm:$0xff] }
 0x1f7   :  { %v4555_v33 = vpop.eup %4554  ;;  %3293 = vmatpush1.msra.mxu0 %v3252_v56  ;;  %v3251_v19 = vmul.f32 %v4553_v22, %v7219_v28  ;;  %3364 = vmatpush1.msra.mxu1 %v3254_v46  ;;  %v3589_v13 = vmul.f32 %v7233_v58, %v7232_v54  ;;  %v7235_v31 = vld [vmem:[#allocation6_spill] sm:$0xff]  ;;  %v7236_v56 = vld [vmem:[#allocation5_spill] sm:$0xff] }
 0x1f8   :  { %v4557_v24 = vpop.eup %4556  ;;  %3294 = vmatprep.subr.mxu0 %v3249_v15  ;;  %3328 = vmatprep.mubr.f32.mxu0 %v6960_v8  ;;  %v3597_v57 = vmul.f32 %v4555_v33, %v6138_v41  ;;  %vm390_vm3 = vcmp.eq.s32.totalorder %v7235_v31, 0  ;;  %vm391_vm5 = vcmp.eq.s32.totalorder %v7235_v31, 1 }
 0x1f9   :  { %v4559_v39 = vpop.eup %4558  ;;  %3365 = vmatprep.subr.mxu1 %v3251_v19  ;;  %3295 = vmatpush1.msra.mxu0 %v3248_v48  ;;  %v3598_v43 = vmul.f32 %v4557_v24, %v6141_v9  ;;  %v7227_v9 = vld [vmem:[#allocation182_spill] sm:$0xff] }
 0x1fa   :  { %v4561_v52 = vpop.eup %4560  ;;  %3366 = vmatpush1.msra.mxu1 %v3250_v44  ;;  %3399 = vmatprep.mubr.f32.mxu1 %v6960_v8  ;;  %v3603_v37 = vmul.f32 %v7227_v9, %v7226_v14  ;;  %v3599_v21 = vmul.f32 %v4559_v39, %v6157_v5  ;;  %v7228_v5 = vld [vmem:[#allocation167_spill] sm:$0xff] }
 0x1fb   :  { %v4563_v10 = vpop.eup %4562  ;;  %3851 = vmatmul.mubr.msk.f32.vlgmr.msra.gmra.mxu0 %vm524_vm0, %v6202_v20  ;;  %v3600_v60 = vmul.f32 %v4561_v52, %v6170_v0  ;;  %3852 = vmatmul.mubr.msk.f32.vlgmr.msra.gmra.mxu1 %vm524_vm0, %v6202_v20  ;;  %v3590_v50 = vmul.f32 %v7229_v36, %v7228_v5 }
 0x1fc   :  { %v4565_v7 = vpop.eup %4564  ;;  %3629 = vmatprep.subr.mxu0 %v3602_v34  ;;  %3700 = vmatprep.subr.mxu1 %v3604_v2  ;;  %v3593_v29 = vmul.f32 %v4563_v10, %v6193_v26 }
 0x1fd   :  { %v4567_v62 = vpop.eup %4566  ;;  %3630 = vmatpush1.msra.mxu0 %v3601_v45  ;;  %v3594_v61 = vmul.f32 %v4565_v7, %v6211_v30  ;;  %3701 = vmatpush1.msra.mxu1 %v3603_v37  ;;  %v7230_v30 = vld [vmem:[#allocation170_spill] sm:$0xff] }
 0x1fe   :  { %v4569_v0 = vpop.eup %4568  ;;  %3631 = vmatprep.subr.mxu0 %v3598_v43  ;;  %v3595_v41 = vmul.f32 %v4567_v62, %v6224_v1  ;;  %3702 = vmatprep.subr.mxu1 %v3600_v60  ;;  %v3592_v26 = vmul.f32 %v7231_v38, %v7230_v30  ;;  %v7234_v1 = vld [vmem:[#allocation172_spill] sm:$0xff] }
 0x1ff   :  { %v4571_v16 = vpop.eup %4570  ;;  %3632 = vmatpush1.msra.mxu0 %v3597_v57  ;;  %v3596_v53 = vmul.f32 %v4569_v0, %v6236_v12  ;;  %3703 = vmatpush1.msra.mxu1 %v3599_v21  ;;  %v4608_v12 = vmov 839922192  }
 0x200   :  { %3633 = vmatprep.subr.mxu0 %v3594_v61  ;;  %v3591_v49 = vmul.f32 %v4571_v16, %v7234_v1  ;;  %3669 = vmatprep.mubr.f32.mxu0 %v6960_v8  ;;  %v51_v25 = vunpack.c.l.s4 %v4608_v12 }
 0x201   :  { %3704 = vmatprep.subr.mxu1 %v3596_v53  ;;  %3634 = vmatpush1.msra.mxu0 %v3593_v29 }
 0x202   :  { %3705 = vmatpush1.msra.mxu1 %v3595_v41  ;;  %3635 = vmatprep.subr.mxu0 %v3590_v50  ;;  %v52_v27 = vunpack.c.0.s8 %v51_v25 }
 0x203   :  { %3706 = vmatprep.subr.mxu1 %v3592_v26  ;;  %3636 = vmatpush1.msra.mxu0 %v3589_v13 }
 0x204   :  { %3707 = vmatpush1.msra.mxu1 %v3591_v49  ;;  %3740 = vmatprep.mubr.f32.mxu1 %v6960_v8  ;;  %v55_v11 = vsub.s32 %v52_v27, %v7235_v31  ;;  %v4574_v8 = vld [vmem:[%s6651_s1 + $0x8] sm:$0xff] }
 0x205   :  { %3853 = vmatmul.mubr.msk.f32.vlgmr.msra.gmra.mxu0 %vm524_vm0, %v6202_v20  ;;  %3854 = vmatmul.mubr.msk.f32.vlgmr.msra.gmra.mxu1 %vm524_vm0, %v6202_v20 }
 0x206   :  { %v56_v4 = vrot.slane %v7236_v56, %v55_v11 }
 0x208   :  { %v6417_v6 = vsub.f32 %v4573_v51, %v56_v4  ;;  %v6422_v35 = vsub.f32 %v4574_v8, %v56_v4 }
 0x20a   :  { %v6427_v23 = vcombine.high %v6417_v6, %v6417_v6  ;;  %v6432_v63 = vcombine.high %v6422_v35, %v6422_v35 }
 0x236   :  { %v594_v20 = vpop.f32.mrf.mxu0 }
 0x237   :  { %v676_v42 = vsub.f32 %v594_v20, %v6417_v6  ;;  %v665_v46 = vpop.f32.mrf.mxu1 }
 0x238   :  { %v678_v32 = vsub.f32 %v665_v46, %v6422_v35  ;;  %v596_v15 = vpop.f32.mrf.mxu0 }
 0x239   :  { %v680_v48 = vmul.f32 %v676_v42, %v676_v42  ;;  %v677_v22 = vsub.f32 %v596_v15, %v6427_v23  ;;  %v667_v18 = vpop.f32.mrf.mxu1 }
 0x23a   :  { %v682_v44 = vmul.f32 %v678_v32, %v678_v32  ;;  %v679_v33 = vsub.f32 %v667_v18, %v6432_v63 }
 0x23b   :  { %v685_v28 = vsel %vm684_vm1, %v680_v48, 0.0  ;;  %v681_v19 = vmul.f32 %v677_v22, %v677_v22 }
 0x23c   :  { %v686_v24 = vrot.slane %v685_v28, 4  ;;  %v699_v39 = vsel %vm684_vm1, %v682_v44, 0.0  ;;  %v683_v52 = vmul.f32 %v679_v33, %v679_v33 }
 0x23d   :  { %v700_v40 = vrot.slane %v699_v39, 4  ;;  %v692_v59 = vsel %vm684_vm1, %v681_v19, 0.0 }
 0x23e   :  { %v687_v34 = vadd.f32 %v686_v24, %v685_v28  ;;  %v693_v17 = vrot.slane %v692_v59, 4  ;;  %v706_v3 = vsel %vm684_vm1, %v683_v52, 0.0 }
 0x23f   :  { %v701_v45 = vadd.f32 %v700_v40, %v699_v39  ;;  %v707_v43 = vrot.slane %v706_v3, 4 }
 0x240   :  { %v688_v10 = vrot.slane %v687_v34, 2  ;;  %v694_v47 = vadd.f32 %v693_v17, %v692_v59 }
 0x241   :  { %v702_v55 = vrot.slane %v701_v45, 2  ;;  %v708_v2 = vadd.f32 %v707_v43, %v706_v3 }
 0x242   :  { %v689_v60 = vadd.f32 %v688_v10, %v687_v34  ;;  %v695_v57 = vrot.slane %v694_v47, 2 }
 0x243   :  { %v703_v7 = vadd.f32 %v702_v55, %v701_v45  ;;  %v709_v14 = vrot.slane %v708_v2, 2 }
 0x244   :  { %v696_v9 = vadd.f32 %v695_v57, %v694_v47  ;;  %v690_v37 = vrot.slane %v689_v60, 1 }
 0x245   :  { %v710_v21 = vadd.f32 %v709_v14, %v708_v2  ;;  %v704_v62 = vrot.slane %v703_v7, 1 }
 0x246   :  { %v691_v61 = vadd.f32 %v690_v37, %v689_v60  ;;  %v697_v29 = vrot.slane %v696_v9, 1 }
 0x247   :  { %v705_v0 = vadd.f32 %v704_v62, %v703_v7  ;;  %v711_v41 = vrot.slane %v710_v21, 1 }
 0x248   :  { %v698_v16 = vadd.f32 %v697_v29, %v696_v9  ;;  %v715_v5 = vsel %vm714_vm2, %v691_v61, 0.0 }
 0x249   :  { %v712_v53 = vadd.f32 %v711_v41, %v710_v21  ;;  %v732_v50 = vsel %vm714_vm2, %v705_v0, 0.0 }
 0x24a   :  { %v716_v36 = vsel %vm714_vm2, %v698_v16, 0.0 }
 0x24b   :  { %v733_v30 = vsel %vm714_vm2, %v712_v53, 0.0  ;;  %v717_v38 = vadd.f32 %v716_v36, %v715_v5 }
 0x24c   :  { %v734_v26 = vadd.f32 %v733_v30, %v732_v50 }
 0x24d   :  { %718 = vadd.xlane.f32.xlu1 %v717_v38 }
 0x24e   :  { %735 = vadd.xlane.f32.xlu0 %v734_v26 }
 0x274   :  { %v943_v54 = vpop.f32.mrf.mxu0 }
 0x275   :  { %v1019_v58 = vsub.f32 %v943_v54, %v6417_v6  ;;  %v1014_v13 = vpop.f32.mrf.mxu1 }
 0x276   :  { %v1021_v1 = vsub.f32 %v1014_v13, %v6422_v35  ;;  %v945_v49 = vpop.f32.mrf.mxu0 }
 0x277   :  { %v1023_v12 = vmul.f32 %v1019_v58, %v1019_v58  ;;  %v1020_v25 = vsub.f32 %v945_v49, %v6427_v23  ;;  %v1016_v27 = vpop.f32.mrf.mxu1 }
 0x278   :  { %v1025_v11 = vmul.f32 %v1021_v1, %v1021_v1  ;;  %v1022_v56 = vsub.f32 %v1016_v27, %v6432_v63 }
 0x279   :  { %v1027_v4 = vsel %vm684_vm1, %v1023_v12, 0.0  ;;  %v1024_v51 = vmul.f32 %v1020_v25, %v1020_v25 }
 0x27a   :  { %v1028_v8 = vrot.slane %v1027_v4, 4  ;;  %v1041_v20 = vsel %vm684_vm1, %v1025_v11, 0.0  ;;  %v1026_v42 = vmul.f32 %v1022_v56, %v1022_v56 }
 0x27b   :  { %v1042_v46 = vrot.slane %v1041_v20, 4  ;;  %v1034_v32 = vsel %vm684_vm1, %v1024_v51, 0.0 }
 0x27c   :  { %v1029_v15 = vadd.f32 %v1028_v8, %v1027_v4  ;;  %v1035_v48 = vrot.slane %v1034_v32, 4  ;;  %v1048_v22 = vsel %vm684_vm1, %v1026_v42, 0.0 }
 0x27d   :  { %v1043_v18 = vadd.f32 %v1042_v46, %v1041_v20  ;;  %v1049_v44 = vrot.slane %v1048_v22, 4 }
 0x27e   :  { %v1030_v33 = vrot.slane %v1029_v15, 2  ;;  %v1036_v28 = vadd.f32 %v1035_v48, %v1034_v32  ;;  %v1284_v19 = vpop.f32.mrf.mxu0 }
 0x27f   :  { %v1044_v24 = vrot.slane %v1043_v18, 2  ;;  %v1050_v39 = vadd.f32 %v1049_v44, %v1048_v22  ;;  %v1360_v52 = vsub.f32 %v1284_v19, %v6417_v6  ;;  %v1355_v40 = vpop.f32.mrf.mxu1 }
 0x280   :  { %v1031_v59 = vadd.f32 %v1030_v33, %v1029_v15  ;;  %v1037_v34 = vrot.slane %v1036_v28, 2  ;;  %v1362_v17 = vsub.f32 %v1355_v40, %v6422_v35  ;;  %v1286_v3 = vpop.f32.mrf.mxu0 }
 0x281   :  { %v1045_v45 = vadd.f32 %v1044_v24, %v1043_v18  ;;  %v1051_v43 = vrot.slane %v1050_v39, 2  ;;  %v1364_v10 = vmul.f32 %v1360_v52, %v1360_v52  ;;  %v1361_v47 = vsub.f32 %v1286_v3, %v6427_v23  ;;  %v1357_v55 = vpop.f32.mrf.mxu1 }
 0x282   :  { %v1038_v2 = vadd.f32 %v1037_v34, %v1036_v28  ;;  %v1366_v60 = vmul.f32 %v1362_v17, %v1362_v17  ;;  %v1363_v57 = vsub.f32 %v1357_v55, %v6432_v63  ;;  %v1032_v7 = vrot.slane %v1031_v59, 1 }
 0x283   :  { %v1052_v14 = vadd.f32 %v1051_v43, %v1050_v39  ;;  %v1368_v9 = vsel %vm684_vm1, %v1364_v10, 0.0  ;;  %v1365_v37 = vmul.f32 %v1361_v47, %v1361_v47  ;;  %v1046_v21 = vrot.slane %v1045_v45, 1 }
 0x284   :  { %v1369_v62 = vrot.slane %v1368_v9, 4  ;;  %v1382_v61 = vsel %vm684_vm1, %v1366_v60, 0.0  ;;  %v1367_v29 = vmul.f32 %v1363_v57, %v1363_v57  ;;  %v1033_v0 = vadd.f32 %v1032_v7, %v1031_v59 }
 0x285   :  { %v1383_v41 = vrot.slane %v1382_v61, 4  ;;  %v1375_v16 = vsel %vm684_vm1, %v1365_v37, 0.0  ;;  %v1039_v53 = vrot.slane %v1038_v2, 1  ;;  %v1047_v5 = vadd.f32 %v1046_v21, %v1045_v45 }
 0x286   :  { %v1370_v36 = vadd.f32 %v1369_v62, %v1368_v9  ;;  %v1376_v50 = vrot.slane %v1375_v16, 4  ;;  %v1389_v30 = vsel %vm684_vm1, %v1367_v29, 0.0  ;;  %v1053_v58 = vrot.slane %v1052_v14, 1 }
 0x287   :  { %v1384_v38 = vadd.f32 %v1383_v41, %v1382_v61  ;;  %v1390_v26 = vrot.slane %v1389_v30, 4  ;;  %v1040_v54 = vadd.f32 %v1039_v53, %v1038_v2  ;;  %v1056_v12 = vsel %vm714_vm2, %v1033_v0, 0.0 }
 0x288   :  { %v1371_v13 = vrot.slane %v1370_v36, 2  ;;  %v1377_v1 = vadd.f32 %v1376_v50, %v1375_v16  ;;  %v1625_v49 = vpop.f32.mrf.mxu0  ;;  %v1073_v25 = vsel %vm714_vm2, %v1047_v5, 0.0  ;;  %v1054_v18 = vadd.f32 %v1053_v58, %v1052_v14 }
 0x289   :  { %v1385_v27 = vrot.slane %v1384_v38, 2  ;;  %v1391_v11 = vadd.f32 %v1390_v26, %v1389_v30  ;;  %v1701_v56 = vsub.f32 %v1625_v49, %v6417_v6  ;;  %v1696_v4 = vpop.f32.mrf.mxu1  ;;  %v1057_v51 = vsel %vm714_vm2, %v1040_v54, 0.0 }
 0x28a   :  { %v1372_v8 = vadd.f32 %v1371_v13, %v1370_v36  ;;  %v1378_v20 = vrot.slane %v1377_v1, 2  ;;  %v1703_v42 = vsub.f32 %v1696_v4, %v6422_v35  ;;  %v1058_v46 = vadd.f32 %v1057_v51, %v1056_v12  ;;  %v1627_v32 = vpop.f32.mrf.mxu0 }
 0x28b   :  { %v1386_v15 = vadd.f32 %v1385_v27, %v1384_v38  ;;  %v1392_v48 = vrot.slane %v1391_v11, 2  ;;  %v1705_v22 = vmul.f32 %v1701_v56, %v1701_v56  ;;  %v1698_v44 = vpop.f32.mrf.mxu1  ;;  %v1702_v19 = vsub.f32 %v1627_v32, %v6427_v23 }
 0x28c   :  { %v1379_v33 = vadd.f32 %v1378_v20, %v1377_v1  ;;  %v1707_v28 = vmul.f32 %v1703_v42, %v1703_v42  ;;  %1059 = vadd.xlane.f32.xlu0 %v1058_v46  ;;  %v1704_v24 = vsub.f32 %v1698_v44, %v6432_v63  ;;  %v1074_v40 = vsel %vm714_vm2, %v1054_v18, 0.0 }
 0x28d   :  { %v1393_v39 = vadd.f32 %v1392_v48, %v1391_v11  ;;  %v1709_v52 = vsel %vm684_vm1, %v1705_v22, 0.0  ;;  %v1387_v59 = vrot.slane %v1386_v15, 1  ;;  %v1075_v3 = vadd.f32 %v1074_v40, %v1073_v25 }
 0x28e   :  { %v1710_v34 = vrot.slane %v1709_v52, 4  ;;  %v1723_v17 = vsel %vm684_vm1, %v1707_v28, 0.0  ;;  %v1706_v45 = vmul.f32 %v1702_v19, %v1702_v19  ;;  %v1708_v10 = vmul.f32 %v1704_v24, %v1704_v24 }
 0x28f   :  { %v1724_v43 = vrot.slane %v1723_v17, 4  ;;  %v1388_v47 = vadd.f32 %v1387_v59, %v1386_v15  ;;  %v1394_v55 = vrot.slane %v1393_v39, 1  ;;  %1076 = vadd.xlane.f32.xlu1 %v1075_v3  ;;  %v1373_v57 = vrot.slane %v1372_v8, 1 }
 0x290   :  { %v1711_v2 = vadd.f32 %v1710_v34, %v1709_v52  ;;  %v1716_v60 = vsel %vm684_vm1, %v1706_v45, 0.0  ;;  %v1380_v7 = vrot.slane %v1379_v33, 1  ;;  %v1730_v37 = vsel %vm684_vm1, %v1708_v10, 0.0 }
 0x291   :  { %v1725_v14 = vadd.f32 %v1724_v43, %v1723_v17  ;;  %v1717_v9 = vrot.slane %v1716_v60, 4  ;;  %v1395_v21 = vadd.f32 %v1394_v55, %v1393_v39  ;;  %v1731_v61 = vrot.slane %v1730_v37, 4 }
 0x292   :  { %v1712_v62 = vrot.slane %v1711_v2, 2  ;;  %v1414_v0 = vsel %vm714_vm2, %v1388_v47, 0.0  ;;  %v1374_v41 = vadd.f32 %v1373_v57, %v1372_v8  ;;  %v1381_v12 = vadd.f32 %v1380_v7, %v1379_v33 }
 0x293   :  { %v1966_v29 = vpop.f32.mrf.mxu0  ;;  %v1726_v16 = vrot.slane %v1725_v14, 2  ;;  %v1718_v53 = vadd.f32 %v1717_v9, %v1716_v60  ;;  %v2037_v36 = vpop.f32.mrf.mxu1  ;;  %v1415_v50 = vsel %vm714_vm2, %v1395_v21, 0.0  ;;  %v1732_v38 = vadd.f32 %v1731_v61, %v1730_v37 }
 0x294   :  { %v2042_v5 = vsub.f32 %v1966_v29, %v6417_v6  ;;  %v1713_v30 = vadd.f32 %v1712_v62, %v1711_v2  ;;  %v2044_v26 = vsub.f32 %v2037_v36, %v6422_v35  ;;  %v1416_v54 = vadd.f32 %v1415_v50, %v1414_v0 }
 0x295   :  { %v1968_v58 = vpop.f32.mrf.mxu0  ;;  %v1727_v13 = vadd.f32 %v1726_v16, %v1725_v14  ;;  %v1719_v1 = vrot.slane %v1718_v53, 2  ;;  %v2039_v25 = vpop.f32.mrf.mxu1  ;;  %v1733_v27 = vrot.slane %v1732_v38, 2  ;;  %v1397_v56 = vsel %vm714_vm2, %v1374_v41, 0.0 }
 0x296   :  { %v2046_v49 = vmul.f32 %v2042_v5, %v2042_v5  ;;  %v2048_v11 = vmul.f32 %v2044_v26, %v2044_v26  ;;  %1417 = vadd.xlane.f32.xlu1 %v1416_v54  ;;  %v2043_v4 = vsub.f32 %v1968_v58, %v6427_v23  ;;  %v1398_v20 = vsel %vm714_vm2, %v1381_v12, 0.0 }
 0x297   :  { %v1720_v51 = vadd.f32 %v1719_v1, %v1718_v53  ;;  %v2045_v42 = vsub.f32 %v2039_v25, %v6432_v63  ;;  %v1734_v46 = vadd.f32 %v1733_v27, %v1732_v38  ;;  %v1399_v48 = vadd.f32 %v1398_v20, %v1397_v56 }
 0x298   :  { %v2050_v8 = vsel %vm684_vm1, %v2046_v49, 0.0  ;;  %v2064_v15 = vsel %vm684_vm1, %v2048_v11, 0.0  ;;  %v2047_v18 = vmul.f32 %v2043_v4, %v2043_v4  ;;  %v1728_v33 = vrot.slane %v1727_v13, 1 }
 0x299   :  { %v2051_v32 = vrot.slane %v2050_v8, 4  ;;  %v2065_v22 = vrot.slane %v2064_v15, 4  ;;  %v2049_v44 = vmul.f32 %v2045_v42, %v2045_v42  ;;  %1400 = vadd.xlane.f32.xlu0 %v1399_v48  ;;  %v1735_v19 = vrot.slane %v1734_v46, 1 }
 0x29a   :  { %v1714_v24 = vrot.slane %v1713_v30, 1  ;;  %v1721_v39 = vrot.slane %v1720_v51, 1  ;;  %v2057_v40 = vsel %vm684_vm1, %v2047_v18, 0.0  ;;  %v1729_v34 = vadd.f32 %v1728_v33, %v1727_v13 }
 0x29b   :  { %v2052_v28 = vadd.f32 %v2051_v32, %v2050_v8  ;;  %v2066_v52 = vadd.f32 %v2065_v22, %v2064_v15  ;;  %v2071_v59 = vsel %vm684_vm1, %v2049_v44, 0.0  ;;  %v2058_v3 = vrot.slane %v2057_v40, 4 }
 0x29c   :  { %v2072_v45 = vrot.slane %v2071_v59, 4  ;;  %v1736_v10 = vadd.f32 %v1735_v19, %v1734_v46  ;;  %v1755_v60 = vsel %vm714_vm2, %v1729_v34, 0.0  ;;  %v1715_v57 = vadd.f32 %v1714_v24, %v1713_v30 }
 0x29d   :  { %v2053_v17 = vrot.slane %v2052_v28, 2  ;;  %v2307_v43 = vpop.f32.mrf.mxu0  ;;  %v2067_v47 = vrot.slane %v2066_v52, 2  ;;  %v2378_v2 = vpop.f32.mrf.mxu1  ;;  %v2059_v14 = vadd.f32 %v2058_v3, %v2057_v40  ;;  %v1722_v0 = vadd.f32 %v1721_v39, %v1720_v51 }
 0x29e   :  { %v2383_v55 = vsub.f32 %v2307_v43, %v6417_v6  ;;  %v2073_v9 = vadd.f32 %v2072_v45, %v2071_v59  ;;  %v2385_v37 = vsub.f32 %v2378_v2, %v6422_v35  ;;  %v1756_v29 = vsel %vm714_vm2, %v1736_v10, 0.0 }
 0x29f   :  { %v2054_v7 = vadd.f32 %v2053_v17, %v2052_v28  ;;  %v2309_v21 = vpop.f32.mrf.mxu0  ;;  %v2068_v62 = vadd.f32 %v2067_v47, %v2066_v52  ;;  %v2060_v41 = vrot.slane %v2059_v14, 2  ;;  %v1757_v5 = vadd.f32 %v1756_v29, %v1755_v60  ;;  %v2380_v36 = vpop.f32.mrf.mxu1 }
 0x2a0   :  { %v2387_v61 = vmul.f32 %v2383_v55, %v2383_v55  ;;  %v2074_v16 = vrot.slane %v2073_v9, 2  ;;  %v2389_v53 = vmul.f32 %v2385_v37, %v2385_v37  ;;  %v1738_v30 = vsel %vm714_vm2, %v1715_v57, 0.0 }
 0x2a1   :  { %v1739_v38 = vsel %vm714_vm2, %v1722_v0, 0.0  ;;  %v2384_v26 = vsub.f32 %v2309_v21, %v6427_v23  ;;  %v2061_v54 = vadd.f32 %v2060_v41, %v2059_v14  ;;  %1758 = vadd.xlane.f32.xlu1 %v1757_v5  ;;  %v2386_v27 = vsub.f32 %v2380_v36, %v6432_v63 }
 0x2a2   :  { %v2391_v50 = vsel %vm684_vm1, %v2387_v61, 0.0  ;;  %v2075_v58 = vadd.f32 %v2074_v16, %v2073_v9  ;;  %v2405_v1 = vsel %vm684_vm1, %v2389_v53, 0.0  ;;  %v1740_v12 = vadd.f32 %v1739_v38, %v1738_v30 }
 0x2a3   :  { %v2392_v13 = vrot.slane %v2391_v50, 4  ;;  %v2406_v49 = vrot.slane %v2405_v1, 4  ;;  %v2388_v25 = vmul.f32 %v2384_v26, %v2384_v26  ;;  %v2069_v56 = vrot.slane %v2068_v62, 1 }
 0x2a4   :  { %v2076_v4 = vrot.slane %v2075_v58, 1  ;;  %v2055_v51 = vrot.slane %v2054_v7, 1  ;;  %1741 = vadd.xlane.f32.xlu0 %v1740_v12  ;;  %v2390_v42 = vmul.f32 %v2386_v27, %v2386_v27  ;;  %v2062_v46 = vrot.slane %v2061_v54, 1 }
 0x2a5   :  { %v2393_v11 = vadd.f32 %v2392_v13, %v2391_v50  ;;  %v2407_v8 = vadd.f32 %v2406_v49, %v2405_v1  ;;  %v2398_v20 = vsel %vm684_vm1, %v2388_v25, 0.0  ;;  %v2070_v22 = vadd.f32 %v2069_v56, %v2068_v62 }
 0x2a6   :  { %v2399_v15 = vrot.slane %v2398_v20, 4  ;;  %v2077_v18 = vadd.f32 %v2076_v4, %v2075_v58  ;;  %v2412_v33 = vsel %vm684_vm1, %v2390_v42, 0.0  ;;  %v2056_v24 = vadd.f32 %v2055_v51, %v2054_v7 }
 0x2a7   :  { %v2394_v32 = vrot.slane %v2393_v11, 2  ;;  %v2648_v48 = vpop.f32.mrf.mxu0  ;;  %v2408_v44 = vrot.slane %v2407_v8, 2  ;;  %v2719_v19 = vpop.f32.mrf.mxu1  ;;  %v2413_v40 = vrot.slane %v2412_v33, 4  ;;  %v2096_v45 = vsel %vm714_vm2, %v2070_v22, 0.0 }
 0x2a8   :  { %v2724_v28 = vsub.f32 %v2648_v48, %v6417_v6  ;;  %v2400_v52 = vadd.f32 %v2399_v15, %v2398_v20  ;;  %v2726_v59 = vsub.f32 %v2719_v19, %v6422_v35  ;;  %v2097_v43 = vsel %vm714_vm2, %v2077_v18, 0.0 }
 0x2a9   :  { %v2395_v39 = vadd.f32 %v2394_v32, %v2393_v11  ;;  %v2650_v34 = vpop.f32.mrf.mxu0  ;;  %v2409_v17 = vadd.f32 %v2408_v44, %v2407_v8  ;;  %v2414_v47 = vadd.f32 %v2413_v40, %v2412_v33  ;;  %v2098_v2 = vadd.f32 %v2097_v43, %v2096_v45  ;;  %v2721_v60 = vpop.f32.mrf.mxu1 }
 0x2aa   :  { %v2728_v3 = vmul.f32 %v2724_v28, %v2724_v28  ;;  %v2401_v10 = vrot.slane %v2400_v52, 2  ;;  %v2730_v55 = vmul.f32 %v2726_v59, %v2726_v59  ;;  %v2063_v7 = vadd.f32 %v2062_v46, %v2061_v54 }
 0x2ab   :  { %v2079_v14 = vsel %vm714_vm2, %v2056_v24, 0.0  ;;  %v2725_v9 = vsub.f32 %v2650_v34, %v6427_v23  ;;  %v2415_v21 = vrot.slane %v2414_v47, 2  ;;  %2099 = vadd.xlane.f32.xlu1 %v2098_v2  ;;  %v2727_v16 = vsub.f32 %v2721_v60, %v6432_v63 }
 0x2ac   :  { %v2732_v57 = vsel %vm684_vm1, %v2728_v3, 0.0  ;;  %v2402_v37 = vadd.f32 %v2401_v10, %v2400_v52  ;;  %v2746_v61 = vsel %vm684_vm1, %v2730_v55, 0.0  ;;  %v2080_v0 = vsel %vm714_vm2, %v2063_v7, 0.0 }
 0x2ad   :  { %v2733_v62 = vrot.slane %v2732_v57, 4  ;;  %v2747_v29 = vrot.slane %v2746_v61, 4  ;;  %v2729_v41 = vmul.f32 %v2725_v9, %v2725_v9  ;;  %v2416_v53 = vadd.f32 %v2415_v21, %v2414_v47 }
 0x2ae   :  { %v2081_v36 = vadd.f32 %v2080_v0, %v2079_v14  ;;  %v2410_v50 = vrot.slane %v2409_v17, 1  ;;  %v2731_v26 = vmul.f32 %v2727_v16, %v2727_v16  ;;  %v2396_v54 = vrot.slane %v2395_v39, 1 }
 0x2af   :  { %v2734_v5 = vadd.f32 %v2733_v62, %v2732_v57  ;;  %v2748_v30 = vadd.f32 %v2747_v29, %v2746_v61  ;;  %v2739_v38 = vsel %vm684_vm1, %v2729_v41, 0.0  ;;  %v2417_v12 = vrot.slane %v2416_v53, 1 }
 0x2b0   :  { %2082 = vadd.xlane.f32.xlu0 %v2081_v36  ;;  %v2740_v13 = vrot.slane %v2739_v38, 4  ;;  %v2411_v49 = vadd.f32 %v2410_v50, %v2409_v17  ;;  %v2753_v27 = vsel %vm684_vm1, %v2731_v26, 0.0  ;;  %v2397_v4 = vadd.f32 %v2396_v54, %v2395_v39 }
 0x2b1   :  { %v2735_v58 = vrot.slane %v2734_v5, 2  ;;  %v2989_v1 = vpop.f32.mrf.mxu0  ;;  %v2749_v25 = vrot.slane %v2748_v30, 2  ;;  %v3060_v56 = vpop.f32.mrf.mxu1  ;;  %v2754_v20 = vrot.slane %v2753_v27, 4  ;;  %v2418_v48 = vadd.f32 %v2417_v12, %v2416_v53 }
 0x2b2   :  { %v3065_v11 = vsub.f32 %v2989_v1, %v6417_v6  ;;  %v2741_v8 = vadd.f32 %v2740_v13, %v2739_v38  ;;  %v3067_v42 = vsub.f32 %v3060_v56, %v6422_v35  ;;  %v2437_v22 = vsel %vm714_vm2, %v2411_v49, 0.0 }
 0x2b3   :  { %v2736_v51 = vadd.f32 %v2735_v58, %v2734_v5  ;;  %v2991_v46 = vpop.f32.mrf.mxu0  ;;  %v2750_v32 = vadd.f32 %v2749_v25, %v2748_v30  ;;  %v2755_v44 = vadd.f32 %v2754_v20, %v2753_v27  ;;  %v2403_v28 = vrot.slane %v2402_v37, 1  ;;  %v3062_v40 = vpop.f32.mrf.mxu1 }
 0x2b4   :  { %v3069_v15 = vmul.f32 %v3065_v11, %v3065_v11  ;;  %v2742_v18 = vrot.slane %v2741_v8, 2  ;;  %v3071_v33 = vmul.f32 %v3067_v42, %v3067_v42  ;;  %v2438_v24 = vsel %vm714_vm2, %v2418_v48, 0.0 }
 0x2b5   :  { %v2420_v39 = vsel %vm714_vm2, %v2397_v4, 0.0  ;;  %v3066_v52 = vsub.f32 %v2991_v46, %v6427_v23  ;;  %v2756_v34 = vrot.slane %v2755_v44, 2  ;;  %v2439_v43 = vadd.f32 %v2438_v24, %v2437_v22 }
 0x2b6   :  { %v3073_v19 = vsel %vm684_vm1, %v3069_v15, 0.0  ;;  %v2743_v59 = vadd.f32 %v2742_v18, %v2741_v8  ;;  %v3087_v3 = vsel %vm684_vm1, %v3071_v33, 0.0  ;;  %v2404_v10 = vadd.f32 %v2403_v28, %v2402_v37 }
 0x2b7   :  { %v3074_v17 = vrot.slane %v3073_v19, 4  ;;  %v3088_v45 = vrot.slane %v3087_v3, 4  ;;  %v3070_v47 = vmul.f32 %v3066_v52, %v3066_v52  ;;  %v2757_v55 = vadd.f32 %v2756_v34, %v2755_v44  ;;  %2440 = vadd.xlane.f32.xlu1 %v2439_v43 }
 0x2b8   :  { %v3068_v60 = vsub.f32 %v3062_v40, %v6432_v63  ;;  %v2751_v57 = vrot.slane %v2750_v32, 1  ;;  %v2421_v14 = vsel %vm714_vm2, %v2404_v10, 0.0  ;;  %v2737_v21 = vrot.slane %v2736_v51, 1 }
 0x2b9   :  { %v3075_v2 = vadd.f32 %v3074_v17, %v3073_v19  ;;  %v3089_v7 = vadd.f32 %v3088_v45, %v3087_v3  ;;  %v3080_v9 = vsel %vm684_vm1, %v3070_v47, 0.0  ;;  %v2422_v61 = vadd.f32 %v2421_v14, %v2420_v39 }
 0x2ba   :  { %v3081_v29 = vrot.slane %v3080_v9, 4  ;;  %v3072_v0 = vmul.f32 %v3068_v60, %v3068_v60  ;;  %v2752_v5 = vadd.f32 %v2751_v57, %v2750_v32  ;;  %v2758_v36 = vrot.slane %v2757_v55, 1 }
 0x2bb   :  { %v3076_v62 = vrot.slane %v3075_v2, 2  ;;  %v3330_v41 = vpop.f32.mrf.mxu0  ;;  %v3090_v16 = vrot.slane %v3089_v7, 2  ;;  %v3401_v53 = vpop.f32.mrf.mxu1  ;;  %2423 = vadd.xlane.f32.xlu0 %v2422_v61  ;;  %v2738_v27 = vadd.f32 %v2737_v21, %v2736_v51  ;;  %v2744_v8 = vrot.slane %v2743_v59, 1 }
 0x2bc   :  { %v3406_v37 = vsub.f32 %v3330_v41, %v6417_v6  ;;  %v3082_v30 = vadd.f32 %v3081_v29, %v3080_v9  ;;  %v3094_v38 = vsel %vm684_vm1, %v3072_v0, 0.0  ;;  %v3408_v26 = vsub.f32 %v3401_v53, %v6422_v35 }
 0x2bd   :  { %v3077_v50 = vadd.f32 %v3076_v62, %v3075_v2  ;;  %v3091_v54 = vadd.f32 %v3090_v16, %v3089_v7  ;;  %v3095_v58 = vrot.slane %v3094_v38, 4  ;;  %v2759_v1 = vadd.f32 %v2758_v36, %v2757_v55  ;;  %v3332_v20 = vpop.f32.mrf.mxu0  ;;  %v3403_v42 = vpop.f32.mrf.mxu1 }
 0x2be   :  { %v3410_v13 = vmul.f32 %v3406_v37, %v3406_v37  ;;  %v3083_v49 = vrot.slane %v3082_v30, 2  ;;  %v3412_v12 = vmul.f32 %v3408_v26, %v3408_v26  ;;  %v2778_v25 = vsel %vm714_vm2, %v2752_v5, 0.0 }
 0x2bf   :  { %v3096_v11 = vadd.f32 %v3095_v58, %v3094_v38  ;;  %v2779_v4 = vsel %vm714_vm2, %v2759_v1, 0.0  ;;  %v2745_v44 = vadd.f32 %v2744_v8, %v2743_v59  ;;  %v2761_v33 = vsel %vm714_vm2, %v2738_v27, 0.0 }
 0x2c0   :  { %v3414_v56 = vsel %vm684_vm1, %v3410_v13, 0.0  ;;  %v3084_v46 = vadd.f32 %v3083_v49, %v3082_v30  ;;  %v3428_v15 = vsel %vm684_vm1, %v3412_v12, 0.0  ;;  %v2780_v48 = vadd.f32 %v2779_v4, %v2778_v25 }
 0x2c1   :  { %v3415_v32 = vrot.slane %v3414_v56, 4  ;;  %v3097_v22 = vrot.slane %v3096_v11, 2  ;;  %v3429_v18 = vrot.slane %v3428_v15, 4  ;;  %v3407_v51 = vsub.f32 %v3332_v20, %v6427_v23 }
 0x2c2   :  { %2781 = vadd.xlane.f32.xlu1 %v2780_v48  ;;  %v3409_v19 = vsub.f32 %v3403_v42, %v6432_v63  ;;  %v3092_v24 = vrot.slane %v3091_v54, 1  ;;  %v2762_v40 = vsel %vm714_vm2, %v2745_v44, 0.0  ;;  %v3078_v34 = vrot.slane %v3077_v50, 1 }
 0x2c3   :  { %v3416_v28 = vadd.f32 %v3415_v32, %v3414_v56  ;;  %v3098_v39 = vadd.f32 %v3097_v22, %v3096_v11  ;;  %v3430_v52 = vadd.f32 %v3429_v18, %v3428_v15  ;;  %v2763_v3 = vadd.f32 %v2762_v40, %v2761_v33 }
 0x2c4   :  { %v3411_v45 = vmul.f32 %v3407_v51, %v3407_v51  ;;  %v3413_v43 = vmul.f32 %v3409_v19, %v3409_v19  ;;  %v3093_v2 = vadd.f32 %v3092_v24, %v3091_v54  ;;  %v3085_v36 = vrot.slane %v3084_v46, 1 }
 0x2c5   :  { %v3417_v17 = vrot.slane %v3416_v28, 2  ;;  %v3671_v10 = vpop.f32.mrf.mxu0  ;;  %v3431_v59 = vrot.slane %v3430_v52, 2  ;;  %v3742_v55 = vpop.f32.mrf.mxu1  ;;  %v3099_v60 = vrot.slane %v3098_v39, 1  ;;  %2764 = vadd.xlane.f32.xlu0 %v2763_v3 }
 0x2c6   :  { %v3747_v47 = vsub.f32 %v3671_v10, %v6417_v6  ;;  %v3421_v7 = vsel %vm684_vm1, %v3411_v45, 0.0  ;;  %v3435_v14 = vsel %vm684_vm1, %v3413_v43, 0.0  ;;  %v3749_v9 = vsub.f32 %v3742_v55, %v6422_v35 }
 0x2c7   :  { %v3418_v57 = vadd.f32 %v3417_v17, %v3416_v28  ;;  %v3432_v21 = vadd.f32 %v3431_v59, %v3430_v52  ;;  %v3422_v62 = vrot.slane %v3421_v7, 4  ;;  %v3436_v61 = vrot.slane %v3435_v14, 4  ;;  %v3673_v30 = vpop.f32.mrf.mxu0  ;;  %v3744_v38 = vpop.f32.mrf.mxu1 }
 0x2c8   :  { %v3751_v29 = vmul.f32 %v3747_v47, %v3747_v47  ;;  %v3753_v0 = vmul.f32 %v3749_v9, %v3749_v9  ;;  %v3100_v41 = vadd.f32 %v3099_v60, %v3098_v39  ;;  %v3119_v16 = vsel %vm714_vm2, %v3093_v2, 0.0 }
 0x2c9   :  { %v3079_v6 = vadd.f32 %v3078_v34, %v3077_v50  ;;  %v3423_v37 = vadd.f32 %v3422_v62, %v3421_v7  ;;  %v3437_v53 = vadd.f32 %v3436_v61, %v3435_v14  ;;  %v3086_v50 = vadd.f32 %v3085_v36, %v3084_v46 }
 0x2ca   :  { %v3755_v5 = vsel %vm684_vm1, %v3751_v29, 0.0  ;;  %v3769_v54 = vsel %vm684_vm1, %v3753_v0, 0.0  ;;  %v3120_v35 = vsel %vm714_vm2, %v3100_v41, 0.0  ;;  %v3748_v27 = vsub.f32 %v3673_v30, %v6427_v23 }
 0x2cb   :  { %v3756_v26 = vrot.slane %v3755_v5, 4  ;;  %v3102_v58 = vsel %vm714_vm2, %v3079_v6, 0.0  ;;  %v3424_v13 = vrot.slane %v3423_v37, 2  ;;  %v3438_v1 = vrot.slane %v3437_v53, 2 }
 0x2cc   :  { %v3770_v49 = vrot.slane %v3769_v54, 4  ;;  %v3121_v12 = vadd.f32 %v3120_v35, %v3119_v16  ;;  %v3750_v11 = vsub.f32 %v3744_v38, %v6432_v63  ;;  %v3433_v20 = vrot.slane %v3432_v21, 1 }
 0x2cd   :  { %v3757_v25 = vadd.f32 %v3756_v26, %v3755_v5  ;;  %v3425_v56 = vadd.f32 %v3424_v13, %v3423_v37  ;;  %v3439_v4 = vadd.f32 %v3438_v1, %v3437_v53  ;;  %v3103_v32 = vsel %vm714_vm2, %v3086_v50, 0.0 }
 0x2ce   :  { %v3771_v8 = vadd.f32 %v3770_v49, %v3769_v54  ;;  %3122 = vadd.xlane.f32.xlu1 %v3121_v12  ;;  %v3752_v15 = vmul.f32 %v3748_v27, %v3748_v27  ;;  %v3754_v48 = vmul.f32 %v3750_v11, %v3750_v11  ;;  %v3104_v18 = vadd.f32 %v3103_v32, %v3102_v58 }
 0x2cf   :  { %v3758_v42 = vrot.slane %v3757_v25, 2  ;;  %v3434_v44 = vadd.f32 %v3433_v20, %v3432_v21  ;;  %v3440_v33 = vrot.slane %v3439_v4, 1  ;;  %v3419_v63 = vrot.slane %v3418_v57, 1 }
 0x2d0   :  { %v3772_v22 = vrot.slane %v3771_v8, 2  ;;  %v3762_v46 = vsel %vm684_vm1, %v3752_v15, 0.0  ;;  %v3776_v23 = vsel %vm684_vm1, %v3754_v48, 0.0  ;;  %3105 = vadd.xlane.f32.xlu0 %v3104_v18  ;;  %v3426_v40 = vrot.slane %v3425_v56, 1 }
 0x2d1   :  { %v3759_v28 = vadd.f32 %v3758_v42, %v3757_v25  ;;  %v3763_v19 = vrot.slane %v3762_v46, 4  ;;  %v3777_v24 = vrot.slane %v3776_v23, 4  ;;  %v3441_v39 = vadd.f32 %v3440_v33, %v3439_v4 }
 0x2d2   :  { %v3773_v51 = vadd.f32 %v3772_v22, %v3771_v8  ;;  %v3420_v52 = vadd.f32 %v3419_v63, %v3418_v57  ;;  %v3460_v3 = vsel %vm714_vm2, %v3434_v44, 0.0  ;;  %v3427_v10 = vadd.f32 %v3426_v40, %v3425_v56 }
 0x2d3   :  { %v3764_v34 = vadd.f32 %v3763_v19, %v3762_v46  ;;  %v3778_v17 = vadd.f32 %v3777_v24, %v3776_v23  ;;  %v3461_v45 = vsel %vm714_vm2, %v3441_v39, 0.0  ;;  %v3760_v2 = vrot.slane %v3759_v28, 1 }
 0x2d4   :  { %v3462_v43 = vadd.f32 %v3461_v45, %v3460_v3  ;;  %v3774_v55 = vrot.slane %v3773_v51, 1  ;;  %v3443_v60 = vsel %vm714_vm2, %v3420_v52, 0.0  ;;  %v3444_v7 = vsel %vm714_vm2, %v3427_v10, 0.0 }
 0x2d5   :  { %v3765_v59 = vrot.slane %v3764_v34, 2  ;;  %v3779_v47 = vrot.slane %v3778_v17, 2  ;;  %v3445_v21 = vadd.f32 %v3444_v7, %v3443_v60  ;;  %v3761_v16 = vadd.f32 %v3760_v2, %v3759_v28 }
 0x2d6   :  { %3463 = vadd.xlane.f32.xlu1 %v3462_v43  ;;  %v719_v14 = vpop.xlane.xlu1 %718  ;;  %v3775_v0 = vadd.f32 %v3774_v55, %v3773_v51 }
 0x2d7   :  { %v3766_v57 = vadd.f32 %v3765_v59, %v3764_v34  ;;  %v3780_v9 = vadd.f32 %v3779_v47, %v3778_v17  ;;  %v736_v62 = vpop.xlane.xlu0 %735  ;;  %v720_v61 = vrot.slane %v719_v14, 4  ;;  %3446 = vadd.xlane.f32.xlu0 %v3445_v21  ;;  %v3784_v35 = vsel %vm714_vm2, %v3761_v16, 0.0 }
 0x2d8   :  { %v737_v29 = vrot.slane %v736_v62, 4  ;;  %v3801_v26 = vsel %vm714_vm2, %v3775_v0, 0.0 }
 0x2d9   :  { %v3781_v41 = vrot.slane %v3780_v9, 1  ;;  %v3767_v6 = vrot.slane %v3766_v57, 1  ;;  %v721_v37 = vadd.f32 %v720_v61, %v719_v14 }
 0x2da   :  { %v738_v53 = vadd.f32 %v737_v29, %v736_v62 }
 0x2db   :  { %v3782_v5 = vadd.f32 %v3781_v41, %v3780_v9  ;;  %v3768_v36 = vadd.f32 %v3767_v6, %v3766_v57  ;;  %v722_v30 = vrot.slane %v721_v37, 2 }
 0x2dc   :  { %v739_v38 = vrot.slane %v738_v53, 2 }
 0x2dd   :  { %v3802_v54 = vsel %vm714_vm2, %v3782_v5, 0.0  ;;  %v3785_v58 = vsel %vm714_vm2, %v3768_v36, 0.0  ;;  %v723_v49 = vadd.f32 %v722_v30, %v721_v37 }
 0x2de   :  { %v3803_v13 = vadd.f32 %v3802_v54, %v3801_v26  ;;  %v3786_v1 = vadd.f32 %v3785_v58, %v3784_v35  ;;  %v740_v12 = vadd.f32 %v739_v38, %v738_v53 }
 0x2df   :  { %v724_v25 = vrot.slane %v723_v49, 1 }
 0x2e0   :  { %3804 = vadd.xlane.f32.xlu1 %v3803_v13  ;;  %3787 = vadd.xlane.f32.xlu0 %v3786_v1  ;;  %v741_v50 = vrot.slane %v740_v12, 1 }
 0x2e1   :  { %v725_v27 = vadd.f32 %v724_v25, %v723_v49 }
 0x2e2   :  { %v742_v11 = vadd.f32 %v741_v50, %v740_v12 }
 0x2e3   :  { %3855 = vpush %v725_v27 }
 0x2e4   :  { %3857 = vpush %v742_v11 }
 0x314   :  { %s3856_s1 = spop %3855 }
 0x315   :  { %v1060_v56 = vpop.xlane.xlu0 %1059  ;;  %s3858_s26 = spop %3857  ;;  %s728_s27 = smul.f32 -0.0009765625, %s3856_s1 }
 0x316   :  { %v1061_v4 = vrot.slane %v1060_v56, 4  ;;  %s745_s5 = smul.f32 -0.0009765625, %s3858_s26 }
 0x318   :  { %v1062_v8 = vadd.f32 %v1061_v4, %v1060_v56  ;;  %v1077_v20 = vpop.xlane.xlu1 %1076 }
 0x319   :  { %v1078_v42 = vrot.slane %v1077_v20, 4 }
 0x31a   :  { %v1063_v32 = vrot.slane %v1062_v8, 2 }
 0x31b   :  { %v1079_v15 = vadd.f32 %v1078_v42, %v1077_v20 }
 0x31c   :  { %v1064_v48 = vadd.f32 %v1063_v32, %v1062_v8 }
 0x31d   :  { %v1080_v22 = vrot.slane %v1079_v15, 2 }
 0x31e   :  { %v1065_v18 = vrot.slane %v1064_v48, 1 }
 0x31f   :  { %v1418_v44 = vpop.xlane.xlu1 %1417  ;;  %v1081_v46 = vadd.f32 %v1080_v22, %v1079_v15 }
 0x320   :  { %v1419_v33 = vrot.slane %v1418_v44, 4  ;;  %v1066_v28 = vadd.f32 %v1065_v18, %v1064_v48 }
 0x321   :  { %v1082_v63 = vrot.slane %v1081_v46, 1 }
 0x322   :  { %v1420_v23 = vadd.f32 %v1419_v33, %v1418_v44  ;;  %3859 = vpush %v1066_v28  ;;  %v1401_v51 = vpop.xlane.xlu0 %1400 }
 0x323   :  { %v1402_v24 = vrot.slane %v1401_v51, 4  ;;  %v1083_v39 = vadd.f32 %v1082_v63, %v1081_v46 }
 0x324   :  { %v1421_v19 = vrot.slane %v1420_v23, 2 }
 0x325   :  { %v1403_v52 = vadd.f32 %v1402_v24, %v1401_v51  ;;  %3861 = vpush %v1083_v39 }
 0x326   :  { %v1422_v40 = vadd.f32 %v1421_v19, %v1420_v23 }
 0x327   :  { %v1404_v34 = vrot.slane %v1403_v52, 2 }
 0x328   :  { %v1423_v17 = vrot.slane %v1422_v40, 1 }
 0x329   :  { %v1405_v3 = vadd.f32 %v1404_v34, %v1403_v52 }
 0x32a   :  { %v1759_v45 = vpop.xlane.xlu1 %1758  ;;  %v1424_v59 = vadd.f32 %v1423_v17, %v1422_v40 }
 0x32b   :  { %v1760_v43 = vrot.slane %v1759_v45, 4  ;;  %v1406_v10 = vrot.slane %v1405_v3, 1 }
 0x32d   :  { %v1761_v47 = vadd.f32 %v1760_v43, %v1759_v45  ;;  %v1742_v55 = vpop.xlane.xlu0 %1741  ;;  %v1407_v2 = vadd.f32 %v1406_v10, %v1405_v3 }
 0x32e   :  { %v1743_v60 = vrot.slane %v1742_v55, 4 }
 0x32f   :  { %v1762_v7 = vrot.slane %v1761_v47, 2  ;;  %3863 = vpush %v1407_v2 }
 0x330   :  { %v1744_v14 = vadd.f32 %v1743_v60, %v1742_v55  ;;  %3865 = vpush %v1424_v59 }
 0x331   :  { %v1763_v57 = vadd.f32 %v1762_v7, %v1761_v47 }
 0x332   :  { %v1745_v9 = vrot.slane %v1744_v14, 2 }
 0x333   :  { %v1764_v21 = vrot.slane %v1763_v57, 1 }
 0x334   :  { %v2100_v62 = vpop.xlane.xlu1 %2099  ;;  %v1746_v61 = vadd.f32 %v1745_v9, %v1744_v14 }
 0x335   :  { %v2101_v29 = vrot.slane %v2100_v62, 4  ;;  %v1765_v16 = vadd.f32 %v1764_v21, %v1763_v57 }
 0x336   :  { %v1747_v0 = vrot.slane %v1746_v61, 1 }
 0x337   :  { %v2102_v41 = vadd.f32 %v2101_v29, %v2100_v62 }
 0x338   :  { %v1748_v37 = vadd.f32 %v1747_v0, %v1746_v61 }
 0x339   :  { %v2083_v6 = vpop.xlane.xlu0 %2082  ;;  %v2103_v53 = vrot.slane %v2102_v41, 2 }
 0x33a   :  { %v2084_v5 = vrot.slane %v2083_v6, 4  ;;  %3867 = vpush %v1748_v37 }
 0x33b   :  { %3869 = vpush %v1765_v16  ;;  %v2104_v30 = vadd.f32 %v2103_v53, %v2102_v41 }
 0x33c   :  { %v2085_v36 = vadd.f32 %v2084_v5, %v2083_v6 }
 0x33d   :  { %v2105_v26 = vrot.slane %v2104_v30, 1 }
 0x33e   :  { %v2086_v38 = vrot.slane %v2085_v36, 2 }
 0x33f   :  { %v2106_v1 = vadd.f32 %v2105_v26, %v2104_v30  ;;  %v7237_v26 = vlaneseq }
 0x340   :  { %v2087_v54 = vadd.f32 %v2086_v38, %v2085_v36  ;;  %v2441_v35 = vpop.xlane.xlu1 %2440 }
 0x341   :  { %v2442_v13 = vrot.slane %v2441_v35, 4 }
 0x342   :  { %v2088_v58 = vrot.slane %v2087_v54, 1 }
 0x343   :  { %v2443_v12 = vadd.f32 %v2442_v13, %v2441_v35 }
 0x344   :  { %v2089_v49 = vadd.f32 %v2088_v58, %v2087_v54  ;;  %v2424_v25 = vpop.xlane.xlu0 %2423  ;;  %v6553_v54 = vand.u32 127, %v7237_v26 }
 0x345   :  { %v2425_v50 = vrot.slane %v2424_v25, 4  ;;  %v2444_v27 = vrot.slane %v2443_v12, 2 }
 0x346   :  { %3871 = vpush %v2089_v49  ;;  %vm713_vm4 = vcmp.eq.s32.totalorder %v6553_v54, 0  ;;  %vm1055_vm7 = vcmp.eq.s32.totalorder %v6553_v54, 1  ;;  %vm1396_vm10 = vcmp.eq.s32.totalorder %v6553_v54, 2  ;;  %vm1737_vm13 = vcmp.eq.s32.totalorder %v6553_v54, 3 }
 0x347   :  { %3873 = vpush %v2106_v1  ;;  %v2426_v11 = vadd.f32 %v2425_v50, %v2424_v25  ;;  %v2445_v56 = vadd.f32 %v2444_v27, %v2443_v12  ;;  %vm6560_vm6 = vmand %vm390_vm3, %vm713_vm4  ;;  %vm2078_vm0 = vcmp.eq.s32.totalorder %v6553_v54, 4 }
 0x348   :  { %vm6567_vm8 = vmand %vm391_vm5, %vm713_vm4  ;;  %vm2419_vm4 = vcmp.eq.s32.totalorder %v6553_v54, 5 }
 0x349   :  { %v2427_v4 = vrot.slane %v2426_v11, 2  ;;  %v2446_v20 = vrot.slane %v2445_v56, 1  ;;  %vm1068_vm9 = vmand %vm390_vm3, %vm1055_vm7 }
 0x34a   :  { %vm1085_vm11 = vmand %vm391_vm5, %vm1055_vm7 }
 0x34b   :  { %v2782_v8 = vpop.xlane.xlu1 %2781  ;;  %v2428_v32 = vadd.f32 %v2427_v4, %v2426_v11  ;;  %v2447_v18 = vadd.f32 %v2446_v20, %v2445_v56  ;;  %v729_v4 = vstv %s728_s27  ;;  %v746_v20 = vstv %s745_s5  ;;  %vm1409_vm12 = vmand %vm390_vm3, %vm1396_vm10 }
 0x34c   :  { %v2783_v42 = vrot.slane %v2782_v8, 4  ;;  %vm1426_vm14 = vmand %vm391_vm5, %vm1396_vm10 }
 0x34d   :  { %v2429_v48 = vrot.slane %v2428_v32, 1  ;;  %vm1750_vm15 = vmand %vm390_vm3, %vm1737_vm13 }
 0x34e   :  { %v2784_v15 = vadd.f32 %v2783_v42, %v2782_v8  ;;  %v2765_v22 = vpop.xlane.xlu0 %2764  ;;  %vm1767_vm1 = vmand %vm391_vm5, %vm1737_vm13 }
 0x34f   :  { %v2766_v33 = vrot.slane %v2765_v22, 4  ;;  %v2430_v28 = vadd.f32 %v2429_v48, %v2428_v32  ;;  %v730_v48 = vsel %vm6560_vm6, %v729_v4, 0.0  ;;  %vm2091_vm2 = vmand %vm390_vm3, %vm2078_vm0 }
 0x350   :  { %v2785_v44 = vrot.slane %v2784_v15, 2  ;;  %vm2108_vm6 = vmand %vm391_vm5, %vm2078_vm0 }
 0x351   :  { %v2767_v46 = vadd.f32 %v2766_v33, %v2765_v22  ;;  %3875 = vpush %v2430_v28  ;;  %v747_v22 = vsel %vm6567_vm8, %v746_v20, 0.0  ;;  %vm2432_vm7 = vmand %vm390_vm3, %vm2419_vm4  ;;  %vm2760_vm8 = vcmp.eq.s32.totalorder %v6553_v54, 6 }
 0x352   :  { %v2786_v23 = vadd.f32 %v2785_v44, %v2784_v15  ;;  %3877 = vpush %v2447_v18  ;;  %v748_v44 = vadd.f32 %v747_v22, %v730_v48  ;;  %vm2773_vm10 = vmand %vm390_vm3, %vm2760_vm8 }
 0x353   :  { %v2768_v63 = vrot.slane %v2767_v46, 2  ;;  %s3860_s28 = spop %3859 }
 0x354   :  { %v2787_v51 = vrot.slane %v2786_v23, 1  ;;  %s1069_s29 = smul.f32 -0.0009765625, %s3860_s28 }
 0x355   :  { %v2769_v24 = vadd.f32 %v2768_v63, %v2767_v46 }
 0x356   :  { %v2788_v34 = vadd.f32 %v2787_v51, %v2786_v23  ;;  %s3862_s30 = spop %3861  ;;  %v1070_v15 = vstv %s1069_s29 }
 0x357   :  { %v3123_v19 = vpop.xlane.xlu1 %3122  ;;  %v2770_v52 = vrot.slane %v2769_v24, 1  ;;  %s1086_s8 = smul.f32 -0.0009765625, %s3862_s30  ;;  %v1071_v18 = vsel %vm1068_vm9, %v1070_v15, 0.0  ;;  %vm2449_vm9 = vmand %vm391_vm5, %vm2419_vm4 }
 0x358   :  { %v3124_v39 = vrot.slane %v3123_v19, 4  ;;  %v1072_v33 = vadd.f32 %v1071_v18, %v748_v44 }
 0x359   :  { %v3106_v17 = vpop.xlane.xlu0 %3105  ;;  %v2771_v3 = vadd.f32 %v2770_v52, %v2769_v24  ;;  %v1087_v28 = vstv %s1086_s8 }
 0x35a   :  { %v3125_v40 = vadd.f32 %v3124_v39, %v3123_v19  ;;  %v3107_v43 = vrot.slane %v3106_v17, 4  ;;  %v1088_v23 = vsel %vm1085_vm11, %v1087_v28, 0.0  ;;  %vm3101_vm11 = vcmp.eq.s32.totalorder %v6553_v54, 7 }
 0x35b   :  { %3879 = vpush %v2771_v3  ;;  %v1089_v51 = vadd.f32 %v1088_v23, %v1072_v33  ;;  %vm3114_vm13 = vmand %vm390_vm3, %vm3101_vm11 }
 0x35c   :  { %v3126_v45 = vrot.slane %v3125_v40, 2  ;;  %v3108_v10 = vadd.f32 %v3107_v43, %v3106_v17  ;;  %3881 = vpush %v2788_v34 }
 0x35e   :  { %v3127_v59 = vadd.f32 %v3126_v45, %v3125_v40  ;;  %v3109_v47 = vrot.slane %v3108_v10, 2 }
 0x35f   :  { %v3464_v55 = vpop.xlane.xlu1 %3463 }
 0x360   :  { %v3465_v2 = vrot.slane %v3464_v55, 4  ;;  %v3128_v60 = vrot.slane %v3127_v59, 1  ;;  %v3110_v7 = vadd.f32 %v3109_v47, %v3108_v10  ;;  %v3447_v57 = vpop.xlane.xlu0 %3446  ;;  %s3864_s7 = spop %3863 }
 0x361   :  { %v3448_v9 = vrot.slane %v3447_v57, 4  ;;  %s1410_s9 = smul.f32 -0.0009765625, %s3864_s7  ;;  %s3866_s2 = spop %3865 }
 0x362   :  { %v3466_v14 = vadd.f32 %v3465_v2, %v3464_v55  ;;  %v3111_v21 = vrot.slane %v3110_v7, 1  ;;  %v3129_v61 = vadd.f32 %v3128_v60, %v3127_v59  ;;  %s1427_s11 = smul.f32 -0.0009765625, %s3866_s2  ;;  %s4609_s2 = smov [#allocation2]  }
 0x363   :  { %v3449_v29 = vadd.f32 %v3448_v9, %v3447_v57  ;;  %v1411_v46 = vstv %s1410_s9 }
 0x364   :  { %v3467_v62 = vrot.slane %v3466_v14, 2  ;;  %v3112_v0 = vadd.f32 %v3111_v21, %v3110_v7  ;;  %v1412_v63 = vsel %vm1409_vm12, %v1411_v46, 0.0  ;;  %v1428_v24 = vstv %s1427_s11  ;;  %vm2790_vm12 = vmand %vm391_vm5, %vm2760_vm8 }
 0x365   :  { %v3450_v16 = vrot.slane %v3449_v29, 2  ;;  %v1413_v19 = vadd.f32 %v1412_v63, %v1089_v51  ;;  %v1429_v52 = vsel %vm1426_vm14, %v1428_v24, 0.0  ;;  %vm3442_vm14 = vcmp.eq.s32.totalorder %v6553_v54, 8 }
 0x366   :  { %v3468_v41 = vadd.f32 %v3467_v62, %v3466_v14  ;;  %3883 = vpush %v3112_v0  ;;  %vm3455_vm0 = vmand %vm390_vm3, %vm3442_vm14 }
 0x367   :  { %3885 = vpush %v3129_v61  ;;  %v3451_v5 = vadd.f32 %v3450_v16, %v3449_v29  ;;  %v1430_v34 = vadd.f32 %v1429_v52, %v1413_v19 }
 0x368   :  { %v3469_v6 = vrot.slane %v3468_v41, 1 }
 0x369   :  { %v3805_v37 = vpop.xlane.xlu1 %3804  ;;  %v3788_v53 = vpop.xlane.xlu0 %3787  ;;  %v3452_v38 = vrot.slane %v3451_v5, 1 }
 0x36a   :  { %v3806_v36 = vrot.slane %v3805_v37, 4  ;;  %v3789_v30 = vrot.slane %v3788_v53, 4  ;;  %v3470_v13 = vadd.f32 %v3469_v6, %v3468_v41 }
 0x36b   :  { %v3453_v1 = vadd.f32 %v3452_v38, %v3451_v5  ;;  %s3868_s10 = spop %3867 }
 0x36c   :  { %v3807_v35 = vadd.f32 %v3806_v36, %v3805_v37  ;;  %v3790_v58 = vadd.f32 %v3789_v30, %v3788_v53  ;;  %s1751_s12 = smul.f32 -0.0009765625, %s3868_s10  ;;  %s3870_s3 = spop %3869 }
 0x36d   :  { %3887 = vpush %v3453_v1  ;;  %s1768_s14 = smul.f32 -0.0009765625, %s3870_s3  ;;  %s3825_s10 = sshll.u32 %s4609_s2, 4  ;;  %s3826_s10 = int_to_ptr.vmem [resolvable:$true] %s3825_s10 }
 0x36e   :  { %v3808_v49 = vrot.slane %v3807_v35, 2  ;;  %v3791_v12 = vrot.slane %v3790_v58, 2  ;;  %3889 = vpush %v3470_v13  ;;  %v1752_v39 = vstv %s1751_s12  ;;  %s4575_s11 = scalar_lea.vmem %s3826_s10, 32  ;;  %p4580_p1 = scmp.lt.s32.totalorder %s3826_s10, %s3826_s10 }
 0x36f   :  { %v1753_v40 = vsel %vm1750_vm15, %v1752_v39, 0.0  ;;  %v1769_v3 = vstv %s1768_s14  ;;  %vm3131_vm15 = vmand %vm391_vm5, %vm3101_vm11  ;;  %p4576_p0 = scmp.ne.s32.totalorder %s3826_s10, %s4575_s11  ;;  %p4581_p2 = scmp.lt.s32.totalorder %s4575_s11, %s4575_s11 }
 0x370   :  { %v3809_v25 = vadd.f32 %v3808_v49, %v3807_v35  ;;  %v3792_v50 = vadd.f32 %v3791_v12, %v3790_v58  ;;  %v1754_v17 = vadd.f32 %v1753_v40, %v1430_v34  ;;  %v1770_v43 = vsel %vm1767_vm1, %v1769_v3, 0.0 }
 0x371   :  { %vm3783_vm1 = vcmp.eq.s32.totalorder %v6553_v54, 9  ;;  %p4582_p3 = por %p4581_p2, %p4580_p1 }
 0x372   :  { %v3793_v27 = vrot.slane %v3792_v50, 1  ;;  %v3810_v11 = vrot.slane %v3809_v25, 1  ;;  %v1771_v59 = vadd.f32 %v1770_v43, %v1754_v17  ;;  %vm3796_vm4 = vmand %vm390_vm3, %vm3783_vm1 }
 0x373   :  { %p4583_p4 = pnand %p4582_p3, %p4576_p0 }
 0x374   :  { %v3794_v42 = vadd.f32 %v3793_v27, %v3792_v50  ;;  %v3811_v32 = vadd.f32 %v3810_v11, %v3809_v25 }
 0x376   :  { %3891 = vpush %v3794_v42 }
 0x377   :  { %3893 = vpush %v3811_v32  ;;  %s3872_s13 = spop %3871 }
 0x378   :  { %s2092_s15 = smul.f32 -0.0009765625, %s3872_s13  ;;  %s3874_s16 = spop %3873 }
 0x379   :  { %s2109_s18 = smul.f32 -0.0009765625, %s3874_s16 }
 0x37a   :  { %v2093_v45 = vstv %s2092_s15 }
 0x37b   :  { %v2094_v10 = vsel %vm2091_vm2, %v2093_v45, 0.0  ;;  %v2110_v55 = vstv %s2109_s18  ;;  %vm3472_vm2 = vmand %vm391_vm5, %vm3442_vm14 }
 0x37c   :  { %v2095_v47 = vadd.f32 %v2094_v10, %v1771_v59  ;;  %v2111_v60 = vsel %vm2108_vm6, %v2110_v55, 0.0  ;;  %vm3813_vm6 = vmand %vm391_vm5, %vm3783_vm1 }
 0x37e   :  { %v2112_v14 = vadd.f32 %v2111_v60, %v2095_v47 }
 0x382   :  { %s3876_s17 = spop %3875 }
 0x383   :  { %s2433_s19 = smul.f32 -0.0009765625, %s3876_s17  ;;  %s3878_s0 = spop %3877 }
 0x384   :  { %s2450_s21 = smul.f32 -0.0009765625, %s3878_s0 }
 0x385   :  { %v2434_v2 = vstv %s2433_s19 }
 0x386   :  { %v2435_v7 = vsel %vm2432_vm7, %v2434_v2, 0.0  ;;  %v2451_v9 = vstv %s2450_s21 }
 0x387   :  { %v2436_v57 = vadd.f32 %v2435_v7, %v2112_v14  ;;  %v2452_v62 = vsel %vm2449_vm9, %v2451_v9, 0.0 }
 0x389   :  { %v2453_v29 = vadd.f32 %v2452_v62, %v2436_v57 }
 0x38c   :  { %s3880_s20 = spop %3879 }
 0x38d   :  { %s2774_s22 = smul.f32 -0.0009765625, %s3880_s20  ;;  %s3882_s4 = spop %3881 }
 0x38e   :  { %s2791_s23 = smul.f32 -0.0009765625, %s3882_s4 }
 0x38f   :  { %v2775_v21 = vstv %s2774_s22 }
 0x390   :  { %v2776_v61 = vsel %vm2773_vm10, %v2775_v21, 0.0  ;;  %v2792_v41 = vstv %s2791_s23 }
 0x391   :  { %v2777_v0 = vadd.f32 %v2776_v61, %v2453_v29  ;;  %v2793_v6 = vsel %vm2790_vm12, %v2792_v41, 0.0 }
 0x393   :  { %v2794_v53 = vadd.f32 %v2793_v6, %v2777_v0 }
 0x397   :  { %s3884_s24 = spop %3883 }
 0x398   :  { %s3115_s25 = smul.f32 -0.0009765625, %s3884_s24  ;;  %s3886_s1 = spop %3885 }
 0x399   :  { %s3132_s26 = smul.f32 -0.0009765625, %s3886_s1 }
 0x39a   :  { %v3116_v16 = vstv %s3115_s25 }
 0x39b   :  { %v3117_v37 = vsel %vm3114_vm13, %v3116_v16, 0.0  ;;  %v3133_v36 = vstv %s3132_s26 }
 0x39c   :  { %v3118_v5 = vadd.f32 %v3117_v37, %v2794_v53  ;;  %v3134_v30 = vsel %vm3131_vm15, %v3133_v36, 0.0 }
 0x39e   :  { %s3888_s27 = spop %3887  ;;  %v3135_v26 = vadd.f32 %v3134_v30, %v3118_v5 }
 0x39f   :  { %s3456_s28 = smul.f32 -0.0009765625, %s3888_s27  ;;  %s3890_s5 = spop %3889 }
 0x3a0   :  { %s3473_s29 = smul.f32 -0.0009765625, %s3890_s5 }
 0x3a1   :  { %v3457_v38 = vstv %s3456_s28 }
 0x3a2   :  { %v3458_v35 = vsel %vm3455_vm0, %v3457_v38, 0.0  ;;  %v3474_v13 = vstv %s3473_s29 }
 0x3a3   :  { %v3459_v58 = vadd.f32 %v3458_v35, %v3135_v26  ;;  %v3475_v1 = vsel %vm3472_vm2, %v3474_v13, 0.0 }
 0x3a5   :  { %v3476_v49 = vadd.f32 %v3475_v1, %v3459_v58 }
 0x3a7   :  { %s3892_s30 = spop %3891 }
 0x3a8   :  { %s3797_s7 = smul.f32 -0.0009765625, %s3892_s30  ;;  %s3894_s8 = spop %3893 }
 0x3a9   :  { %s3814_s9 = smul.f32 -0.0009765625, %s3894_s8 }
 0x3aa   :  { %v3798_v12 = vstv %s3797_s7 }
 0x3ab   :  { %v3799_v25 = vsel %vm3796_vm4, %v3798_v12, 0.0  ;;  %v3815_v50 = vstv %s3814_s9 }
 0x3ac   :  { %v3800_v54 = vadd.f32 %v3799_v25, %v3476_v49  ;;  %v3816_v27 = vsel %vm3813_vm6, %v3815_v50, 0.0 }
 0x3ae   :  { %v3817_v11 = vadd.f32 %v3816_v27, %v3800_v54 }
 0x3b0   :  { %3818 = vst [vmem:[#allocation2] sm:$0x3] %v3817_v11 }
 0x3b1   :  { %4586 = shalt.err (!%p4583_p4)
}
 0x3b2   :  { %3828 = dma.vmem_to_hbm [thread:$0]  %s3826_s10, 32, %s6656_s6, [#allocation3]  }
 0x3b3   :  { %4595 = dma.done.wait [#allocation3], 32  }
 0x3b4   :  { %4596 = vsyncadd [#allocation3], 4294967264 }
 0x3b5   :  { %3832 = vsyncpa [#allocation3], 1 }

</bundles_post_ra>
